<compile_context>
chip_gen: v5e
topology: v5e:2x2
jax: 0.10.0
libtpu: 0.0.40
codegen_flags: <defaults>
</compile_context>

<pallas_src>
import functools

import jax
import jax.numpy as jnp
from jax.experimental import pallas as pl
from jax.experimental.pallas import tpu as pltpu


NP = 128            # padded channel / lane width for every layer output
G1, K1P = 200, 32   # conv1: 14*14=196 pooled rows -> 200 ; K=25   -> 32
G2, K2P = 32, 160   # conv3:  5*5=25  pooled rows -> 32  ; K=150  -> 160


# ----------------------------- Pallas kernels -------------------------------

def _conv_pool_kernel(x_ref, w_ref, b_ref, o_ref, *, G, relu):
    """Per-image fused conv(as matmul) + bias + ReLU + 2x2 avg-pool.

    x_ref: (1, 4*G, Kp) im2col patches, pool-grouped (four (dh,dw) groups of
           G rows each; rows beyond the valid count and K beyond the valid
           width are zero-padded).
    w_ref: (Kp, 128)  b_ref: (1, 128)  o_ref: (1, G, 128)
    """
    acc = jnp.dot(x_ref[0], w_ref[...], preferred_element_type=jnp.float32)
    acc = acc + b_ref[...]
    if relu:
        acc = jnp.maximum(acc, 0.0)
    # 2x2 average pool = mean of the four pool groups.  G is a multiple of 8,
    # so every slice is sublane-aligned -> plain VPU adds, no relayout.
    pooled = (acc[0:G] + acc[G:2 * G] + acc[2 * G:3 * G] + acc[3 * G:4 * G]) * 0.25
    o_ref[0] = pooled.astype(o_ref.dtype)


def _mlp_kernel(x_ref, w5_ref, b5_ref, w6_ref, b6_ref, wo_ref, bo_ref, o_ref):
    """Fused c5 (as dense matmul) + f6 + output: three chained MXU dots."""
    h = jnp.dot(x_ref[...], w5_ref[...], preferred_element_type=jnp.float32)
    h = h + b5_ref[...]                                    # c5 (no ReLU in spec)
    h = jnp.dot(h, w6_ref[...], preferred_element_type=jnp.float32) + b6_ref[...]
    o = jnp.dot(h, wo_ref[...], preferred_element_type=jnp.float32) + bo_ref[...]
    o_ref[...] = o.astype(o_ref.dtype)


# ------------------------------ kernel wrappers ------------------------------

def conv_bias_relu_pool(patches, w, b, *, G, relu):
    """patches: (B, 4*G, Kp) -> pooled activations (B, G, 128)."""
    B, R, Kp = patches.shape
    assert R == 4 * G
    N = w.shape[1]
    kern = functools.partial(_conv_pool_kernel, G=G, relu=relu)
    flops = 2 * B * R * Kp * N + 4 * B * G * N
    bytes_accessed = 4 * (B * R * Kp + Kp * N + N + B * G * N)
    return pl.pallas_call(
        kern,
        out_shape=jax.ShapeDtypeStruct((B, G, N), jnp.float32),
        grid=(B,),
        in_specs=[pl.BlockSpec((1, R, Kp), lambda i: (i, 0, 0)),
                  pl.BlockSpec((Kp, N), lambda i: (0, 0)),
                  pl.BlockSpec((1, N), lambda i: (0, 0))],
        out_specs=pl.BlockSpec((1, G, N), lambda i: (i, 0, 0)),
        compiler_params=pltpu.CompilerParams(
            dimension_semantics=("parallel",)),
        cost_estimate=pl.CostEstimate(flops=flops, transcendentals=0,
                                      bytes_accessed=bytes_accessed),
    )(patches, w, b)


def mlp_head(x, w5, b5, w6, b6, wo, bo, *, tm_max=256):
    """x: (B, K) -> logits padded to (B, 128). Tiles the batch for large B."""
    B, K = x.shape
    if B <= tm_max:
        tm, Bp = B, B                      # full-array block (allowed)
    else:
        tm = tm_max
        Bp = ((B + tm - 1) // tm) * tm
        if Bp != B:
            x = jnp.pad(x, ((0, Bp - B), (0, 0)))
    flops = 2 * Bp * (K * NP + NP * NP + NP * NP)
    bytes_accessed = 4 * (Bp * K + K * NP + 2 * NP * NP + 3 * NP + Bp * NP)
    out = pl.pallas_call(
        _mlp_kernel,
        out_shape=jax.ShapeDtypeStruct((Bp, NP), jnp.float32),
        grid=(Bp // tm,),
        in_specs=[pl.BlockSpec((tm, K), lambda i: (i, 0)),
                  pl.BlockSpec(w5.shape, lambda i: (0, 0)),
                  pl.BlockSpec(b5.shape, lambda i: (0, 0)),
                  pl.BlockSpec(w6.shape, lambda i: (0, 0)),
                  pl.BlockSpec(b6.shape, lambda i: (0, 0)),
                  pl.BlockSpec(wo.shape, lambda i: (0, 0)),
                  pl.BlockSpec(bo.shape, lambda i: (0, 0))],
        out_specs=pl.BlockSpec((tm, NP), lambda i: (i, 0)),
        compiler_params=pltpu.CompilerParams(
            dimension_semantics=("parallel",)),
        cost_estimate=pl.CostEstimate(flops=flops, transcendentals=0,
                                      bytes_accessed=bytes_accessed),
    )(x, w5, b5, w6, b6, wo, bo)
    return out[:B]


# --------------------------- im2col + pool grouping --------------------------

def im2col_pool_grouped(x, kh, kw, oh, ow, group_rows, k_pad):
    """x: (B,H,W,C) already spatially padded for the conv.

    Returns (B, 4*group_rows, k_pad): the im2col rows of the conv output,
    reordered into the four 2x2-pool groups (dh,dw); each group is padded to
    `group_rows` (multiple of 8) rows and K is zero-padded to `k_pad`.
    Feature order within K is (kh, kw, cin), matching the weight prep below.
    """
    B, H, W, C = x.shape
    cols = [x[:, i:i + oh, j:j + ow, :] for i in range(kh) for j in range(kw)]
    pat = jnp.stack(cols, axis=3).reshape(B, oh, ow, kh * kw * C)
    K = kh * kw * C
    ph, pw = oh // 2, ow // 2
    groups = [pat[:, dh::2, dw::2, :].reshape(B, ph * pw, K)
              for dh in (0, 1) for dw in (0, 1)]
    g = jnp.stack(groups, axis=1)                              # (B, 4, ph*pw, K)
    g = jnp.pad(g, ((0, 0), (0, 0),
                    (0, group_rows - ph * pw), (0, k_pad - K)))
    return g.reshape(B, 4 * group_rows, k_pad)


# ------------------------------- parameters ----------------------------------

def init_lenet_params(key):
    """Deterministic init matching PyTorch default U(-1/sqrt(fan_in), +...)."""
    def uniform(k, shape, fan_in):
        bound = 1.0 / (fan_in ** 0.5)
        return jax.random.uniform(k, shape, jnp.float32, -bound, bound)

    ks = jax.random.split(key, 10)
    return {
        "c1_w": uniform(ks[0], (6, 1, 5, 5), 1 * 25),
        "c1_b": uniform(ks[1], (6,), 1 * 25),
        "c3_w": uniform(ks[2], (16, 6, 5, 5), 6 * 25),
        "c3_b": uniform(ks[3], (16,), 6 * 25),
        "c5_w": uniform(ks[4], (120, 16, 5, 5), 16 * 25),
        "c5_b": uniform(ks[5], (120,), 16 * 25),
        "f6_w": uniform(ks[6], (84, 120), 120),
        "f6_b": uniform(ks[7], (84,), 120),
        "out_w": uniform(ks[8], (10, 84), 84),
        "out_b": uniform(ks[9], (10,), 84),
    }


def prepare_lenet_params(params):
    """One-time weight layout prep (hoisted out of the jitted forward):
    transpose to (K, N), zero-pad K to the kernel's Kp and N (Cout) to 128."""
    f32 = jnp.float32

    def pad2(a, rows, cols):
        out = jnp.zeros((rows, cols), f32)
        return out.at[:a.shape[0], :a.shape[1]].set(a.astype(f32))

    def pad_bias(b):
        return pad2(b.reshape(1, -1), 1, NP)

    def conv_w(w, k_pad):                      # OIHW -> (KH*KW*Cin, Cout), padded
        cout, cin, kh, kw = w.shape
        wm = jnp.transpose(w, (2, 3, 1, 0)).reshape(kh * kw * cin, cout)
        return pad2(wm, k_pad, NP)

    prep = {
        "w1": conv_w(params["c1_w"], K1P), "b1": pad_bias(params["c1_b"]),
        "w2": conv_w(params["c3_w"], K2P), "b2": pad_bias(params["c3_b"]),
    }

    # c5 consumed as a dense matmul over the flattened, channel-padded pooled
    # activation of kernel B: x3[b, p*128 + c] with p in [0,32) spatial
    # (valid p<25, raster (5,5)) and c in [0,128) channel (valid c<16).
    w5 = params["c5_w"]                                   # (120, 16, 5, 5)
    w5r = jnp.transpose(w5, (2, 3, 1, 0)).reshape(25, 16, 120)   # [y*5+x, cin, cout]
    w5p = jnp.zeros((G2, NP, 120), f32).at[:25, :16, :].set(w5r)
    prep["w5"] = pad2(w5p.reshape(G2 * NP, 120), G2 * NP, NP)
    prep["b5"] = pad_bias(params["c5_b"])

    prep["w6"] = pad2(params["f6_w"].T, NP, NP)           # (120,84) -> (128,128)
    prep["b6"] = pad_bias(params["f6_b"])
    prep["wo"] = pad2(params["out_w"].T, NP, NP)          # (84,10)  -> (128,128)
    prep["bo"] = pad_bias(params["out_b"])
    return prep


# ------------------------------- forward pass ---------------------------------

@jax.jit
def lenet_forward(prep, x_nchw):
    # x_nchw: (B, 1, 28, 28) float32 (PyTorch NCHW). With Cin=1 the NCHW->NHWC
    # transpose is a pure reshape (free).
    B = x_nchw.shape[0]
    x = x_nchw.reshape(B, 28, 28, 1)

    # c1 (pad=2) + ReLU + s2 avgpool, fused.
    xp = jnp.pad(x, ((0, 0), (2, 2), (2, 2), (0, 0)))              # (B,32,32,1)
    p1 = im2col_pool_grouped(xp, 5, 5, 28, 28, G1, K1P)            # (B,800,32)
    a1 = conv_bias_relu_pool(p1, prep["w1"], prep["b1"], G=G1, relu=True)  # (B,200,128)

    # c3 + ReLU + s4 avgpool, fused.
    h1 = a1[:, :196, :6].reshape(B, 14, 14, 6)
    p2 = im2col_pool_grouped(h1, 5, 5, 10, 10, G2, K2P)            # (B,128,160)
    a2 = conv_bias_relu_pool(p2, prep["w2"], prep["b2"], G=G2, relu=True)  # (B,32,128)

    # c5 + flatten + f6 + output, fused (padding carried: reshape is a bitcast,
    # the padded rows/channels hit zero rows of w5).
    x3 = a2.reshape(B, G2 * NP)                                    # (B, 4096)
    logits = mlp_head(x3, prep["w5"], prep["b5"], prep["w6"], prep["b6"],
                      prep["wo"], prep["bo"])                      # (B, 128)
    return logits[:, :10]


# ------------------------------ pure-JAX reference ----------------------------

def lenet_reference(params, x_nchw):
    def conv_ref(x, w, b, pad):
        out = jax.lax.conv_general_dilated(
            x, w, window_strides=(1, 1),
            padding=((pad, pad), (pad, pad)),
            dimension_numbers=("NCHW", "OIHW", "NCHW"),
            precision=jax.lax.Precision.HIGHEST)
        return out + b.reshape(1, -1, 1, 1)

    def pool_ref(x):
        B, C, H, W = x.shape
        return x.reshape(B, C, H // 2, 2, W // 2, 2).mean(axis=(3, 5))

    x = jax.nn.relu(conv_ref(x_nchw, params["c1_w"], params["c1_b"], 2))
    x = pool_ref(x)
    x = jax.nn.relu(conv_ref(x, params["c3_w"], params["c3_b"], 0))
    x = pool_ref(x)
    x = conv_ref(x, params["c5_w"], params["c5_b"], 0)
    x = x.reshape(x.shape[0], -1)
    x = x @ params["f6_w"].T + params["f6_b"]
    x = x @ params["out_w"].T + params["out_b"]
    return x


if __name__ == "__main__":
    key = jax.random.PRNGKey(0)
    pkey, xkey = jax.random.split(key)
    params = init_lenet_params(pkey)
    prep = prepare_lenet_params(params)        # one-time layout prep (eager)
    x = jax.random.normal(xkey, (2, 1, 28, 28), dtype=jnp.float32)

    out = lenet_forward(prep, x)
    out = jax.block_until_ready(out)
    assert out.shape == (2, 10) and out.dtype == jnp.float32

    ref = lenet_reference(params, x)
    if not jnp.allclose(out, ref, atol=1e-2, rtol=1e-2):
        raise AssertionError("Pallas LeNet output mismatch vs JAX reference")

    print("KERNEL_OK")
</pallas_src>

<mosaic_0001>
module attributes {stable_mosaic.version = 11 : i64} {
  func.func @_conv_pool_kernel(%arg0: i32, %arg1: memref<1x800x32xf32, #tpu.memory_space<vmem>>, %arg2: memref<32x128xf32, #tpu.memory_space<vmem>>, %arg3: memref<1x128xf32, #tpu.memory_space<vmem>>, %arg4: memref<1x200x128xf32, #tpu.memory_space<vmem>>) attributes {dimension_semantics = [#tpu.dimension_semantics<parallel>], iteration_bounds = array<i64: 2>, scalar_prefetch = 0 : i64, scratch_operands = 0 : i64, tpu.core_type = #tpu.core_type<tc>, window_params = [{transform_indices = @transform_0, window_bounds = array<i64: 1, 800, 32>}, {pipeline_mode = #tpu.pipeline_mode<synchronous>, transform_indices = @transform_1, window_bounds = array<i64: 32, 128>}, {pipeline_mode = #tpu.pipeline_mode<synchronous>, transform_indices = @transform_2, window_bounds = array<i64: 1, 128>}, {transform_indices = @transform_3, window_bounds = array<i64: 1, 200, 128>}]} {
    %c0 = arith.constant 0 : index
    %c0_0 = arith.constant 0 : index
    %c0_1 = arith.constant 0 : index
    %0 = vector.load %arg1[%c0, %c0_0, %c0_1] : memref<1x800x32xf32, #tpu.memory_space<vmem>>, vector<1x800x32xf32>
    %1 = vector.shape_cast %0 : vector<1x800x32xf32> to vector<800x32xf32>
    %c0_2 = arith.constant 0 : index
    %c0_3 = arith.constant 0 : index
    %2 = vector.load %arg2[%c0_2, %c0_3] : memref<32x128xf32, #tpu.memory_space<vmem>>, vector<32x128xf32>
    %cst = arith.constant dense<0.000000e+00> : vector<800x128xf32>
    %3 = tpu.matmul %1, %2, %cst {dimension_numbers = #tpu.dot_dimension_numbers<[1], [0], [0], [1], [0, 0, 1, 1], [], []>} : vector<800x32xf32>, vector<32x128xf32>, vector<800x128xf32> -> vector<800x128xf32>
    %c0_4 = arith.constant 0 : index
    %c0_5 = arith.constant 0 : index
    %4 = vector.load %arg3[%c0_4, %c0_5] : memref<1x128xf32, #tpu.memory_space<vmem>>, vector<1x128xf32>
    %5 = vector.broadcast %4 : vector<1x128xf32> to vector<800x128xf32>
    %6 = arith.addf %3, %5 : vector<800x128xf32>
    %cst_6 = arith.constant 0.000000e+00 : f32
    %7 = vector.broadcast %cst_6 : f32 to vector<800x128xf32>
    %8 = arith.maximumf %6, %7 : vector<800x128xf32>
    %9 = vector.extract_strided_slice %8 {offsets = [0, 0], sizes = [200, 128], strides = [1, 1]} : vector<800x128xf32> to vector<200x128xf32>
    %10 = vector.extract_strided_slice %8 {offsets = [200, 0], sizes = [200, 128], strides = [1, 1]} : vector<800x128xf32> to vector<200x128xf32>
    %11 = arith.addf %9, %10 : vector<200x128xf32>
    %12 = vector.extract_strided_slice %8 {offsets = [400, 0], sizes = [200, 128], strides = [1, 1]} : vector<800x128xf32> to vector<200x128xf32>
    %13 = arith.addf %11, %12 : vector<200x128xf32>
    %14 = vector.extract_strided_slice %8 {offsets = [600, 0], sizes = [200, 128], strides = [1, 1]} : vector<800x128xf32> to vector<200x128xf32>
    %15 = arith.addf %13, %14 : vector<200x128xf32>
    %cst_7 = arith.constant 2.500000e-01 : f32
    %16 = vector.broadcast %cst_7 : f32 to vector<200x128xf32>
    %17 = arith.mulf %15, %16 : vector<200x128xf32>
    %c0_8 = arith.constant 0 : index
    %c0_9 = arith.constant 0 : index
    %c0_10 = arith.constant 0 : index
    %18 = vector.load %arg4[%c0_8, %c0_9, %c0_10] : memref<1x200x128xf32, #tpu.memory_space<vmem>>, vector<1x200x128xf32>
    %19 = vector.shape_cast %18 : vector<1x200x128xf32> to vector<200x128xf32>
    %20 = vector.shape_cast %17 : vector<200x128xf32> to vector<1x200x128xf32>
    tpu.vector_store %arg4[%c0_8, %c0_9, %c0_10], %20 {strides = array<i32>} : memref<1x200x128xf32, #tpu.memory_space<vmem>>, vector<1x200x128xf32>,
    return
  }
  func.func @transform_0(%arg0: i32) -> (i32, i32, i32) {
    %c0_i32 = arith.constant 0 : i32
    %c0_i32_0 = arith.constant 0 : i32
    %c0_i32_1 = arith.constant 0 : i32
    return %arg0, %c0_i32, %c0_i32_0 : i32, i32, i32
  }
  func.func @transform_1(%arg0: i32) -> (i32, i32) {
    %c0_i32 = arith.constant 0 : i32
    %c0_i32_0 = arith.constant 0 : i32
    %c0_i32_1 = arith.constant 0 : i32
    return %c0_i32, %c0_i32_0 : i32, i32
  }
  func.func @transform_2(%arg0: i32) -> (i32, i32) {
    %c0_i32 = arith.constant 0 : i32
    %c0_i32_0 = arith.constant 0 : i32
    %c0_i32_1 = arith.constant 0 : i32
    return %c0_i32, %c0_i32_0 : i32, i32
  }
  func.func @transform_3(%arg0: i32) -> (i32, i32, i32) {
    %c0_i32 = arith.constant 0 : i32
    %c0_i32_0 = arith.constant 0 : i32
    %c0_i32_1 = arith.constant 0 : i32
    return %arg0, %c0_i32, %c0_i32_0 : i32, i32, i32
  }
}

module attributes {stable_mosaic.version = 11 : i64} {
  func.func @_conv_pool_kernel(%arg0: i32, %arg1: memref<1x128x160xf32, #tpu.memory_space<vmem>>, %arg2: memref<160x128xf32, #tpu.memory_space<vmem>>, %arg3: memref<1x128xf32, #tpu.memory_space<vmem>>, %arg4: memref<1x32x128xf32, #tpu.memory_space<vmem>>) attributes {dimension_semantics = [#tpu.dimension_semantics<parallel>], iteration_bounds = array<i64: 2>, scalar_prefetch = 0 : i64, scratch_operands = 0 : i64, tpu.core_type = #tpu.core_type<tc>, window_params = [{transform_indices = @transform_0, window_bounds = array<i64: 1, 128, 160>}, {pipeline_mode = #tpu.pipeline_mode<synchronous>, transform_indices = @transform_1, window_bounds = array<i64: 160, 128>}, {pipeline_mode = #tpu.pipeline_mode<synchronous>, transform_indices = @transform_2, window_bounds = array<i64: 1, 128>}, {transform_indices = @transform_3, window_bounds = array<i64: 1, 32, 128>}]} {
    %c0 = arith.constant 0 : index
    %c0_0 = arith.constant 0 : index
    %c0_1 = arith.constant 0 : index
    %0 = vector.load %arg1[%c0, %c0_0, %c0_1] : memref<1x128x160xf32, #tpu.memory_space<vmem>>, vector<1x128x160xf32>
    %1 = vector.shape_cast %0 : vector<1x128x160xf32> to vector<128x160xf32>
    %c0_2 = arith.constant 0 : index
    %c0_3 = arith.constant 0 : index
    %2 = vector.load %arg2[%c0_2, %c0_3] : memref<160x128xf32, #tpu.memory_space<vmem>>, vector<160x128xf32>
    %cst = arith.constant dense<0.000000e+00> : vector<128x128xf32>
    %3 = tpu.matmul %1, %2, %cst {dimension_numbers = #tpu.dot_dimension_numbers<[1], [0], [0], [1], [0, 0, 1, 1], [], []>} : vector<128x160xf32>, vector<160x128xf32>, vector<128x128xf32> -> vector<128x128xf32>
    %c0_4 = arith.constant 0 : index
    %c0_5 = arith.constant 0 : index
    %4 = vector.load %arg3[%c0_4, %c0_5] : memref<1x128xf32, #tpu.memory_space<vmem>>, vector<1x128xf32>
    %5 = vector.broadcast %4 : vector<1x128xf32> to vector<128x128xf32>
    %6 = arith.addf %3, %5 : vector<128x128xf32>
    %cst_6 = arith.constant 0.000000e+00 : f32
    %7 = vector.broadcast %cst_6 : f32 to vector<128x128xf32>
    %8 = arith.maximumf %6, %7 : vector<128x128xf32>
    %9 = vector.extract_strided_slice %8 {offsets = [0, 0], sizes = [32, 128], strides = [1, 1]} : vector<128x128xf32> to vector<32x128xf32>
    %10 = vector.extract_strided_slice %8 {offsets = [32, 0], sizes = [32, 128], strides = [1, 1]} : vector<128x128xf32> to vector<32x128xf32>
    %11 = arith.addf %9, %10 : vector<32x128xf32>
    %12 = vector.extract_strided_slice %8 {offsets = [64, 0], sizes = [32, 128], strides = [1, 1]} : vector<128x128xf32> to vector<32x128xf32>
    %13 = arith.addf %11, %12 : vector<32x128xf32>
    %14 = vector.extract_strided_slice %8 {offsets = [96, 0], sizes = [32, 128], strides = [1, 1]} : vector<128x128xf32> to vector<32x128xf32>
    %15 = arith.addf %13, %14 : vector<32x128xf32>
    %cst_7 = arith.constant 2.500000e-01 : f32
    %16 = vector.broadcast %cst_7 : f32 to vector<32x128xf32>
    %17 = arith.mulf %15, %16 : vector<32x128xf32>
    %c0_8 = arith.constant 0 : index
    %c0_9 = arith.constant 0 : index
    %c0_10 = arith.constant 0 : index
    %18 = vector.load %arg4[%c0_8, %c0_9, %c0_10] : memref<1x32x128xf32, #tpu.memory_space<vmem>>, vector<1x32x128xf32>
    %19 = vector.shape_cast %18 : vector<1x32x128xf32> to vector<32x128xf32>
    %20 = vector.shape_cast %17 : vector<32x128xf32> to vector<1x32x128xf32>
    tpu.vector_store %arg4[%c0_8, %c0_9, %c0_10], %20 {strides = array<i32>} : memref<1x32x128xf32, #tpu.memory_space<vmem>>, vector<1x32x128xf32>,
    return
  }
  func.func @transform_0(%arg0: i32) -> (i32, i32, i32) {
    %c0_i32 = arith.constant 0 : i32
    %c0_i32_0 = arith.constant 0 : i32
    %c0_i32_1 = arith.constant 0 : i32
    return %arg0, %c0_i32, %c0_i32_0 : i32, i32, i32
  }
  func.func @transform_1(%arg0: i32) -> (i32, i32) {
    %c0_i32 = arith.constant 0 : i32
    %c0_i32_0 = arith.constant 0 : i32
    %c0_i32_1 = arith.constant 0 : i32
    return %c0_i32, %c0_i32_0 : i32, i32
  }
  func.func @transform_2(%arg0: i32) -> (i32, i32) {
    %c0_i32 = arith.constant 0 : i32
    %c0_i32_0 = arith.constant 0 : i32
    %c0_i32_1 = arith.constant 0 : i32
    return %c0_i32, %c0_i32_0 : i32, i32
  }
  func.func @transform_3(%arg0: i32) -> (i32, i32, i32) {
    %c0_i32 = arith.constant 0 : i32
    %c0_i32_0 = arith.constant 0 : i32
    %c0_i32_1 = arith.constant 0 : i32
    return %arg0, %c0_i32, %c0_i32_0 : i32, i32, i32
  }
}

module attributes {stable_mosaic.version = 11 : i64} {
  func.func @_mlp_kernel(%arg0: i32, %arg1: memref<2x4096xf32, #tpu.memory_space<vmem>>, %arg2: memref<4096x128xf32, #tpu.memory_space<vmem>>, %arg3: memref<1x128xf32, #tpu.memory_space<vmem>>, %arg4: memref<128x128xf32, #tpu.memory_space<vmem>>, %arg5: memref<1x128xf32, #tpu.memory_space<vmem>>, %arg6: memref<128x128xf32, #tpu.memory_space<vmem>>, %arg7: memref<1x128xf32, #tpu.memory_space<vmem>>, %arg8: memref<2x128xf32, #tpu.memory_space<vmem>>) attributes {dimension_semantics = [#tpu.dimension_semantics<parallel>], iteration_bounds = array<i64: 1>, scalar_prefetch = 0 : i64, scratch_operands = 0 : i64, tpu.core_type = #tpu.core_type<tc>, window_params = [{transform_indices = @transform_0, window_bounds = array<i64: 2, 4096>}, {pipeline_mode = #tpu.pipeline_mode<synchronous>, transform_indices = @transform_1, window_bounds = array<i64: 4096, 128>}, {pipeline_mode = #tpu.pipeline_mode<synchronous>, transform_indices = @transform_2, window_bounds = array<i64: 1, 128>}, {pipeline_mode = #tpu.pipeline_mode<synchronous>, transform_indices = @transform_3, window_bounds = array<i64: 128, 128>}, {pipeline_mode = #tpu.pipeline_mode<synchronous>, transform_indices = @transform_4, window_bounds = array<i64: 1, 128>}, {pipeline_mode = #tpu.pipeline_mode<synchronous>, transform_indices = @transform_5, window_bounds = array<i64: 128, 128>}, {pipeline_mode = #tpu.pipeline_mode<synchronous>, transform_indices = @transform_6, window_bounds = array<i64: 1, 128>}, {transform_indices = @transform_7, window_bounds = array<i64: 2, 128>}]} {
    %c0 = arith.constant 0 : index
    %c0_0 = arith.constant 0 : index
    %0 = vector.load %arg1[%c0, %c0_0] : memref<2x4096xf32, #tpu.memory_space<vmem>>, vector<2x4096xf32>
    %c0_1 = arith.constant 0 : index
    %c0_2 = arith.constant 0 : index
    %1 = vector.load %arg2[%c0_1, %c0_2] : memref<4096x128xf32, #tpu.memory_space<vmem>>, vector<4096x128xf32>
    %cst = arith.constant dense<0.000000e+00> : vector<2x128xf32>
    %2 = tpu.matmul %0, %1, %cst {dimension_numbers = #tpu.dot_dimension_numbers<[1], [0], [0], [1], [0, 0, 1, 1], [], []>} : vector<2x4096xf32>, vector<4096x128xf32>, vector<2x128xf32> -> vector<2x128xf32>
    %c0_3 = arith.constant 0 : index
    %c0_4 = arith.constant 0 : index
    %3 = vector.load %arg3[%c0_3, %c0_4] : memref<1x128xf32, #tpu.memory_space<vmem>>, vector<1x128xf32>
    %4 = vector.broadcast %3 : vector<1x128xf32> to vector<2x128xf32>
    %5 = arith.addf %2, %4 : vector<2x128xf32>
    %c0_5 = arith.constant 0 : index
    %c0_6 = arith.constant 0 : index
    %6 = vector.load %arg4[%c0_5, %c0_6] : memref<128x128xf32, #tpu.memory_space<vmem>>, vector<128x128xf32>
    %cst_7 = arith.constant dense<0.000000e+00> : vector<2x128xf32>
    %7 = tpu.matmul %5, %6, %cst_7 {dimension_numbers = #tpu.dot_dimension_numbers<[1], [0], [0], [1], [0, 0, 1, 1], [], []>} : vector<2x128xf32>, vector<128x128xf32>, vector<2x128xf32> -> vector<2x128xf32>
    %c0_8 = arith.constant 0 : index
    %c0_9 = arith.constant 0 : index
    %8 = vector.load %arg5[%c0_8, %c0_9] : memref<1x128xf32, #tpu.memory_space<vmem>>, vector<1x128xf32>
    %9 = vector.broadcast %8 : vector<1x128xf32> to vector<2x128xf32>
    %10 = arith.addf %7, %9 : vector<2x128xf32>
    %c0_10 = arith.constant 0 : index
    %c0_11 = arith.constant 0 : index
    %11 = vector.load %arg6[%c0_10, %c0_11] : memref<128x128xf32, #tpu.memory_space<vmem>>, vector<128x128xf32>
    %cst_12 = arith.constant dense<0.000000e+00> : vector<2x128xf32>
    %12 = tpu.matmul %10, %11, %cst_12 {dimension_numbers = #tpu.dot_dimension_numbers<[1], [0], [0], [1], [0, 0, 1, 1], [], []>} : vector<2x128xf32>, vector<128x128xf32>, vector<2x128xf32> -> vector<2x128xf32>
    %c0_13 = arith.constant 0 : index
    %c0_14 = arith.constant 0 : index
    %13 = vector.load %arg7[%c0_13, %c0_14] : memref<1x128xf32, #tpu.memory_space<vmem>>, vector<1x128xf32>
    %14 = vector.broadcast %13 : vector<1x128xf32> to vector<2x128xf32>
    %15 = arith.addf %12, %14 : vector<2x128xf32>
    %c0_15 = arith.constant 0 : index
    %c0_16 = arith.constant 0 : index
    %16 = vector.load %arg8[%c0_15, %c0_16] : memref<2x128xf32, #tpu.memory_space<vmem>>, vector<2x128xf32>
    tpu.vector_store %arg8[%c0_15, %c0_16], %15 {strides = array<i32>} : memref<2x128xf32, #tpu.memory_space<vmem>>, vector<2x128xf32>,
    return
  }
  func.func @transform_0(%arg0: i32) -> (i32, i32) {
    %c0_i32 = arith.constant 0 : i32
    %c0_i32_0 = arith.constant 0 : i32
    return %arg0, %c0_i32 : i32, i32
  }
  func.func @transform_1(%arg0: i32) -> (i32, i32) {
    %c0_i32 = arith.constant 0 : i32
    %c0_i32_0 = arith.constant 0 : i32
    %c0_i32_1 = arith.constant 0 : i32
    return %c0_i32, %c0_i32_0 : i32, i32
  }
  func.func @transform_2(%arg0: i32) -> (i32, i32) {
    %c0_i32 = arith.constant 0 : i32
    %c0_i32_0 = arith.constant 0 : i32
    %c0_i32_1 = arith.constant 0 : i32
    return %c0_i32, %c0_i32_0 : i32, i32
  }
  func.func @transform_3(%arg0: i32) -> (i32, i32) {
    %c0_i32 = arith.constant 0 : i32
    %c0_i32_0 = arith.constant 0 : i32
    %c0_i32_1 = arith.constant 0 : i32
    return %c0_i32, %c0_i32_0 : i32, i32
  }
  func.func @transform_4(%arg0: i32) -> (i32, i32) {
    %c0_i32 = arith.constant 0 : i32
    %c0_i32_0 = arith.constant 0 : i32
    %c0_i32_1 = arith.constant 0 : i32
    return %c0_i32, %c0_i32_0 : i32, i32
  }
  func.func @transform_5(%arg0: i32) -> (i32, i32) {
    %c0_i32 = arith.constant 0 : i32
    %c0_i32_0 = arith.constant 0 : i32
    %c0_i32_1 = arith.constant 0 : i32
    return %c0_i32, %c0_i32_0 : i32, i32
  }
  func.func @transform_6(%arg0: i32) -> (i32, i32) {
    %c0_i32 = arith.constant 0 : i32
    %c0_i32_0 = arith.constant 0 : i32
    %c0_i32_1 = arith.constant 0 : i32
    return %c0_i32, %c0_i32_0 : i32, i32
  }
  func.func @transform_7(%arg0: i32) -> (i32, i32) {
    %c0_i32 = arith.constant 0 : i32
    %c0_i32_0 = arith.constant 0 : i32
    return %arg0, %c0_i32 : i32, i32
  }
}

</mosaic_0001>

<bundles_post_ra>
// kernel: lenet_forward.3
= control target key start
LH: loop header
LB: loop body
LE: loop exit
PB: predicated region body
PF: predicated region fallthrough
CT: control target
= control target key end

     0   :  { %s1337_s12 = smov 0   ;;  %s1704_s0 = inlined_call_operand.vmem [shape: f32[2,800,32], index: 0, kind: input, shape index: {}]   ;;  %s1705_s1 = inlined_call_operand.vmem [shape: f32[32,128], index: 1, kind: input, shape index: {}]   ;;  %s1706_s2 = inlined_call_operand.vmem [shape: f32[1,128], index: 2, kind: input, shape index: {}]   ;;  %s1707_s3 = inlined_call_operand.vmem [shape: f32[2,200,128], index: 3, kind: output, shape index: {}]  }
   0x1 LB: > { %s1177_s13 = sadd.s32 4294967295, %s1315_s12   ;;  %p1181_p0 = scmp.ge.s32.totalorder %s1315_s12, 1  ;;  %s1315_s12 = sphi %s1337_s12, %s13_s12  }
   0x2   : > { %p137_p1 = scmp.lt.s32.totalorder %s1315_s12, 3 }
   0x4   : > { %p138_p2 = pnand %p1181_p0, %p137_p1 }
   0x5   : > { %p161_p3 = scmp.lt.s32.totalorder (!%p138_p2), %s1177_s13, 1 }
   0x6   : > { %141 = sbr.rel (%p138_p2) target bundleno = 354 (0x162), region = 32 }
   0xb   : > { %v274_v0 = vld [vmem:[%s1705_s1 + $0x18] sm:$0xff]  ;;  %v273_v1 = vld [vmem:[%s1705_s1 + $0x10] sm:$0xff]  ;;  %v272_v2 = vld [vmem:[%s1705_s1 + $0x8] sm:$0xff]  ;;  %s1709_s13 = smov (!%p161_p3, %s1177_s13), 1  ;;  %vm279_vm0 = vcmask 261120  }
   0xc   : > { %1287 = vmatpush.msra.mxu2 %v274_v0  ;;  %1288 = vmatpush.msra.mxu3 %v274_v0  ;;  %v271_v3 = vld [vmem:[%s1705_s1] sm:$0xff]  ;;  %s1298_s22 = smul.u32 800, %s1709_s13 }
   0xd   : > { %592 = vmatpush.msra.mxu0 %v274_v0  ;;  %1286 = vmatpush.msra.mxu1 %v274_v0  ;;  %s1299_s28 = smul.u32 200, %s1709_s13 }
   0xe   : > { %1290 = vmatpush.msra.mxu2 %v273_v1  ;;  %1291 = vmatpush.msra.mxu3 %v273_v1  ;;  %s1363_s25 = scalar_lea.vmem %s1704_s0, %s1298_s22 }
   0xf   : > { %593 = vmatpush.msra.mxu0 %v273_v1  ;;  %1289 = vmatpush.msra.mxu1 %v273_v1  ;;  %v221_v4 = vld [vmem:[%s1363_s25 + $0x190] sm:$0xff]  ;;  %v246_v5 = vld [vmem:[%s1363_s25 + $0x258] sm:$0xff]  ;;  %v171_v6 = vld [vmem:[%s1363_s25] sm:$0xff]  ;;  %s1524_s4 = scalar_lea.vmem %s1707_s3, %s1299_s28 }
  0x10   : > { %1293 = vmatpush.msra.mxu2 %v272_v2  ;;  %1294 = vmatpush.msra.mxu3 %v272_v2  ;;  %v196_v7 = vld [vmem:[%s1363_s25 + $0xc8] sm:$0xff]  ;;  %v222_v8 = vld [vmem:[%s1363_s25 + $0x198] sm:$0xff]  ;;  %v247_v9 = vld [vmem:[%s1363_s25 + $0x260] sm:$0xff] }
  0x11   : > { %594 = vmatpush.msra.mxu0 %v272_v2  ;;  %1292 = vmatpush.msra.mxu1 %v272_v2  ;;  %v172_v10 = vld [vmem:[%s1363_s25 + $0x8] sm:$0xff]  ;;  %v197_v11 = vld [vmem:[%s1363_s25 + $0xd0] sm:$0xff]  ;;  %v223_v12 = vld [vmem:[%s1363_s25 + $0x1a0] sm:$0xff] }
  0x12   : > { %1296 = vmatpush.msra.mxu2 %v271_v3  ;;  %1297 = vmatpush.msra.mxu3 %v271_v3  ;;  %v248_v13 = vld [vmem:[%s1363_s25 + $0x268] sm:$0xff]  ;;  %v173_v14 = vld [vmem:[%s1363_s25 + $0x10] sm:$0xff]  ;;  %v198_v15 = vld [vmem:[%s1363_s25 + $0xd8] sm:$0xff] }
  0x13   : > { %1234 = vmatmul.msk.f32.vlgmr.msra.gmra.mxu2 %vm279_vm0, %v221_v4  ;;  %1259 = vmatmul.msk.f32.vlgmr.msra.gmra.mxu3 %vm279_vm0, %v246_v5  ;;  %v224_v16 = vld [vmem:[%s1363_s25 + $0x1a8] sm:$0xff]  ;;  %v249_v17 = vld [vmem:[%s1363_s25 + $0x270] sm:$0xff]  ;;  %v174_v18 = vld [vmem:[%s1363_s25 + $0x18] sm:$0xff] }
  0x14   : > { %595 = vmatpush.msra.mxu0 %v271_v3  ;;  %1295 = vmatpush.msra.mxu1 %v271_v3  ;;  %v199_v19 = vld [vmem:[%s1363_s25 + $0xe0] sm:$0xff]  ;;  %v225_v20 = vld [vmem:[%s1363_s25 + $0x1b0] sm:$0xff]  ;;  %v250_v21 = vld [vmem:[%s1363_s25 + $0x278] sm:$0xff] }
  0x15   : > { %1184 = vmatmul.msk.f32.vlgmr.msra.gmra.mxu0 %vm279_vm0, %v171_v6  ;;  %1209 = vmatmul.msk.f32.vlgmr.msra.gmra.mxu1 %vm279_vm0, %v196_v7  ;;  %v175_v22 = vld [vmem:[%s1363_s25 + $0x20] sm:$0xff]  ;;  %v200_v23 = vld [vmem:[%s1363_s25 + $0xe8] sm:$0xff]  ;;  %v226_v24 = vld [vmem:[%s1363_s25 + $0x1b8] sm:$0xff] }
  0x16   : > { %v251_v25 = vld [vmem:[%s1363_s25 + $0x280] sm:$0xff]  ;;  %v176_v26 = vld [vmem:[%s1363_s25 + $0x28] sm:$0xff]  ;;  %v201_v27 = vld [vmem:[%s1363_s25 + $0xf0] sm:$0xff] }
  0x17   : > { %v227_v28 = vld [vmem:[%s1363_s25 + $0x1c0] sm:$0xff]  ;;  %v252_v29 = vld [vmem:[%s1363_s25 + $0x288] sm:$0xff]  ;;  %v177_v30 = vld [vmem:[%s1363_s25 + $0x30] sm:$0xff] }
  0x18   : > { %v202_v31 = vld [vmem:[%s1363_s25 + $0xf8] sm:$0xff]  ;;  %v228_v32 = vld [vmem:[%s1363_s25 + $0x1c8] sm:$0xff]  ;;  %v253_v33 = vld [vmem:[%s1363_s25 + $0x290] sm:$0xff] }
  0x19   : > { %v178_v34 = vld [vmem:[%s1363_s25 + $0x38] sm:$0xff]  ;;  %v203_v35 = vld [vmem:[%s1363_s25 + $0x100] sm:$0xff]  ;;  %v229_v36 = vld [vmem:[%s1363_s25 + $0x1d0] sm:$0xff] }
  0x1a   : > { %v254_v37 = vld [vmem:[%s1363_s25 + $0x298] sm:$0xff]  ;;  %v179_v38 = vld [vmem:[%s1363_s25 + $0x40] sm:$0xff]  ;;  %v204_v39 = vld [vmem:[%s1363_s25 + $0x108] sm:$0xff] }
  0x1b   : > { %1235 = vmatmul.msk.f32.gmra.mxu2 %vm279_vm0, %v222_v8  ;;  %1260 = vmatmul.msk.f32.gmra.mxu3 %vm279_vm0, %v247_v9  ;;  %v230_v40 = vld [vmem:[%s1363_s25 + $0x1d8] sm:$0xff]  ;;  %v255_v41 = vld [vmem:[%s1363_s25 + $0x2a0] sm:$0xff]  ;;  %v180_v42 = vld [vmem:[%s1363_s25 + $0x48] sm:$0xff] }
  0x1c   : > { %v205_v43 = vld [vmem:[%s1363_s25 + $0x110] sm:$0xff]  ;;  %v231_v44 = vld [vmem:[%s1363_s25 + $0x1e0] sm:$0xff]  ;;  %v256_v45 = vld [vmem:[%s1363_s25 + $0x2a8] sm:$0xff] }
  0x1d   : > { %1185 = vmatmul.msk.f32.gmra.mxu0 %vm279_vm0, %v172_v10  ;;  %1210 = vmatmul.msk.f32.gmra.mxu1 %vm279_vm0, %v197_v11  ;;  %v181_v46 = vld [vmem:[%s1363_s25 + $0x50] sm:$0xff]  ;;  %v206_v47 = vld [vmem:[%s1363_s25 + $0x118] sm:$0xff]  ;;  %v232_v48 = vld [vmem:[%s1363_s25 + $0x1e8] sm:$0xff] }
  0x1e   : > { %v257_v49 = vld [vmem:[%s1363_s25 + $0x2b0] sm:$0xff]  ;;  %v182_v50 = vld [vmem:[%s1363_s25 + $0x58] sm:$0xff]  ;;  %v207_v51 = vld [vmem:[%s1363_s25 + $0x120] sm:$0xff] }
  0x1f   : > { %v233_v52 = vld [vmem:[%s1363_s25 + $0x1f0] sm:$0xff]  ;;  %v258_v53 = vld [vmem:[%s1363_s25 + $0x2b8] sm:$0xff]  ;;  %v183_v54 = vld [vmem:[%s1363_s25 + $0x60] sm:$0xff] }
  0x20   : > { %v208_v55 = vld [vmem:[%s1363_s25 + $0x128] sm:$0xff]  ;;  %v234_v56 = vld [vmem:[%s1363_s25 + $0x1f8] sm:$0xff]  ;;  %v259_v57 = vld [vmem:[%s1363_s25 + $0x2c0] sm:$0xff] }
  0x21   : > { %v184_v58 = vld [vmem:[%s1363_s25 + $0x68] sm:$0xff]  ;;  %v209_v59 = vld [vmem:[%s1363_s25 + $0x130] sm:$0xff]  ;;  %v235_v60 = vld [vmem:[%s1363_s25 + $0x200] sm:$0xff] }
  0x22   : > { %v260_v61 = vld [vmem:[%s1363_s25 + $0x2c8] sm:$0xff]  ;;  %v185_v62 = vld [vmem:[%s1363_s25 + $0x70] sm:$0xff]  ;;  %v210_v63 = vld [vmem:[%s1363_s25 + $0x138] sm:$0xff] }
  0x23   : > { %1236 = vmatmul.msk.f32.gmra.mxu2 %vm279_vm0, %v223_v12  ;;  %1261 = vmatmul.msk.f32.gmra.mxu3 %vm279_vm0, %v248_v13  ;;  %v236_v0 = vld [vmem:[%s1363_s25 + $0x208] sm:$0xff]  ;;  %v261_v1 = vld [vmem:[%s1363_s25 + $0x2d0] sm:$0xff]  ;;  %v186_v2 = vld [vmem:[%s1363_s25 + $0x78] sm:$0xff] }
  0x24   : > { %v211_v3 = vld [vmem:[%s1363_s25 + $0x140] sm:$0xff]  ;;  %v237_v5 = vld [vmem:[%s1363_s25 + $0x210] sm:$0xff]  ;;  %v262_v6 = vld [vmem:[%s1363_s25 + $0x2d8] sm:$0xff] }
  0x25   : > { %1186 = vmatmul.msk.f32.gmra.mxu0 %vm279_vm0, %v173_v14  ;;  %1211 = vmatmul.msk.f32.gmra.mxu1 %vm279_vm0, %v198_v15  ;;  %v1496_v4 = vld [vmem:[%s1706_s2] ss:$0 sm:$0xff]  ;;  %v212_v10 = vld [vmem:[%s1363_s25 + $0x148] sm:$0xff] }
  0x26   : > { %v187_v9 = vld [vmem:[%s1363_s25 + $0x80] sm:$0xff] }
  0x2b   : > { %1237 = vmatmul.msk.f32.gmra.mxu2 %vm279_vm0, %v224_v16  ;;  %1262 = vmatmul.msk.f32.gmra.mxu3 %vm279_vm0, %v249_v17 }
  0x2d   : > { %1187 = vmatmul.msk.f32.gmra.mxu0 %vm279_vm0, %v174_v18  ;;  %1212 = vmatmul.msk.f32.gmra.mxu1 %vm279_vm0, %v199_v19 }
  0x33   : > { %1238 = vmatmul.msk.f32.gmra.mxu2 %vm279_vm0, %v225_v20  ;;  %1263 = vmatmul.msk.f32.gmra.mxu3 %vm279_vm0, %v250_v21  ;;  %v238_v20 = vld [vmem:[%s1363_s25 + $0x218] sm:$0xff]  ;;  %v263_v21 = vld [vmem:[%s1363_s25 + $0x2e0] sm:$0xff] }
  0x35   : > { %1188 = vmatmul.msk.f32.gmra.mxu0 %vm279_vm0, %v175_v22  ;;  %1213 = vmatmul.msk.f32.gmra.mxu1 %vm279_vm0, %v200_v23 }
  0x3b   : > { %1239 = vmatmul.msk.f32.gmra.mxu2 %vm279_vm0, %v226_v24  ;;  %1264 = vmatmul.msk.f32.gmra.mxu3 %vm279_vm0, %v251_v25 }
  0x3d   : > { %1189 = vmatmul.msk.f32.gmra.mxu0 %vm279_vm0, %v176_v26  ;;  %1214 = vmatmul.msk.f32.gmra.mxu1 %vm279_vm0, %v201_v27  ;;  %v188_v26 = vld [vmem:[%s1363_s25 + $0x88] sm:$0xff]  ;;  %v213_v27 = vld [vmem:[%s1363_s25 + $0x150] sm:$0xff] }
  0x43   : > { %1240 = vmatmul.msk.f32.gmra.mxu2 %vm279_vm0, %v227_v28  ;;  %1265 = vmatmul.msk.f32.gmra.mxu3 %vm279_vm0, %v252_v29 }
  0x45   : > { %1190 = vmatmul.msk.f32.gmra.mxu0 %vm279_vm0, %v177_v30  ;;  %1215 = vmatmul.msk.f32.gmra.mxu1 %vm279_vm0, %v202_v31 }
  0x4b   : > { %1241 = vmatmul.msk.f32.gmra.mxu2 %vm279_vm0, %v228_v32  ;;  %1266 = vmatmul.msk.f32.gmra.mxu3 %vm279_vm0, %v253_v33 }
  0x4d   : > { %1191 = vmatmul.msk.f32.gmra.mxu0 %vm279_vm0, %v178_v34  ;;  %1216 = vmatmul.msk.f32.gmra.mxu1 %vm279_vm0, %v203_v35 }
  0x53   : > { %1242 = vmatmul.msk.f32.gmra.mxu2 %vm279_vm0, %v229_v36  ;;  %1267 = vmatmul.msk.f32.gmra.mxu3 %vm279_vm0, %v254_v37 }
  0x55   : > { %1192 = vmatmul.msk.f32.gmra.mxu0 %vm279_vm0, %v179_v38  ;;  %1217 = vmatmul.msk.f32.gmra.mxu1 %vm279_vm0, %v204_v39 }
  0x5b   : > { %1243 = vmatmul.msk.f32.gmra.mxu2 %vm279_vm0, %v230_v40  ;;  %1268 = vmatmul.msk.f32.gmra.mxu3 %vm279_vm0, %v255_v41  ;;  %v239_v40 = vld [vmem:[%s1363_s25 + $0x220] sm:$0xff]  ;;  %v264_v41 = vld [vmem:[%s1363_s25 + $0x2e8] sm:$0xff] }
  0x5d   : > { %1193 = vmatmul.msk.f32.gmra.mxu0 %vm279_vm0, %v180_v42  ;;  %1218 = vmatmul.msk.f32.gmra.mxu1 %vm279_vm0, %v205_v43 }
  0x63   : > { %1244 = vmatmul.msk.f32.gmra.mxu2 %vm279_vm0, %v231_v44  ;;  %1269 = vmatmul.msk.f32.gmra.mxu3 %vm279_vm0, %v256_v45 }
  0x65   : > { %1194 = vmatmul.msk.f32.gmra.mxu0 %vm279_vm0, %v181_v46  ;;  %1219 = vmatmul.msk.f32.gmra.mxu1 %vm279_vm0, %v206_v47  ;;  %v189_v46 = vld [vmem:[%s1363_s25 + $0x90] sm:$0xff]  ;;  %v214_v47 = vld [vmem:[%s1363_s25 + $0x158] sm:$0xff] }
  0x6b   : > { %1245 = vmatmul.msk.f32.gmra.mxu2 %vm279_vm0, %v232_v48  ;;  %1270 = vmatmul.msk.f32.gmra.mxu3 %vm279_vm0, %v257_v49 }
  0x6d   : > { %1195 = vmatmul.msk.f32.gmra.mxu0 %vm279_vm0, %v182_v50  ;;  %1220 = vmatmul.msk.f32.gmra.mxu1 %vm279_vm0, %v207_v51 }
  0x73   : > { %1246 = vmatmul.msk.f32.gmra.mxu2 %vm279_vm0, %v233_v52  ;;  %1271 = vmatmul.msk.f32.gmra.mxu3 %vm279_vm0, %v258_v53 }
  0x75   : > { %1196 = vmatmul.msk.f32.gmra.mxu0 %vm279_vm0, %v183_v54  ;;  %1221 = vmatmul.msk.f32.gmra.mxu1 %vm279_vm0, %v208_v55 }
  0x7b   : > { %1247 = vmatmul.msk.f32.gmra.mxu2 %vm279_vm0, %v234_v56  ;;  %1272 = vmatmul.msk.f32.gmra.mxu3 %vm279_vm0, %v259_v57 }
  0x7d   : > { %1197 = vmatmul.msk.f32.gmra.mxu0 %vm279_vm0, %v184_v58  ;;  %1222 = vmatmul.msk.f32.gmra.mxu1 %vm279_vm0, %v209_v59 }
  0x83   : > { %1248 = vmatmul.msk.f32.gmra.mxu2 %vm279_vm0, %v235_v60  ;;  %1273 = vmatmul.msk.f32.gmra.mxu3 %vm279_vm0, %v260_v61  ;;  %v240_v60 = vld [vmem:[%s1363_s25 + $0x228] sm:$0xff]  ;;  %v265_v61 = vld [vmem:[%s1363_s25 + $0x2f0] sm:$0xff] }
  0x85   : > { %1198 = vmatmul.msk.f32.gmra.mxu0 %vm279_vm0, %v185_v62  ;;  %1223 = vmatmul.msk.f32.gmra.mxu1 %vm279_vm0, %v210_v63 }
  0x8b   : > { %1249 = vmatmul.msk.f32.gmra.mxu2 %vm279_vm0, %v236_v0  ;;  %1274 = vmatmul.msk.f32.gmra.mxu3 %vm279_vm0, %v261_v1 }
  0x8d   : > { %1199 = vmatmul.msk.f32.gmra.mxu0 %vm279_vm0, %v186_v2  ;;  %1224 = vmatmul.msk.f32.gmra.mxu1 %vm279_vm0, %v211_v3  ;;  %v190_v2 = vld [vmem:[%s1363_s25 + $0x98] sm:$0xff]  ;;  %v215_v3 = vld [vmem:[%s1363_s25 + $0x160] sm:$0xff] }
  0x92   : > { %v597_v7 = vpop.f32.mrf.mxu0  ;;  %v672_v8 = vpop.f32.mrf.mxu1 }
  0x93   : > { %1250 = vmatmul.msk.f32.gmra.mxu2 %vm279_vm0, %v237_v5  ;;  %v598_v11 = vadd.f32 %v1496_v4, %v597_v7  ;;  %v673_v12 = vadd.f32 %v1496_v4, %v672_v8  ;;  %1275 = vmatmul.msk.f32.gmra.mxu3 %vm279_vm0, %v262_v6 }
  0x95   : > { %v897_v13 = vmax.f32 %v598_v11, 0.0  ;;  %v922_v14 = vmax.f32 %v673_v12, 0.0  ;;  %1200 = vmatmul.msk.f32.gmra.mxu0 %vm279_vm0, %v187_v9  ;;  %1225 = vmatmul.msk.f32.gmra.mxu1 %vm279_vm0, %v212_v10 }
  0x96   : > { %v747_v15 = vpop.f32.mrf.mxu2  ;;  %v822_v16 = vpop.f32.mrf.mxu3 }
  0x97   : > { %v997_v17 = vadd.f32 %v922_v14, %v897_v13  ;;  %v748_v18 = vadd.f32 %v1496_v4, %v747_v15  ;;  %v823_v19 = vadd.f32 %v1496_v4, %v822_v16 }
  0x99   : > { %v947_v22 = vmax.f32 %v748_v18, 0.0  ;;  %v972_v23 = vmax.f32 %v823_v19, 0.0  ;;  %v266_v18 = vld [vmem:[%s1363_s25 + $0x2f8] sm:$0xff] }
  0x9a   : > { %v600_v24 = vpop.f32.mrf.mxu0  ;;  %v675_v25 = vpop.f32.mrf.mxu1 }
  0x9b   : > { %v1022_v28 = vadd.f32 %v997_v17, %v947_v22  ;;  %1251 = vmatmul.msk.f32.gmra.mxu2 %vm279_vm0, %v238_v20  ;;  %v601_v29 = vadd.f32 %v1496_v4, %v600_v24  ;;  %v676_v30 = vadd.f32 %v1496_v4, %v675_v25  ;;  %1276 = vmatmul.msk.f32.gmra.mxu3 %vm279_vm0, %v263_v21  ;;  %v241_v17 = vld [vmem:[%s1363_s25 + $0x230] sm:$0xff]  ;;  %v216_v24 = vld [vmem:[%s1363_s25 + $0x168] sm:$0xff] }
  0x9d   : > { %v1047_v31 = vadd.f32 %v1022_v28, %v972_v23  ;;  %v898_v32 = vmax.f32 %v601_v29, 0.0  ;;  %v923_v33 = vmax.f32 %v676_v30, 0.0  ;;  %1201 = vmatmul.msk.f32.gmra.mxu0 %vm279_vm0, %v188_v26  ;;  %1226 = vmatmul.msk.f32.gmra.mxu1 %vm279_vm0, %v213_v27  ;;  %v191_v23 = vld [vmem:[%s1363_s25 + $0xa0] sm:$0xff] }
  0x9e   : > { %v750_v34 = vpop.f32.mrf.mxu2  ;;  %v825_v35 = vpop.f32.mrf.mxu3 }
  0x9f   : > { %v1072_v36 = vmul.f32 0.25, %v1047_v31  ;;  %v998_v37 = vadd.f32 %v923_v33, %v898_v32  ;;  %v751_v38 = vadd.f32 %v1496_v4, %v750_v34  ;;  %v826_v39 = vadd.f32 %v1496_v4, %v825_v35 }
  0xa1   : > { %1097 = vst [vmem:[%s1524_s4] sm:$0xff] %v1072_v36  ;;  %v948_v42 = vmax.f32 %v751_v38, 0.0  ;;  %v973_v43 = vmax.f32 %v826_v39, 0.0  ;;  %v267_v38 = vld [vmem:[%s1363_s25 + $0x300] sm:$0xff] }
  0xa2   : > { %v603_v44 = vpop.f32.mrf.mxu0  ;;  %v678_v45 = vpop.f32.mrf.mxu1 }
  0xa3   : > { %v1023_v48 = vadd.f32 %v998_v37, %v948_v42  ;;  %1252 = vmatmul.msk.f32.gmra.mxu2 %vm279_vm0, %v239_v40  ;;  %v604_v49 = vadd.f32 %v1496_v4, %v603_v44  ;;  %v679_v50 = vadd.f32 %v1496_v4, %v678_v45  ;;  %1277 = vmatmul.msk.f32.gmra.mxu3 %vm279_vm0, %v264_v41  ;;  %v242_v37 = vld [vmem:[%s1363_s25 + $0x238] sm:$0xff]  ;;  %v217_v44 = vld [vmem:[%s1363_s25 + $0x170] sm:$0xff] }
  0xa5   : > { %v1048_v51 = vadd.f32 %v1023_v48, %v973_v43  ;;  %v899_v52 = vmax.f32 %v604_v49, 0.0  ;;  %v924_v53 = vmax.f32 %v679_v50, 0.0  ;;  %1202 = vmatmul.msk.f32.gmra.mxu0 %vm279_vm0, %v189_v46  ;;  %1227 = vmatmul.msk.f32.gmra.mxu1 %vm279_vm0, %v214_v47  ;;  %v192_v43 = vld [vmem:[%s1363_s25 + $0xa8] sm:$0xff] }
  0xa6   : > { %v753_v54 = vpop.f32.mrf.mxu2  ;;  %v828_v55 = vpop.f32.mrf.mxu3 }
  0xa7   : > { %v1073_v56 = vmul.f32 0.25, %v1048_v51  ;;  %v999_v57 = vadd.f32 %v924_v53, %v899_v52  ;;  %v754_v58 = vadd.f32 %v1496_v4, %v753_v54  ;;  %v829_v59 = vadd.f32 %v1496_v4, %v828_v55 }
  0xa9   : > { %1098 = vst [vmem:[%s1524_s4 + $0x8] sm:$0xff] %v1073_v56  ;;  %v949_v62 = vmax.f32 %v754_v58, 0.0  ;;  %v974_v63 = vmax.f32 %v829_v59, 0.0  ;;  %v268_v58 = vld [vmem:[%s1363_s25 + $0x308] sm:$0xff] }
  0xaa   : > { %v606_v0 = vpop.f32.mrf.mxu0  ;;  %v681_v1 = vpop.f32.mrf.mxu1 }
  0xab   : > { %v1024_v5 = vadd.f32 %v999_v57, %v949_v62  ;;  %1253 = vmatmul.msk.f32.gmra.mxu2 %vm279_vm0, %v240_v60  ;;  %v607_v6 = vadd.f32 %v1496_v4, %v606_v0  ;;  %v682_v7 = vadd.f32 %v1496_v4, %v681_v1  ;;  %1278 = vmatmul.msk.f32.gmra.mxu3 %vm279_vm0, %v265_v61  ;;  %v243_v57 = vld [vmem:[%s1363_s25 + $0x240] sm:$0xff]  ;;  %v218_v0 = vld [vmem:[%s1363_s25 + $0x178] sm:$0xff] }
  0xad   : > { %v1049_v8 = vadd.f32 %v1024_v5, %v974_v63  ;;  %v900_v9 = vmax.f32 %v607_v6, 0.0  ;;  %v925_v10 = vmax.f32 %v682_v7, 0.0  ;;  %1203 = vmatmul.msk.f32.gmra.mxu0 %vm279_vm0, %v190_v2  ;;  %1228 = vmatmul.msk.f32.gmra.mxu1 %vm279_vm0, %v215_v3  ;;  %v193_v63 = vld [vmem:[%s1363_s25 + $0xb0] sm:$0xff] }
  0xae   : > { %v756_v11 = vpop.f32.mrf.mxu2  ;;  %v831_v12 = vpop.f32.mrf.mxu3 }
  0xaf   : > { %v1074_v13 = vmul.f32 0.25, %v1049_v8  ;;  %v1000_v14 = vadd.f32 %v925_v10, %v900_v9  ;;  %v757_v15 = vadd.f32 %v1496_v4, %v756_v11  ;;  %v832_v16 = vadd.f32 %v1496_v4, %v831_v12 }
  0xb1   : > { %1099 = vst [vmem:[%s1524_s4 + $0x10] sm:$0xff] %v1074_v13  ;;  %v950_v19 = vmax.f32 %v757_v15, 0.0  ;;  %v975_v20 = vmax.f32 %v832_v16, 0.0  ;;  %v269_v15 = vld [vmem:[%s1363_s25 + $0x310] sm:$0xff] }
  0xb2   : > { %v609_v21 = vpop.f32.mrf.mxu0  ;;  %v684_v22 = vpop.f32.mrf.mxu1 }
  0xb3   : > { %v1025_v25 = vadd.f32 %v1000_v14, %v950_v19  ;;  %1254 = vmatmul.msk.f32.gmra.mxu2 %vm279_vm0, %v241_v17  ;;  %v610_v26 = vadd.f32 %v1496_v4, %v609_v21  ;;  %v685_v27 = vadd.f32 %v1496_v4, %v684_v22  ;;  %1279 = vmatmul.msk.f32.gmra.mxu3 %vm279_vm0, %v266_v18  ;;  %v244_v14 = vld [vmem:[%s1363_s25 + $0x248] sm:$0xff]  ;;  %v219_v21 = vld [vmem:[%s1363_s25 + $0x180] sm:$0xff] }
  0xb5   : > { %v1050_v28 = vadd.f32 %v1025_v25, %v975_v20  ;;  %v901_v29 = vmax.f32 %v610_v26, 0.0  ;;  %v926_v30 = vmax.f32 %v685_v27, 0.0  ;;  %1204 = vmatmul.msk.f32.gmra.mxu0 %vm279_vm0, %v191_v23  ;;  %1229 = vmatmul.msk.f32.gmra.mxu1 %vm279_vm0, %v216_v24  ;;  %v194_v20 = vld [vmem:[%s1363_s25 + $0xb8] sm:$0xff] }
  0xb6   : > { %v759_v31 = vpop.f32.mrf.mxu2  ;;  %v834_v32 = vpop.f32.mrf.mxu3 }
  0xb7   : > { %v1075_v33 = vmul.f32 0.25, %v1050_v28  ;;  %v1001_v34 = vadd.f32 %v926_v30, %v901_v29  ;;  %v760_v35 = vadd.f32 %v1496_v4, %v759_v31  ;;  %v835_v36 = vadd.f32 %v1496_v4, %v834_v32 }
  0xb9   : > { %1100 = vst [vmem:[%s1524_s4 + $0x18] sm:$0xff] %v1075_v33  ;;  %v951_v39 = vmax.f32 %v760_v35, 0.0  ;;  %v976_v40 = vmax.f32 %v835_v36, 0.0  ;;  %v270_v35 = vld [vmem:[%s1363_s25 + $0x318] sm:$0xff] }
  0xba   : > { %v612_v41 = vpop.f32.mrf.mxu0  ;;  %v687_v42 = vpop.f32.mrf.mxu1 }
  0xbb   : > { %v1026_v45 = vadd.f32 %v1001_v34, %v951_v39  ;;  %1255 = vmatmul.msk.f32.gmra.mxu2 %vm279_vm0, %v242_v37  ;;  %v613_v46 = vadd.f32 %v1496_v4, %v612_v41  ;;  %v688_v47 = vadd.f32 %v1496_v4, %v687_v42  ;;  %1280 = vmatmul.msk.f32.gmra.mxu3 %vm279_vm0, %v267_v38  ;;  %v245_v34 = vld [vmem:[%s1363_s25 + $0x250] sm:$0xff]  ;;  %v220_v41 = vld [vmem:[%s1363_s25 + $0x188] sm:$0xff] }
  0xbd   : > { %v1051_v48 = vadd.f32 %v1026_v45, %v976_v40  ;;  %v902_v49 = vmax.f32 %v613_v46, 0.0  ;;  %v927_v50 = vmax.f32 %v688_v47, 0.0  ;;  %1205 = vmatmul.msk.f32.gmra.mxu0 %vm279_vm0, %v192_v43  ;;  %1230 = vmatmul.msk.f32.gmra.mxu1 %vm279_vm0, %v217_v44  ;;  %v195_v40 = vld [vmem:[%s1363_s25 + $0xc0] sm:$0xff] }
  0xbe   : > { %v762_v51 = vpop.f32.mrf.mxu2  ;;  %v837_v52 = vpop.f32.mrf.mxu3 }
  0xbf   : > { %v1076_v53 = vmul.f32 0.25, %v1051_v48  ;;  %v1002_v54 = vadd.f32 %v927_v50, %v902_v49  ;;  %v763_v55 = vadd.f32 %v1496_v4, %v762_v51  ;;  %v838_v56 = vadd.f32 %v1496_v4, %v837_v52 }
  0xc1   : > { %1101 = vst [vmem:[%s1524_s4 + $0x20] sm:$0xff] %v1076_v53  ;;  %v952_v59 = vmax.f32 %v763_v55, 0.0  ;;  %v977_v60 = vmax.f32 %v838_v56, 0.0 }
  0xc2   : > { %v615_v61 = vpop.f32.mrf.mxu0  ;;  %v690_v62 = vpop.f32.mrf.mxu1 }
  0xc3   : > { %v1027_v1 = vadd.f32 %v1002_v54, %v952_v59  ;;  %1256 = vmatmul.msk.f32.gmra.mxu2 %vm279_vm0, %v243_v57  ;;  %v616_v2 = vadd.f32 %v1496_v4, %v615_v61  ;;  %v691_v3 = vadd.f32 %v1496_v4, %v690_v62  ;;  %1281 = vmatmul.msk.f32.gmra.mxu3 %vm279_vm0, %v268_v58 }
  0xc5   : > { %v1052_v5 = vadd.f32 %v1027_v1, %v977_v60  ;;  %v903_v6 = vmax.f32 %v616_v2, 0.0  ;;  %v928_v7 = vmax.f32 %v691_v3, 0.0  ;;  %1206 = vmatmul.msk.f32.gmra.mxu0 %vm279_vm0, %v193_v63  ;;  %1231 = vmatmul.msk.f32.gmra.mxu1 %vm279_vm0, %v218_v0 }
  0xc6   : > { %v765_v8 = vpop.f32.mrf.mxu2  ;;  %v840_v9 = vpop.f32.mrf.mxu3 }
  0xc7   : > { %v1077_v10 = vmul.f32 0.25, %v1052_v5  ;;  %v1003_v11 = vadd.f32 %v928_v7, %v903_v6  ;;  %v766_v12 = vadd.f32 %v1496_v4, %v765_v8  ;;  %v841_v13 = vadd.f32 %v1496_v4, %v840_v9 }
  0xc9   : > { %1102 = vst [vmem:[%s1524_s4 + $0x28] sm:$0xff] %v1077_v10  ;;  %v953_v16 = vmax.f32 %v766_v12, 0.0  ;;  %v978_v17 = vmax.f32 %v841_v13, 0.0 }
  0xca   : > { %v618_v18 = vpop.f32.mrf.mxu0  ;;  %v693_v19 = vpop.f32.mrf.mxu1 }
  0xcb   : > { %v1028_v22 = vadd.f32 %v1003_v11, %v953_v16  ;;  %1257 = vmatmul.msk.f32.gmra.mxu2 %vm279_vm0, %v244_v14  ;;  %v619_v23 = vadd.f32 %v1496_v4, %v618_v18  ;;  %v694_v24 = vadd.f32 %v1496_v4, %v693_v19  ;;  %1282 = vmatmul.msk.f32.gmra.mxu3 %vm279_vm0, %v269_v15 }
  0xcd   : > { %v1053_v25 = vadd.f32 %v1028_v22, %v978_v17  ;;  %v904_v26 = vmax.f32 %v619_v23, 0.0  ;;  %v929_v27 = vmax.f32 %v694_v24, 0.0  ;;  %1207 = vmatmul.msk.f32.gmra.mxu0 %vm279_vm0, %v194_v20  ;;  %1232 = vmatmul.msk.f32.gmra.mxu1 %vm279_vm0, %v219_v21 }
  0xce   : > { %v768_v28 = vpop.f32.mrf.mxu2  ;;  %v843_v29 = vpop.f32.mrf.mxu3 }
  0xcf   : > { %v1078_v30 = vmul.f32 0.25, %v1053_v25  ;;  %v1004_v31 = vadd.f32 %v929_v27, %v904_v26  ;;  %v769_v32 = vadd.f32 %v1496_v4, %v768_v28  ;;  %v844_v33 = vadd.f32 %v1496_v4, %v843_v29 }
  0xd1   : > { %1103 = vst [vmem:[%s1524_s4 + $0x30] sm:$0xff] %v1078_v30  ;;  %v954_v36 = vmax.f32 %v769_v32, 0.0  ;;  %v979_v37 = vmax.f32 %v844_v33, 0.0 }
  0xd2   : > { %v621_v38 = vpop.f32.mrf.mxu0  ;;  %v696_v39 = vpop.f32.mrf.mxu1 }
  0xd3   : > { %v1029_v42 = vadd.f32 %v1004_v31, %v954_v36  ;;  %1258 = vmatmul.msk.f32.gmra.mxu2 %vm279_vm0, %v245_v34  ;;  %v622_v43 = vadd.f32 %v1496_v4, %v621_v38  ;;  %v697_v44 = vadd.f32 %v1496_v4, %v696_v39  ;;  %1283 = vmatmul.msk.f32.gmra.mxu3 %vm279_vm0, %v270_v35 }
  0xd5   : > { %v1054_v45 = vadd.f32 %v1029_v42, %v979_v37  ;;  %v905_v46 = vmax.f32 %v622_v43, 0.0  ;;  %v930_v47 = vmax.f32 %v697_v44, 0.0  ;;  %1208 = vmatmul.msk.f32.gmra.mxu0 %vm279_vm0, %v195_v40  ;;  %1233 = vmatmul.msk.f32.gmra.mxu1 %vm279_vm0, %v220_v41 }
  0xd6   : > { %v771_v48 = vpop.f32.mrf.mxu2  ;;  %v846_v49 = vpop.f32.mrf.mxu3 }
  0xd7   : > { %v1079_v50 = vmul.f32 0.25, %v1054_v45  ;;  %v1005_v51 = vadd.f32 %v930_v47, %v905_v46  ;;  %v772_v52 = vadd.f32 %v1496_v4, %v771_v48  ;;  %v847_v53 = vadd.f32 %v1496_v4, %v846_v49 }
  0xd9   : > { %1104 = vst [vmem:[%s1524_s4 + $0x38] sm:$0xff] %v1079_v50  ;;  %v955_v54 = vmax.f32 %v772_v52, 0.0  ;;  %v980_v55 = vmax.f32 %v847_v53, 0.0 }
  0xda   : > { %v624_v56 = vpop.f32.mrf.mxu0  ;;  %v699_v57 = vpop.f32.mrf.mxu1 }
  0xdb   : > { %v1030_v58 = vadd.f32 %v1005_v51, %v955_v54  ;;  %v625_v59 = vadd.f32 %v1496_v4, %v624_v56  ;;  %v700_v60 = vadd.f32 %v1496_v4, %v699_v57 }
  0xdd   : > { %v1055_v61 = vadd.f32 %v1030_v58, %v980_v55  ;;  %v906_v62 = vmax.f32 %v625_v59, 0.0  ;;  %v931_v63 = vmax.f32 %v700_v60, 0.0 }
  0xde   : > { %v774_v0 = vpop.f32.mrf.mxu2  ;;  %v849_v1 = vpop.f32.mrf.mxu3 }
  0xdf   : > { %v1080_v2 = vmul.f32 0.25, %v1055_v61  ;;  %v1006_v3 = vadd.f32 %v931_v63, %v906_v62  ;;  %v775_v5 = vadd.f32 %v1496_v4, %v774_v0  ;;  %v850_v6 = vadd.f32 %v1496_v4, %v849_v1 }
  0xe1   : > { %1105 = vst [vmem:[%s1524_s4 + $0x40] sm:$0xff] %v1080_v2  ;;  %v956_v7 = vmax.f32 %v775_v5, 0.0  ;;  %v981_v8 = vmax.f32 %v850_v6, 0.0 }
  0xe2   : > { %v627_v9 = vpop.f32.mrf.mxu0  ;;  %v702_v10 = vpop.f32.mrf.mxu1 }
  0xe3   : > { %v1031_v11 = vadd.f32 %v1006_v3, %v956_v7  ;;  %v628_v12 = vadd.f32 %v1496_v4, %v627_v9  ;;  %v703_v13 = vadd.f32 %v1496_v4, %v702_v10 }
  0xe5   : > { %v1056_v14 = vadd.f32 %v1031_v11, %v981_v8  ;;  %v907_v15 = vmax.f32 %v628_v12, 0.0  ;;  %v932_v16 = vmax.f32 %v703_v13, 0.0 }
  0xe6   : > { %v777_v17 = vpop.f32.mrf.mxu2  ;;  %v852_v18 = vpop.f32.mrf.mxu3 }
  0xe7   : > { %v1081_v19 = vmul.f32 0.25, %v1056_v14  ;;  %v1007_v20 = vadd.f32 %v932_v16, %v907_v15  ;;  %v778_v21 = vadd.f32 %v1496_v4, %v777_v17  ;;  %v853_v22 = vadd.f32 %v1496_v4, %v852_v18 }
  0xe9   : > { %1106 = vst [vmem:[%s1524_s4 + $0x48] sm:$0xff] %v1081_v19  ;;  %v957_v23 = vmax.f32 %v778_v21, 0.0  ;;  %v982_v24 = vmax.f32 %v853_v22, 0.0 }
  0xea   : > { %v630_v25 = vpop.f32.mrf.mxu0  ;;  %v705_v26 = vpop.f32.mrf.mxu1 }
  0xeb   : > { %v1032_v27 = vadd.f32 %v1007_v20, %v957_v23  ;;  %v631_v28 = vadd.f32 %v1496_v4, %v630_v25  ;;  %v706_v29 = vadd.f32 %v1496_v4, %v705_v26 }
  0xed   : > { %v1057_v30 = vadd.f32 %v1032_v27, %v982_v24  ;;  %v908_v31 = vmax.f32 %v631_v28, 0.0  ;;  %v933_v32 = vmax.f32 %v706_v29, 0.0 }
  0xee   : > { %v780_v33 = vpop.f32.mrf.mxu2  ;;  %v855_v34 = vpop.f32.mrf.mxu3 }
  0xef   : > { %v1082_v35 = vmul.f32 0.25, %v1057_v30  ;;  %v1008_v36 = vadd.f32 %v933_v32, %v908_v31  ;;  %v781_v37 = vadd.f32 %v1496_v4, %v780_v33  ;;  %v856_v38 = vadd.f32 %v1496_v4, %v855_v34 }
  0xf1   : > { %1107 = vst [vmem:[%s1524_s4 + $0x50] sm:$0xff] %v1082_v35  ;;  %v958_v39 = vmax.f32 %v781_v37, 0.0  ;;  %v983_v40 = vmax.f32 %v856_v38, 0.0 }
  0xf2   : > { %v633_v41 = vpop.f32.mrf.mxu0  ;;  %v708_v42 = vpop.f32.mrf.mxu1 }
  0xf3   : > { %v1033_v43 = vadd.f32 %v1008_v36, %v958_v39  ;;  %v634_v44 = vadd.f32 %v1496_v4, %v633_v41  ;;  %v709_v45 = vadd.f32 %v1496_v4, %v708_v42 }
  0xf5   : > { %v1058_v46 = vadd.f32 %v1033_v43, %v983_v40  ;;  %v909_v47 = vmax.f32 %v634_v44, 0.0  ;;  %v934_v48 = vmax.f32 %v709_v45, 0.0 }
  0xf6   : > { %v783_v49 = vpop.f32.mrf.mxu2  ;;  %v858_v50 = vpop.f32.mrf.mxu3 }
  0xf7   : > { %v1083_v51 = vmul.f32 0.25, %v1058_v46  ;;  %v1009_v52 = vadd.f32 %v934_v48, %v909_v47  ;;  %v784_v53 = vadd.f32 %v1496_v4, %v783_v49  ;;  %v859_v54 = vadd.f32 %v1496_v4, %v858_v50 }
  0xf9   : > { %1108 = vst [vmem:[%s1524_s4 + $0x58] sm:$0xff] %v1083_v51  ;;  %v959_v55 = vmax.f32 %v784_v53, 0.0  ;;  %v984_v56 = vmax.f32 %v859_v54, 0.0 }
  0xfa   : > { %v636_v57 = vpop.f32.mrf.mxu0  ;;  %v711_v58 = vpop.f32.mrf.mxu1 }
  0xfb   : > { %v1034_v59 = vadd.f32 %v1009_v52, %v959_v55  ;;  %v637_v60 = vadd.f32 %v1496_v4, %v636_v57  ;;  %v712_v61 = vadd.f32 %v1496_v4, %v711_v58 }
  0xfd   : > { %v1059_v62 = vadd.f32 %v1034_v59, %v984_v56  ;;  %v910_v63 = vmax.f32 %v637_v60, 0.0  ;;  %v935_v0 = vmax.f32 %v712_v61, 0.0 }
  0xfe   : > { %v786_v1 = vpop.f32.mrf.mxu2  ;;  %v861_v2 = vpop.f32.mrf.mxu3 }
  0xff   : > { %v1084_v3 = vmul.f32 0.25, %v1059_v62  ;;  %v1010_v5 = vadd.f32 %v935_v0, %v910_v63  ;;  %v787_v6 = vadd.f32 %v1496_v4, %v786_v1  ;;  %v862_v7 = vadd.f32 %v1496_v4, %v861_v2 }
 0x101   : > { %1109 = vst [vmem:[%s1524_s4 + $0x60] sm:$0xff] %v1084_v3  ;;  %v960_v8 = vmax.f32 %v787_v6, 0.0  ;;  %v985_v9 = vmax.f32 %v862_v7, 0.0 }
 0x102   : > { %v639_v10 = vpop.f32.mrf.mxu0  ;;  %v714_v11 = vpop.f32.mrf.mxu1 }
 0x103   : > { %v1035_v12 = vadd.f32 %v1010_v5, %v960_v8  ;;  %v640_v13 = vadd.f32 %v1496_v4, %v639_v10  ;;  %v715_v14 = vadd.f32 %v1496_v4, %v714_v11 }
 0x105   : > { %v1060_v15 = vadd.f32 %v1035_v12, %v985_v9  ;;  %v911_v16 = vmax.f32 %v640_v13, 0.0  ;;  %v936_v17 = vmax.f32 %v715_v14, 0.0 }
 0x106   : > { %v789_v18 = vpop.f32.mrf.mxu2  ;;  %v864_v19 = vpop.f32.mrf.mxu3 }
 0x107   : > { %v1085_v20 = vmul.f32 0.25, %v1060_v15  ;;  %v1011_v21 = vadd.f32 %v936_v17, %v911_v16  ;;  %v790_v22 = vadd.f32 %v1496_v4, %v789_v18  ;;  %v865_v23 = vadd.f32 %v1496_v4, %v864_v19 }
 0x109   : > { %1110 = vst [vmem:[%s1524_s4 + $0x68] sm:$0xff] %v1085_v20  ;;  %v961_v24 = vmax.f32 %v790_v22, 0.0  ;;  %v986_v25 = vmax.f32 %v865_v23, 0.0 }
 0x10a   : > { %v642_v26 = vpop.f32.mrf.mxu0  ;;  %v717_v27 = vpop.f32.mrf.mxu1 }
 0x10b   : > { %v1036_v28 = vadd.f32 %v1011_v21, %v961_v24  ;;  %v643_v29 = vadd.f32 %v1496_v4, %v642_v26  ;;  %v718_v30 = vadd.f32 %v1496_v4, %v717_v27 }
 0x10d   : > { %v1061_v31 = vadd.f32 %v1036_v28, %v986_v25  ;;  %v912_v32 = vmax.f32 %v643_v29, 0.0  ;;  %v937_v33 = vmax.f32 %v718_v30, 0.0 }
 0x10e   : > { %v792_v34 = vpop.f32.mrf.mxu2  ;;  %v867_v35 = vpop.f32.mrf.mxu3 }
 0x10f   : > { %v1086_v36 = vmul.f32 0.25, %v1061_v31  ;;  %v1012_v37 = vadd.f32 %v937_v33, %v912_v32  ;;  %v793_v38 = vadd.f32 %v1496_v4, %v792_v34  ;;  %v868_v39 = vadd.f32 %v1496_v4, %v867_v35 }
 0x111   : > { %1111 = vst [vmem:[%s1524_s4 + $0x70] sm:$0xff] %v1086_v36  ;;  %v962_v40 = vmax.f32 %v793_v38, 0.0  ;;  %v987_v41 = vmax.f32 %v868_v39, 0.0 }
 0x112   : > { %v645_v42 = vpop.f32.mrf.mxu0  ;;  %v720_v43 = vpop.f32.mrf.mxu1 }
 0x113   : > { %v1037_v44 = vadd.f32 %v1012_v37, %v962_v40  ;;  %v646_v45 = vadd.f32 %v1496_v4, %v645_v42  ;;  %v721_v46 = vadd.f32 %v1496_v4, %v720_v43 }
 0x115   : > { %v1062_v47 = vadd.f32 %v1037_v44, %v987_v41  ;;  %v913_v48 = vmax.f32 %v646_v45, 0.0  ;;  %v938_v49 = vmax.f32 %v721_v46, 0.0 }
 0x116   : > { %v795_v50 = vpop.f32.mrf.mxu2  ;;  %v870_v51 = vpop.f32.mrf.mxu3 }
 0x117   : > { %v1087_v52 = vmul.f32 0.25, %v1062_v47  ;;  %v1013_v53 = vadd.f32 %v938_v49, %v913_v48  ;;  %v796_v54 = vadd.f32 %v1496_v4, %v795_v50  ;;  %v871_v55 = vadd.f32 %v1496_v4, %v870_v51 }
 0x119   : > { %1112 = vst [vmem:[%s1524_s4 + $0x78] sm:$0xff] %v1087_v52  ;;  %v963_v56 = vmax.f32 %v796_v54, 0.0  ;;  %v988_v57 = vmax.f32 %v871_v55, 0.0 }
 0x11a   : > { %v648_v58 = vpop.f32.mrf.mxu0  ;;  %v723_v59 = vpop.f32.mrf.mxu1 }
 0x11b   : > { %v1038_v60 = vadd.f32 %v1013_v53, %v963_v56  ;;  %v649_v61 = vadd.f32 %v1496_v4, %v648_v58  ;;  %v724_v62 = vadd.f32 %v1496_v4, %v723_v59 }
 0x11d   : > { %v1063_v63 = vadd.f32 %v1038_v60, %v988_v57  ;;  %v914_v0 = vmax.f32 %v649_v61, 0.0  ;;  %v939_v1 = vmax.f32 %v724_v62, 0.0 }
 0x11e   : > { %v798_v2 = vpop.f32.mrf.mxu2  ;;  %v873_v3 = vpop.f32.mrf.mxu3 }
 0x11f   : > { %v1088_v5 = vmul.f32 0.25, %v1063_v63  ;;  %v1014_v6 = vadd.f32 %v939_v1, %v914_v0  ;;  %v799_v7 = vadd.f32 %v1496_v4, %v798_v2  ;;  %v874_v8 = vadd.f32 %v1496_v4, %v873_v3 }
 0x121   : > { %1113 = vst [vmem:[%s1524_s4 + $0x80] sm:$0xff] %v1088_v5  ;;  %v964_v9 = vmax.f32 %v799_v7, 0.0  ;;  %v989_v10 = vmax.f32 %v874_v8, 0.0 }
 0x122   : > { %v651_v11 = vpop.f32.mrf.mxu0  ;;  %v726_v12 = vpop.f32.mrf.mxu1 }
 0x123   : > { %v1039_v13 = vadd.f32 %v1014_v6, %v964_v9  ;;  %v652_v14 = vadd.f32 %v1496_v4, %v651_v11  ;;  %v727_v15 = vadd.f32 %v1496_v4, %v726_v12 }
 0x125   : > { %v1064_v16 = vadd.f32 %v1039_v13, %v989_v10  ;;  %v915_v17 = vmax.f32 %v652_v14, 0.0  ;;  %v940_v18 = vmax.f32 %v727_v15, 0.0 }
 0x126   : > { %v801_v19 = vpop.f32.mrf.mxu2  ;;  %v876_v20 = vpop.f32.mrf.mxu3 }
 0x127   : > { %v1089_v21 = vmul.f32 0.25, %v1064_v16  ;;  %v1015_v22 = vadd.f32 %v940_v18, %v915_v17  ;;  %v802_v23 = vadd.f32 %v1496_v4, %v801_v19  ;;  %v877_v24 = vadd.f32 %v1496_v4, %v876_v20 }
 0x129   : > { %1114 = vst [vmem:[%s1524_s4 + $0x88] sm:$0xff] %v1089_v21  ;;  %v965_v25 = vmax.f32 %v802_v23, 0.0  ;;  %v990_v26 = vmax.f32 %v877_v24, 0.0 }
 0x12a   : > { %v654_v27 = vpop.f32.mrf.mxu0  ;;  %v729_v28 = vpop.f32.mrf.mxu1 }
 0x12b   : > { %v1040_v29 = vadd.f32 %v1015_v22, %v965_v25  ;;  %v655_v30 = vadd.f32 %v1496_v4, %v654_v27  ;;  %v730_v31 = vadd.f32 %v1496_v4, %v729_v28 }
 0x12d   : > { %v1065_v32 = vadd.f32 %v1040_v29, %v990_v26  ;;  %v916_v33 = vmax.f32 %v655_v30, 0.0  ;;  %v941_v34 = vmax.f32 %v730_v31, 0.0 }
 0x12e   : > { %v804_v35 = vpop.f32.mrf.mxu2  ;;  %v879_v36 = vpop.f32.mrf.mxu3 }
 0x12f   : > { %v1090_v37 = vmul.f32 0.25, %v1065_v32  ;;  %v1016_v38 = vadd.f32 %v941_v34, %v916_v33  ;;  %v805_v39 = vadd.f32 %v1496_v4, %v804_v35  ;;  %v880_v40 = vadd.f32 %v1496_v4, %v879_v36 }
 0x131   : > { %1115 = vst [vmem:[%s1524_s4 + $0x90] sm:$0xff] %v1090_v37  ;;  %v966_v41 = vmax.f32 %v805_v39, 0.0  ;;  %v991_v42 = vmax.f32 %v880_v40, 0.0 }
 0x132   : > { %v657_v43 = vpop.f32.mrf.mxu0  ;;  %v732_v44 = vpop.f32.mrf.mxu1 }
 0x133   : > { %v1041_v45 = vadd.f32 %v1016_v38, %v966_v41  ;;  %v658_v46 = vadd.f32 %v1496_v4, %v657_v43  ;;  %v733_v47 = vadd.f32 %v1496_v4, %v732_v44 }
 0x135   : > { %v1066_v48 = vadd.f32 %v1041_v45, %v991_v42  ;;  %v917_v49 = vmax.f32 %v658_v46, 0.0  ;;  %v942_v50 = vmax.f32 %v733_v47, 0.0 }
 0x136   : > { %v807_v51 = vpop.f32.mrf.mxu2  ;;  %v882_v52 = vpop.f32.mrf.mxu3 }
 0x137   : > { %v1091_v53 = vmul.f32 0.25, %v1066_v48  ;;  %v1017_v54 = vadd.f32 %v942_v50, %v917_v49  ;;  %v808_v55 = vadd.f32 %v1496_v4, %v807_v51  ;;  %v883_v56 = vadd.f32 %v1496_v4, %v882_v52 }
 0x139   : > { %1116 = vst [vmem:[%s1524_s4 + $0x98] sm:$0xff] %v1091_v53  ;;  %v967_v57 = vmax.f32 %v808_v55, 0.0  ;;  %v992_v58 = vmax.f32 %v883_v56, 0.0 }
 0x13a   : > { %v660_v59 = vpop.f32.mrf.mxu0  ;;  %v735_v60 = vpop.f32.mrf.mxu1 }
 0x13b   : > { %v1042_v61 = vadd.f32 %v1017_v54, %v967_v57  ;;  %v661_v62 = vadd.f32 %v1496_v4, %v660_v59  ;;  %v736_v63 = vadd.f32 %v1496_v4, %v735_v60 }
 0x13d   : > { %v1067_v0 = vadd.f32 %v1042_v61, %v992_v58  ;;  %v918_v1 = vmax.f32 %v661_v62, 0.0  ;;  %v943_v2 = vmax.f32 %v736_v63, 0.0 }
 0x13e   : > { %v810_v3 = vpop.f32.mrf.mxu2  ;;  %v885_v5 = vpop.f32.mrf.mxu3 }
 0x13f   : > { %v1092_v6 = vmul.f32 0.25, %v1067_v0  ;;  %v1018_v7 = vadd.f32 %v943_v2, %v918_v1  ;;  %v811_v8 = vadd.f32 %v1496_v4, %v810_v3  ;;  %v886_v9 = vadd.f32 %v1496_v4, %v885_v5 }
 0x141   : > { %1117 = vst [vmem:[%s1524_s4 + $0xa0] sm:$0xff] %v1092_v6  ;;  %v968_v10 = vmax.f32 %v811_v8, 0.0  ;;  %v993_v11 = vmax.f32 %v886_v9, 0.0 }
 0x142   : > { %v663_v12 = vpop.f32.mrf.mxu0  ;;  %v738_v13 = vpop.f32.mrf.mxu1 }
 0x143   : > { %v1043_v14 = vadd.f32 %v1018_v7, %v968_v10  ;;  %v664_v15 = vadd.f32 %v1496_v4, %v663_v12  ;;  %v739_v16 = vadd.f32 %v1496_v4, %v738_v13 }
 0x145   : > { %v1068_v17 = vadd.f32 %v1043_v14, %v993_v11  ;;  %v919_v18 = vmax.f32 %v664_v15, 0.0  ;;  %v944_v19 = vmax.f32 %v739_v16, 0.0 }
 0x146   : > { %v813_v20 = vpop.f32.mrf.mxu2  ;;  %v888_v21 = vpop.f32.mrf.mxu3 }
 0x147   : > { %v1093_v22 = vmul.f32 0.25, %v1068_v17  ;;  %v1019_v23 = vadd.f32 %v944_v19, %v919_v18  ;;  %v814_v24 = vadd.f32 %v1496_v4, %v813_v20  ;;  %v889_v25 = vadd.f32 %v1496_v4, %v888_v21 }
 0x149   : > { %1118 = vst [vmem:[%s1524_s4 + $0xa8] sm:$0xff] %v1093_v22  ;;  %v969_v26 = vmax.f32 %v814_v24, 0.0  ;;  %v994_v27 = vmax.f32 %v889_v25, 0.0 }
 0x14a   : > { %v666_v28 = vpop.f32.mrf.mxu0  ;;  %v741_v29 = vpop.f32.mrf.mxu1 }
 0x14b   : > { %v1044_v30 = vadd.f32 %v1019_v23, %v969_v26  ;;  %v667_v31 = vadd.f32 %v1496_v4, %v666_v28  ;;  %v742_v32 = vadd.f32 %v1496_v4, %v741_v29 }
 0x14d   : > { %v1069_v33 = vadd.f32 %v1044_v30, %v994_v27  ;;  %v920_v34 = vmax.f32 %v667_v31, 0.0  ;;  %v945_v35 = vmax.f32 %v742_v32, 0.0 }
 0x14e   : > { %v816_v36 = vpop.f32.mrf.mxu2  ;;  %v891_v37 = vpop.f32.mrf.mxu3 }
 0x14f   : > { %v1094_v38 = vmul.f32 0.25, %v1069_v33  ;;  %v1020_v39 = vadd.f32 %v945_v35, %v920_v34  ;;  %v817_v40 = vadd.f32 %v1496_v4, %v816_v36  ;;  %v892_v41 = vadd.f32 %v1496_v4, %v891_v37 }
 0x151   : > { %1119 = vst [vmem:[%s1524_s4 + $0xb0] sm:$0xff] %v1094_v38  ;;  %v970_v42 = vmax.f32 %v817_v40, 0.0  ;;  %v995_v43 = vmax.f32 %v892_v41, 0.0 }
 0x152   : > { %v669_v44 = vpop.f32.mrf.mxu0  ;;  %v744_v45 = vpop.f32.mrf.mxu1 }
 0x153   : > { %v1045_v46 = vadd.f32 %v1020_v39, %v970_v42  ;;  %v670_v47 = vadd.f32 %v1496_v4, %v669_v44  ;;  %v745_v48 = vadd.f32 %v1496_v4, %v744_v45 }
 0x155   : > { %v1070_v49 = vadd.f32 %v1045_v46, %v995_v43  ;;  %v921_v50 = vmax.f32 %v670_v47, 0.0  ;;  %v946_v51 = vmax.f32 %v745_v48, 0.0 }
 0x156   : > { %v819_v52 = vpop.f32.mrf.mxu2  ;;  %v894_v53 = vpop.f32.mrf.mxu3 }
 0x157   : > { %v1095_v54 = vmul.f32 0.25, %v1070_v49  ;;  %v1021_v55 = vadd.f32 %v946_v51, %v921_v50  ;;  %v820_v56 = vadd.f32 %v1496_v4, %v819_v52  ;;  %v895_v57 = vadd.f32 %v1496_v4, %v894_v53 }
 0x159   : > { %1120 = vst [vmem:[%s1524_s4 + $0xb8] sm:$0xff] %v1095_v54  ;;  %v971_v58 = vmax.f32 %v820_v56, 0.0  ;;  %v996_v59 = vmax.f32 %v895_v57, 0.0 }
 0x15b   : > { %v1046_v60 = vadd.f32 %v1021_v55, %v971_v58 }
 0x15d   : > { %v1071_v61 = vadd.f32 %v1046_v60, %v996_v59 }
 0x15f   : > { %v1096_v62 = vmul.f32 0.25, %v1071_v61 }
 0x161   : > { %1121 = vst [vmem:[%s1524_s4 + $0xc0] sm:$0xff] %v1096_v62 }
 0x162 PF: > { %s13_s12 = sadd.s32 1, %s1315_s12  }
 0x163   : > { %p10_p4 = scmp.ge.s32.totalorder %s13_s12, 4  }
 0x165   :  { %12 = sbr.rel (!%p10_p4) target bundleno = 1 (0x1), region = 62 }

// kernel: lenet_forward.4
= control target key start
LH: loop header
LB: loop body
LE: loop exit
PB: predicated region body
PF: predicated region fallthrough
CT: control target
= control target key end

     0   :  { %s599_s12 = smov 0   ;;  %s779_s0 = inlined_call_operand.vmem [shape: f32[2,128,160], index: 0, kind: input, shape index: {}]   ;;  %s780_s1 = inlined_call_operand.vmem [shape: f32[160,128], index: 1, kind: input, shape index: {}]   ;;  %s781_s2 = inlined_call_operand.vmem [shape: f32[1,128], index: 2, kind: input, shape index: {}]   ;;  %s782_s3 = inlined_call_operand.vmem [shape: f32[2,32,128], index: 3, kind: output, shape index: {}]  }
   0x1 LB: > { %s497_s13 = sadd.s32 4294967295, %s577_s12   ;;  %p501_p0 = scmp.ge.s32.totalorder %s577_s12, 1  ;;  %s577_s12 = sphi %s599_s12, %s13_s12  }
   0x2   : > { %p137_p1 = scmp.lt.s32.totalorder %s577_s12, 3 }
   0x4   : > { %p138_p2 = pnand %p501_p0, %p137_p1 }
   0x5   : > { %p161_p3 = scmp.lt.s32.totalorder (!%p138_p2), %s497_s13, 1 }
   0x6   : > { %141 = sbr.rel (%p138_p2) target bundleno = 244 (0xf4), region = 32 }
   0xb   : > { %v218_v0 = vld [vmem:[%s780_s1 + $0x78] sm:$0xff]  ;;  %v217_v2 = vld [vmem:[%s780_s1 + $0x70] sm:$0xff]  ;;  %v216_v4 = vld [vmem:[%s780_s1 + $0x68] sm:$0xff]  ;;  %s784_s13 = smov (!%p161_p3, %s497_s13), 1  ;;  %vm227_vm0 = vcmask 261120  }
   0xc   : > { %v613_v1 = vld [vmem:[%s780_s1 + $0x98] sm:$0xff]  ;;  %276 = vmatpush.msra.mxu0 %v218_v0  ;;  %526 = vmatpush.msra.mxu2 %v218_v0  ;;  %v621_v3 = vld [vmem:[%s780_s1 + $0x90] sm:$0xff]  ;;  %v632_v5 = vld [vmem:[%s780_s1 + $0x88] sm:$0xff]  ;;  %s524_s28 = sshll.u32 %s784_s13, 8  ;;  %s525_s8 = sshll.u32 %s784_s13, 5 }
   0xd   : > { %527 = vmatpush.msra.mxu3 %v218_v0  ;;  %353 = vmatpush.msra.mxu1 %v613_v1  ;;  %v215_v6 = vld [vmem:[%s780_s1 + $0x60] sm:$0xff]  ;;  %s647_s6 = scalar_lea.vmem %s779_s0, %s524_s28  ;;  %v214_v9 = vld [vmem:[%s780_s1 + $0x58] sm:$0xff]  ;;  %v213_v10 = vld [vmem:[%s780_s1 + $0x50] sm:$0xff]  ;;  %s765_s11 = scalar_lea.vmem %s782_s3, %s525_s8 }
   0xe   : > { %277 = vmatpush.msra.mxu0 %v217_v2  ;;  %528 = vmatpush.msra.mxu2 %v217_v2  ;;  %v642_v7 = vld [vmem:[%s780_s1 + $0x80] sm:$0xff]  ;;  %v172_v8 = vld [vmem:[%s647_s6 + $0x8] sm:$0xff]  ;;  %v174_v13 = vld [vmem:[%s647_s6 + $0x18] sm:$0xff] }
   0xf   : > { %529 = vmatpush.msra.mxu3 %v217_v2  ;;  %354 = vmatpush.msra.mxu1 %v621_v3  ;;  %v212_v11 = vld [vmem:[%s780_s1 + $0x48] sm:$0xff]  ;;  %v211_v12 = vld [vmem:[%s780_s1 + $0x40] sm:$0xff]  ;;  %v210_v14 = vld [vmem:[%s780_s1 + $0x38] sm:$0xff] }
  0x10   : > { %278 = vmatpush.msra.mxu0 %v216_v4  ;;  %530 = vmatpush.msra.mxu2 %v216_v4  ;;  %v209_v15 = vld [vmem:[%s780_s1 + $0x30] sm:$0xff]  ;;  %v208_v16 = vld [vmem:[%s780_s1 + $0x28] sm:$0xff]  ;;  %v207_v17 = vld [vmem:[%s780_s1 + $0x20] sm:$0xff] }
  0x11   : > { %531 = vmatpush.msra.mxu3 %v216_v4  ;;  %355 = vmatpush.msra.mxu1 %v632_v5  ;;  %v176_v18 = vld [vmem:[%s647_s6 + $0x28] sm:$0xff]  ;;  %v206_v19 = vld [vmem:[%s780_s1 + $0x18] sm:$0xff]  ;;  %v205_v20 = vld [vmem:[%s780_s1 + $0x10] sm:$0xff] }
  0x12   : > { %279 = vmatpush.msra.mxu0 %v215_v6  ;;  %532 = vmatpush.msra.mxu2 %v215_v6  ;;  %v204_v21 = vld [vmem:[%s780_s1 + $0x8] sm:$0xff]  ;;  %v203_v22 = vld [vmem:[%s780_s1] sm:$0xff]  ;;  %v185_v24 = vld [vmem:[%s647_s6 + $0x70] sm:$0xff] }
  0x13   : > { %533 = vmatpush.msra.mxu3 %v215_v6  ;;  %356 = vmatpush.msra.mxu1 %v642_v7  ;;  %v171_v23 = vld [vmem:[%s647_s6] sm:$0xff]  ;;  %v201_v25 = vld [vmem:[%s647_s6 + $0xf0] sm:$0xff]  ;;  %v178_v26 = vld [vmem:[%s647_s6 + $0x38] sm:$0xff] }
  0x14   : > { %506 = vmatmul.msk.f32.vlgmr.msra.gmra.mxu1 %vm227_vm0, %v172_v8  ;;  %280 = vmatpush.msra.mxu0 %v214_v9  ;;  %v173_v27 = vld [vmem:[%s647_s6 + $0x10] sm:$0xff]  ;;  %v187_v28 = vld [vmem:[%s647_s6 + $0x80] sm:$0xff]  ;;  %v180_v29 = vld [vmem:[%s647_s6 + $0x48] sm:$0xff] }
  0x15   : > { %534 = vmatpush.msra.mxu2 %v214_v9  ;;  %535 = vmatpush.msra.mxu3 %v214_v9  ;;  %v192_v30 = vld [vmem:[%s647_s6 + $0xa8] sm:$0xff]  ;;  %v175_v31 = vld [vmem:[%s647_s6 + $0x20] sm:$0xff]  ;;  %v189_v32 = vld [vmem:[%s647_s6 + $0x90] sm:$0xff] }
  0x16   : > { %281 = vmatpush.msra.mxu0 %v213_v10  ;;  %v182_v33 = vld [vmem:[%s647_s6 + $0x58] sm:$0xff]  ;;  %v177_v35 = vld [vmem:[%s647_s6 + $0x30] sm:$0xff]  ;;  %v191_v36 = vld [vmem:[%s647_s6 + $0xa0] sm:$0xff] }
  0x17   : > { %536 = vmatpush.msra.mxu2 %v213_v10  ;;  %537 = vmatpush.msra.mxu3 %v213_v10  ;;  %v194_v34 = vld [vmem:[%s647_s6 + $0xb8] sm:$0xff]  ;;  %v184_v37 = vld [vmem:[%s647_s6 + $0x68] sm:$0xff]  ;;  %v179_v39 = vld [vmem:[%s647_s6 + $0x40] sm:$0xff] }
  0x18   : > { %282 = vmatpush.msra.mxu0 %v212_v11  ;;  %v196_v38 = vld [vmem:[%s647_s6 + $0xc8] sm:$0xff]  ;;  %v193_v40 = vld [vmem:[%s647_s6 + $0xb0] sm:$0xff]  ;;  %v186_v41 = vld [vmem:[%s647_s6 + $0x78] sm:$0xff] }
  0x19   : > { %538 = vmatpush.msra.mxu2 %v212_v11  ;;  %539 = vmatpush.msra.mxu3 %v212_v11  ;;  %v198_v42 = vld [vmem:[%s647_s6 + $0xd8] sm:$0xff]  ;;  %v181_v43 = vld [vmem:[%s647_s6 + $0x50] sm:$0xff]  ;;  %v195_v44 = vld [vmem:[%s647_s6 + $0xc0] sm:$0xff] }
  0x1a   : > { %283 = vmatpush.msra.mxu0 %v211_v12  ;;  %v188_v45 = vld [vmem:[%s647_s6 + $0x88] sm:$0xff]  ;;  %v183_v47 = vld [vmem:[%s647_s6 + $0x60] sm:$0xff]  ;;  %v197_v48 = vld [vmem:[%s647_s6 + $0xd0] sm:$0xff] }
  0x1b   : > { %540 = vmatpush.msra.mxu2 %v211_v12  ;;  %541 = vmatpush.msra.mxu3 %v211_v12  ;;  %v200_v46 = vld [vmem:[%s647_s6 + $0xe8] sm:$0xff]  ;;  %v190_v49 = vld [vmem:[%s647_s6 + $0x98] sm:$0xff]  ;;  %v199_v51 = vld [vmem:[%s647_s6 + $0xe0] sm:$0xff] }
  0x1c   : > { %507 = vmatmul.msk.f32.gmra.mxu1 %vm227_vm0, %v174_v13  ;;  %284 = vmatpush.msra.mxu0 %v210_v14  ;;  %v202_v50 = vld [vmem:[%s647_s6 + $0xf8] sm:$0xff]  ;;  %v746_v9 = vld [vmem:[%s781_s2] ss:$0 sm:$0xff] }
  0x1d   : > { %542 = vmatpush.msra.mxu2 %v210_v14  ;;  %543 = vmatpush.msra.mxu3 %v210_v14 }
  0x1e   : > { %285 = vmatpush.msra.mxu0 %v209_v15 }
  0x1f   : > { %544 = vmatpush.msra.mxu2 %v209_v15  ;;  %545 = vmatpush.msra.mxu3 %v209_v15 }
  0x20   : > { %286 = vmatpush.msra.mxu0 %v208_v16 }
  0x21   : > { %546 = vmatpush.msra.mxu2 %v208_v16  ;;  %547 = vmatpush.msra.mxu3 %v208_v16 }
  0x22   : > { %287 = vmatpush.msra.mxu0 %v207_v17 }
  0x23   : > { %548 = vmatpush.msra.mxu2 %v207_v17  ;;  %549 = vmatpush.msra.mxu3 %v207_v17 }
  0x24   : > { %508 = vmatmul.msk.f32.gmra.mxu1 %vm227_vm0, %v176_v18  ;;  %288 = vmatpush.msra.mxu0 %v206_v19 }
  0x25   : > { %550 = vmatpush.msra.mxu2 %v206_v19  ;;  %551 = vmatpush.msra.mxu3 %v206_v19 }
  0x26   : > { %289 = vmatpush.msra.mxu0 %v205_v20 }
  0x27   : > { %552 = vmatpush.msra.mxu2 %v205_v20  ;;  %553 = vmatpush.msra.mxu3 %v205_v20 }
  0x28   : > { %290 = vmatpush.msra.mxu0 %v204_v21 }
  0x29   : > { %554 = vmatpush.msra.mxu2 %v204_v21  ;;  %555 = vmatpush.msra.mxu3 %v204_v21 }
  0x2a   : > { %291 = vmatpush.msra.mxu0 %v203_v22 }
  0x2b   : > { %556 = vmatpush.msra.mxu2 %v203_v22  ;;  %557 = vmatpush.msra.mxu3 %v203_v22 }
  0x2c   : > { %292 = vmatmul.f32.vlgmr.msra.gmra.mxu0 %v171_v23  ;;  %313 = vmatmul.f32.vlgmr.msra.gmra.mxu2 %v185_v24 }
  0x2d   : > { %337 = vmatmul.f32.vlgmr.msra.gmra.mxu3 %v201_v25  ;;  %509 = vmatmul.msk.f32.gmra.mxu1 %vm227_vm0, %v178_v26 }
  0x2e   : > { %558 = vmatpush.msrb.mxu3 %v613_v1 }
  0x30   : > { %559 = vmatpush.msrb.mxu3 %v621_v3 }
  0x32   : > { %560 = vmatpush.msrb.mxu3 %v632_v5 }
  0x34   : > { %561 = vmatpush.msrb.mxu3 %v642_v7  ;;  %295 = vmatmul.f32.gmra.mxu0 %v173_v27 }
  0x35   : > { %316 = vmatmul.f32.gmra.mxu2 %v187_v28  ;;  %510 = vmatmul.msk.f32.gmra.mxu1 %vm227_vm0, %v180_v29 }
  0x36   : > { %516 = vmatmul.msk.f32.vlgmr.msrb.gmra.mxu3 %vm227_vm0, %v192_v30 }
  0x3c   : > { %298 = vmatmul.f32.gmra.mxu0 %v175_v31 }
  0x3d   : > { %319 = vmatmul.f32.gmra.mxu2 %v189_v32  ;;  %511 = vmatmul.msk.f32.gmra.mxu1 %vm227_vm0, %v182_v33 }
  0x3e   : > { %517 = vmatmul.msk.f32.gmra.mxu3 %vm227_vm0, %v194_v34 }
  0x44   : > { %301 = vmatmul.f32.gmra.mxu0 %v177_v35 }
  0x45   : > { %322 = vmatmul.f32.gmra.mxu2 %v191_v36  ;;  %512 = vmatmul.msk.f32.gmra.mxu1 %vm227_vm0, %v184_v37 }
  0x46   : > { %518 = vmatmul.msk.f32.gmra.mxu3 %vm227_vm0, %v196_v38 }
  0x4c   : > { %304 = vmatmul.f32.gmra.mxu0 %v179_v39 }
  0x4d   : > { %325 = vmatmul.f32.gmra.mxu2 %v193_v40  ;;  %513 = vmatmul.msk.f32.gmra.mxu1 %vm227_vm0, %v186_v41 }
  0x4e   : > { %519 = vmatmul.msk.f32.gmra.mxu3 %vm227_vm0, %v198_v42 }
  0x54   : > { %307 = vmatmul.f32.gmra.mxu0 %v181_v43 }
  0x55   : > { %328 = vmatmul.f32.gmra.mxu2 %v195_v44  ;;  %514 = vmatmul.msk.f32.gmra.mxu1 %vm227_vm0, %v188_v45 }
  0x56   : > { %520 = vmatmul.msk.f32.gmra.mxu3 %vm227_vm0, %v200_v46 }
  0x5c   : > { %310 = vmatmul.f32.gmra.mxu0 %v183_v47 }
  0x5d   : > { %331 = vmatmul.f32.gmra.mxu2 %v197_v48  ;;  %515 = vmatmul.msk.f32.gmra.mxu1 %vm227_vm0, %v190_v49 }
  0x5e   : > { %521 = vmatmul.msk.f32.gmra.mxu3 %vm227_vm0, %v202_v50 }
  0x65   : > { %334 = vmatmul.f32.gmra.mxu2 %v199_v51 }
  0x91   : > { %v358_v52 = vpop.f32.mrf.mxu1 }
  0x99   : > { %v361_v53 = vpop.f32.mrf.mxu1 }
  0xa1   : > { %v739_v54 = vpop.f32.mrf.mxu1 }
  0xa9   : > { %v293_v55 = vpop.f32.mrf.mxu0 }
  0xaa   : > { %v367_v56 = vpop.f32.mrf.mxu1  ;;  %v294_v12 = vadd.f32 %v746_v9, %v293_v55 }
  0xac   : > { %v359_v18 = vadd.f32 %v358_v52, %v294_v12 }
  0xae   : > { %v406_v27 = vmax.f32 %v359_v18, 0.0 }
  0xaf   : > { %v314_v57 = vpop.f32.mrf.mxu2 }
  0xb0   : > { %v338_v58 = vpop.f32.mrf.mxu3  ;;  %v315_v22 = vadd.f32 %v746_v9, %v314_v57 }
  0xb1   : > { %v296_v59 = vpop.f32.mrf.mxu0  ;;  %v339_v49 = vadd.f32 %v746_v9, %v338_v58 }
  0xb2   : > { %v370_v60 = vpop.f32.mrf.mxu1  ;;  %v297_v23 = vadd.f32 %v746_v9, %v296_v59 }
  0xb4   : > { %v362_v38 = vadd.f32 %v361_v53, %v297_v23 }
  0xb6   : > { %v407_v50 = vmax.f32 %v362_v38, 0.0 }
  0xb8   : > { %v317_v61 = vpop.f32.mrf.mxu2 }
  0xb9   : > { %v741_v62 = vpop.f32.mrf.mxu3  ;;  %v299_v63 = vpop.f32.mrf.mxu0  ;;  %v318_v16 = vadd.f32 %v746_v9, %v317_v61 }
  0xba   : > { %v373_v0 = vpop.f32.mrf.mxu1  ;;  %v300_v46 = vadd.f32 %v746_v9, %v299_v63 }
  0xbc   : > { %v365_v58 = vadd.f32 %v739_v54, %v300_v46 }
  0xc0   : > { %v320_v1 = vpop.f32.mrf.mxu2 }
  0xc1   : > { %v391_v2 = vpop.f32.mrf.mxu3  ;;  %v302_v3 = vpop.f32.mrf.mxu0  ;;  %v321_v34 = vadd.f32 %v746_v9, %v320_v1 }
  0xc2   : > { %v376_v4 = vpop.f32.mrf.mxu1  ;;  %v303_v24 = vadd.f32 %v746_v9, %v302_v3 }
  0xc4   : > { %v368_v39 = vadd.f32 %v367_v56, %v303_v24 }
  0xc6   : > { %v409_v51 = vmax.f32 %v368_v39, 0.0 }
  0xc8   : > { %v323_v5 = vpop.f32.mrf.mxu2 }
  0xc9   : > { %v394_v6 = vpop.f32.mrf.mxu3  ;;  %v305_v7 = vpop.f32.mrf.mxu0 }
  0xca   : > { %v379_v8 = vpop.f32.mrf.mxu1  ;;  %v306_v10 = vadd.f32 %v746_v9, %v305_v7 }
  0xcb   : > { %v380_v31 = vadd.f32 %v379_v8, %v315_v22 }
  0xcc   : > { %v371_v17 = vadd.f32 %v370_v60, %v306_v10 }
  0xcd   : > { %v413_v45 = vmax.f32 %v380_v31, 0.0 }
  0xce   : > { %v410_v20 = vmax.f32 %v371_v17, 0.0 }
  0xcf   : > { %v425_v61 = vadd.f32 %v413_v45, %v409_v51 }
  0xd0   : > { %v326_v11 = vpop.f32.mrf.mxu2  ;;  %v422_v36 = vadd.f32 %v410_v20, %v406_v27 }
  0xd1   : > { %v397_v13 = vpop.f32.mrf.mxu3  ;;  %v308_v14 = vpop.f32.mrf.mxu0  ;;  %v327_v25 = vadd.f32 %v746_v9, %v326_v11  ;;  %v408_v11 = vmax.f32 %v365_v58, 0.0 }
  0xd2   : > { %v382_v15 = vpop.f32.mrf.mxu1  ;;  %v309_v21 = vadd.f32 %v746_v9, %v308_v14 }
  0xd3   : > { %v383_v19 = vadd.f32 %v382_v15, %v318_v16  ;;  %v392_v40 = vadd.f32 %v391_v2, %v327_v25 }
  0xd4   : > { %v374_v35 = vadd.f32 %v373_v0, %v309_v21  ;;  %v324_v0 = vadd.f32 %v746_v9, %v323_v5 }
  0xd5   : > { %v414_v28 = vmax.f32 %v383_v19, 0.0  ;;  %v417_v52 = vmax.f32 %v392_v40, 0.0 }
  0xd6   : > { %v411_v47 = vmax.f32 %v374_v35, 0.0  ;;  %v389_v12 = vadd.f32 %v741_v62, %v324_v0 }
  0xd7   : > { %v426_v41 = vadd.f32 %v422_v36, %v414_v28 }
  0xd8   : > { %v329_v26 = vpop.f32.mrf.mxu2  ;;  %v423_v1 = vadd.f32 %v411_v47, %v407_v50 }
  0xd9   : > { %v330_v29 = vadd.f32 %v746_v9, %v329_v26  ;;  %v400_v30 = vpop.f32.mrf.mxu3  ;;  %v311_v32 = vpop.f32.mrf.mxu0 }
  0xda   : > { %v385_v33 = vpop.f32.mrf.mxu1  ;;  %v312_v43 = vadd.f32 %v746_v9, %v311_v32 }
  0xdb   : > { %v395_v37 = vadd.f32 %v394_v6, %v330_v29  ;;  %v386_v44 = vadd.f32 %v385_v33, %v321_v34  ;;  %v429_v6 = vadd.f32 %v425_v61, %v417_v52 }
  0xdc   : > { %v377_v56 = vadd.f32 %v376_v4, %v312_v43 }
  0xdd   : > { %v418_v42 = vmax.f32 %v395_v37, 0.0  ;;  %v415_v57 = vmax.f32 %v386_v44, 0.0 }
  0xde   : > { %v412_v7 = vmax.f32 %v377_v56, 0.0 }
  0xdf   : > { %v430_v48 = vadd.f32 %v426_v41, %v418_v42  ;;  %v427_v8 = vadd.f32 %v423_v1, %v415_v57 }
  0xe0   : > { %v332_v53 = vpop.f32.mrf.mxu2  ;;  %v424_v16 = vadd.f32 %v412_v7, %v408_v11 }
  0xe1   : > { %v434_v55 = vmul.f32 0.25, %v430_v48  ;;  %v333_v59 = vadd.f32 %v746_v9, %v332_v53  ;;  %v403_v60 = vpop.f32.mrf.mxu3 }
  0xe2   : > { %v404_v63 = vadd.f32 %v403_v60, %v339_v49 }
  0xe3   : > { %438 = vst [vmem:[%s765_s11] sm:$0xff] %v434_v55  ;;  %v398_v2 = vadd.f32 %v397_v13, %v333_v59  ;;  %v416_v13 = vmax.f32 %v389_v12, 0.0 }
  0xe4   : > { %v421_v3 = vmax.f32 %v404_v63, 0.0 }
  0xe5   : > { %v419_v4 = vmax.f32 %v398_v2, 0.0  ;;  %v428_v20 = vadd.f32 %v424_v16, %v416_v13 }
  0xe6   : > { %v433_v10 = vadd.f32 %v429_v6, %v421_v3 }
  0xe7   : > { %v431_v14 = vadd.f32 %v427_v8, %v419_v4 }
  0xe8   : > { %v437_v15 = vmul.f32 0.25, %v433_v10  ;;  %v335_v54 = vpop.f32.mrf.mxu2 }
  0xe9   : > { %v435_v5 = vmul.f32 0.25, %v431_v14  ;;  %v336_v17 = vadd.f32 %v746_v9, %v335_v54 }
  0xea   : > { %441 = vst [vmem:[%s765_s11 + $0x18] sm:$0xff] %v437_v15 }
  0xeb   : > { %439 = vst [vmem:[%s765_s11 + $0x8] sm:$0xff] %v435_v5  ;;  %v401_v18 = vadd.f32 %v400_v30, %v336_v17 }
  0xed   : > { %v420_v19 = vmax.f32 %v401_v18, 0.0 }
  0xef   : > { %v432_v21 = vadd.f32 %v428_v20, %v420_v19 }
  0xf1   : > { %v436_v22 = vmul.f32 0.25, %v432_v21 }
  0xf3   : > { %440 = vst [vmem:[%s765_s11 + $0x10] sm:$0xff] %v436_v22 }
  0xf4 PF: > { %s13_s12 = sadd.s32 1, %s577_s12  }
  0xf5   : > { %p10_p4 = scmp.ge.s32.totalorder %s13_s12, 4  }
  0xf7   :  { %12 = sbr.rel (!%p10_p4) target bundleno = 1 (0x1), region = 62 }

// kernel: lenet_forward.5
= control target key start
LH: loop header
LB: loop body
LE: loop exit
PB: predicated region body
PF: predicated region fallthrough
CT: control target
= control target key end

     0   :  { %s3150_s0 = inlined_call_operand.vmem [shape: f32[2,4096], index: 0, kind: input, shape index: {}]   ;;  %s3151_s1 = inlined_call_operand.vmem [shape: f32[4096,128], index: 1, kind: input, shape index: {}]   ;;  %s3152_s2 = inlined_call_operand.vmem [shape: f32[1,128], index: 2, kind: input, shape index: {}]   ;;  %s3153_s3 = inlined_call_operand.vmem [shape: f32[128,128], index: 3, kind: input, shape index: {}]   ;;  %s3154_s4 = inlined_call_operand.vmem [shape: f32[1,128], index: 4, kind: input, shape index: {}]   ;;  %s3155_s5 = inlined_call_operand.vmem [shape: f32[128,128], index: 5, kind: input, shape index: {}]   ;;  %s3156_s6 = inlined_call_operand.vmem [shape: f32[1,128], index: 6, kind: input, shape index: {}]   ;;  %s3157_s7 = inlined_call_operand.hbm [shape: f32[2,128], index: 7, kind: output, shape index: {}]  }
   0x1   :  { %v50_v0 = vld [vmem:[%s3151_s1 + $0x78] sm:$0xff]  ;;  %v49_v2 = vld [vmem:[%s3151_s1 + $0x70] sm:$0xff]  ;;  %v48_v6 = vld [vmem:[%s3151_s1 + $0x68] sm:$0xff] }
   0x2   :  { %v82_v1 = vld [vmem:[%s3151_s1 + $0x178] sm:$0xff]  ;;  %632 = vmatpush.msra.mxu0 %v50_v0  ;;  %v81_v4 = vld [vmem:[%s3151_s1 + $0x170] sm:$0xff]  ;;  %v80_v8 = vld [vmem:[%s3151_s1 + $0x168] sm:$0xff] }
   0x3   :  { %672 = vmatpush.msra.mxu2 %v82_v1  ;;  %v66_v3 = vld [vmem:[%s3151_s1 + $0xf8] sm:$0xff]  ;;  %v65_v7 = vld [vmem:[%s3151_s1 + $0xf0] sm:$0xff]  ;;  %v64_v10 = vld [vmem:[%s3151_s1 + $0xe8] sm:$0xff] }
   0x4   :  { %v98_v5 = vld [vmem:[%s3151_s1 + $0x1f8] sm:$0xff]  ;;  %652 = vmatpush.msra.mxu1 %v66_v3  ;;  %633 = vmatpush.msra.mxu0 %v49_v2  ;;  %v97_v9 = vld [vmem:[%s3151_s1 + $0x1f0] sm:$0xff]  ;;  %v47_v11 = vld [vmem:[%s3151_s1 + $0x60] sm:$0xff] }
   0x5   :  { %692 = vmatpush.msra.mxu3 %v98_v5  ;;  %673 = vmatpush.msra.mxu2 %v81_v4  ;;  %v79_v12 = vld [vmem:[%s3151_s1 + $0x160] sm:$0xff]  ;;  %v96_v13 = vld [vmem:[%s3151_s1 + $0x1e8] sm:$0xff]  ;;  %v46_v16 = vld [vmem:[%s3151_s1 + $0x58] sm:$0xff] }
   0x6   :  { %653 = vmatpush.msra.mxu1 %v65_v7  ;;  %634 = vmatpush.msra.mxu0 %v48_v6  ;;  %v63_v14 = vld [vmem:[%s3151_s1 + $0xe0] sm:$0xff]  ;;  %v78_v17 = vld [vmem:[%s3151_s1 + $0x158] sm:$0xff]  ;;  %v45_v20 = vld [vmem:[%s3151_s1 + $0x50] sm:$0xff] }
   0x7   :  { %693 = vmatpush.msra.mxu3 %v97_v9  ;;  %674 = vmatpush.msra.mxu2 %v80_v8  ;;  %v95_v15 = vld [vmem:[%s3151_s1 + $0x1e0] sm:$0xff]  ;;  %v62_v18 = vld [vmem:[%s3151_s1 + $0xd8] sm:$0xff]  ;;  %v77_v21 = vld [vmem:[%s3151_s1 + $0x150] sm:$0xff] }
   0x8   :  { %654 = vmatpush.msra.mxu1 %v64_v10  ;;  %635 = vmatpush.msra.mxu0 %v47_v11  ;;  %v94_v19 = vld [vmem:[%s3151_s1 + $0x1d8] sm:$0xff]  ;;  %v61_v22 = vld [vmem:[%s3151_s1 + $0xd0] sm:$0xff]  ;;  %v44_v24 = vld [vmem:[%s3151_s1 + $0x48] sm:$0xff] }
   0x9   :  { %694 = vmatpush.msra.mxu3 %v96_v13  ;;  %675 = vmatpush.msra.mxu2 %v79_v12  ;;  %v93_v23 = vld [vmem:[%s3151_s1 + $0x1d0] sm:$0xff]  ;;  %v76_v25 = vld [vmem:[%s3151_s1 + $0x148] sm:$0xff]  ;;  %v43_v28 = vld [vmem:[%s3151_s1 + $0x40] sm:$0xff] }
   0xa   :  { %655 = vmatpush.msra.mxu1 %v63_v14  ;;  %636 = vmatpush.msra.mxu0 %v46_v16  ;;  %v60_v26 = vld [vmem:[%s3151_s1 + $0xc8] sm:$0xff]  ;;  %v75_v29 = vld [vmem:[%s3151_s1 + $0x140] sm:$0xff]  ;;  %v42_v32 = vld [vmem:[%s3151_s1 + $0x38] sm:$0xff] }
   0xb   :  { %695 = vmatpush.msra.mxu3 %v95_v15  ;;  %676 = vmatpush.msra.mxu2 %v78_v17  ;;  %v92_v27 = vld [vmem:[%s3151_s1 + $0x1c8] sm:$0xff]  ;;  %v59_v30 = vld [vmem:[%s3151_s1 + $0xc0] sm:$0xff]  ;;  %v74_v33 = vld [vmem:[%s3151_s1 + $0x138] sm:$0xff] }
   0xc   :  { %656 = vmatpush.msra.mxu1 %v62_v18  ;;  %637 = vmatpush.msra.mxu0 %v45_v20  ;;  %v91_v31 = vld [vmem:[%s3151_s1 + $0x1c0] sm:$0xff]  ;;  %v58_v34 = vld [vmem:[%s3151_s1 + $0xb8] sm:$0xff]  ;;  %v41_v36 = vld [vmem:[%s3151_s1 + $0x30] sm:$0xff] }
   0xd   :  { %696 = vmatpush.msra.mxu3 %v94_v19  ;;  %677 = vmatpush.msra.mxu2 %v77_v21  ;;  %v90_v35 = vld [vmem:[%s3151_s1 + $0x1b8] sm:$0xff]  ;;  %v73_v37 = vld [vmem:[%s3151_s1 + $0x130] sm:$0xff]  ;;  %v40_v40 = vld [vmem:[%s3151_s1 + $0x28] sm:$0xff] }
   0xe   :  { %657 = vmatpush.msra.mxu1 %v61_v22  ;;  %638 = vmatpush.msra.mxu0 %v44_v24  ;;  %v57_v38 = vld [vmem:[%s3151_s1 + $0xb0] sm:$0xff]  ;;  %v72_v41 = vld [vmem:[%s3151_s1 + $0x128] sm:$0xff]  ;;  %v39_v44 = vld [vmem:[%s3151_s1 + $0x20] sm:$0xff] }
   0xf   :  { %697 = vmatpush.msra.mxu3 %v93_v23  ;;  %678 = vmatpush.msra.mxu2 %v76_v25  ;;  %v89_v39 = vld [vmem:[%s3151_s1 + $0x1b0] sm:$0xff]  ;;  %v56_v42 = vld [vmem:[%s3151_s1 + $0xa8] sm:$0xff]  ;;  %v71_v45 = vld [vmem:[%s3151_s1 + $0x120] sm:$0xff] }
  0x10   :  { %658 = vmatpush.msra.mxu1 %v60_v26  ;;  %639 = vmatpush.msra.mxu0 %v43_v28  ;;  %v88_v43 = vld [vmem:[%s3151_s1 + $0x1a8] sm:$0xff]  ;;  %v55_v46 = vld [vmem:[%s3151_s1 + $0xa0] sm:$0xff]  ;;  %v38_v48 = vld [vmem:[%s3151_s1 + $0x18] sm:$0xff] }
  0x11   :  { %698 = vmatpush.msra.mxu3 %v92_v27  ;;  %679 = vmatpush.msra.mxu2 %v75_v29  ;;  %v87_v47 = vld [vmem:[%s3151_s1 + $0x1a0] sm:$0xff]  ;;  %v70_v49 = vld [vmem:[%s3151_s1 + $0x118] sm:$0xff]  ;;  %v37_v52 = vld [vmem:[%s3151_s1 + $0x10] sm:$0xff] }
  0x12   :  { %659 = vmatpush.msra.mxu1 %v59_v30  ;;  %640 = vmatpush.msra.mxu0 %v42_v32  ;;  %v54_v50 = vld [vmem:[%s3151_s1 + $0x98] sm:$0xff]  ;;  %v69_v53 = vld [vmem:[%s3151_s1 + $0x110] sm:$0xff]  ;;  %v36_v56 = vld [vmem:[%s3151_s1 + $0x8] sm:$0xff] }
  0x13   :  { %699 = vmatpush.msra.mxu3 %v91_v31  ;;  %680 = vmatpush.msra.mxu2 %v74_v33  ;;  %v86_v51 = vld [vmem:[%s3151_s1 + $0x198] sm:$0xff]  ;;  %v53_v54 = vld [vmem:[%s3151_s1 + $0x90] sm:$0xff]  ;;  %v68_v57 = vld [vmem:[%s3151_s1 + $0x108] sm:$0xff] }
  0x14   :  { %660 = vmatpush.msra.mxu1 %v58_v34  ;;  %641 = vmatpush.msra.mxu0 %v41_v36  ;;  %v85_v55 = vld [vmem:[%s3151_s1 + $0x190] sm:$0xff]  ;;  %v52_v58 = vld [vmem:[%s3151_s1 + $0x88] sm:$0xff]  ;;  %v35_v60 = vld [vmem:[%s3151_s1] sm:$0xff] }
  0x15   :  { %700 = vmatpush.msra.mxu3 %v90_v35  ;;  %681 = vmatpush.msra.mxu2 %v73_v37  ;;  %v84_v59 = vld [vmem:[%s3151_s1 + $0x188] sm:$0xff]  ;;  %v67_v61 = vld [vmem:[%s3151_s1 + $0x100] sm:$0xff]  ;;  %v114_v62 = vld [vmem:[%s3151_s1 + $0x278] sm:$0xff] }
  0x16   :  { %661 = vmatpush.msra.mxu1 %v57_v38  ;;  %642 = vmatpush.msra.mxu0 %v40_v40  ;;  %v146_v63 = vld [vmem:[%s3151_s1 + $0x378] sm:$0xff]  ;;  %v51_v0 = vld [vmem:[%s3151_s1 + $0x80] sm:$0xff]  ;;  %v113_v2 = vld [vmem:[%s3151_s1 + $0x270] sm:$0xff] }
  0x17   :  { %701 = vmatpush.msra.mxu3 %v89_v39  ;;  %682 = vmatpush.msra.mxu2 %v72_v41  ;;  %v83_v1 = vld [vmem:[%s3151_s1 + $0x180] sm:$0xff]  ;;  %v130_v3 = vld [vmem:[%s3151_s1 + $0x2f8] sm:$0xff]  ;;  %v145_v4 = vld [vmem:[%s3151_s1 + $0x370] sm:$0xff] }
  0x18   :  { %662 = vmatpush.msra.mxu1 %v56_v42  ;;  %643 = vmatpush.msra.mxu0 %v39_v44  ;;  %v162_v5 = vld [vmem:[%s3151_s1 + $0x3f8] sm:$0xff]  ;;  %v112_v6 = vld [vmem:[%s3151_s1 + $0x268] sm:$0xff]  ;;  %v129_v7 = vld [vmem:[%s3151_s1 + $0x2f0] sm:$0xff] }
  0x19   :  { %702 = vmatpush.msra.mxu3 %v88_v43  ;;  %683 = vmatpush.msra.mxu2 %v71_v45  ;;  %v144_v8 = vld [vmem:[%s3151_s1 + $0x368] sm:$0xff]  ;;  %v161_v9 = vld [vmem:[%s3151_s1 + $0x3f0] sm:$0xff]  ;;  %v111_v10 = vld [vmem:[%s3151_s1 + $0x260] sm:$0xff] }
  0x1a   :  { %663 = vmatpush.msra.mxu1 %v55_v46  ;;  %644 = vmatpush.msra.mxu0 %v38_v48  ;;  %v128_v11 = vld [vmem:[%s3151_s1 + $0x2e8] sm:$0xff]  ;;  %v143_v12 = vld [vmem:[%s3151_s1 + $0x360] sm:$0xff]  ;;  %v110_v14 = vld [vmem:[%s3151_s1 + $0x258] sm:$0xff] }
  0x1b   :  { %703 = vmatpush.msra.mxu3 %v87_v47  ;;  %684 = vmatpush.msra.mxu2 %v70_v49  ;;  %v160_v13 = vld [vmem:[%s3151_s1 + $0x3e8] sm:$0xff]  ;;  %v127_v15 = vld [vmem:[%s3151_s1 + $0x2e0] sm:$0xff]  ;;  %v142_v16 = vld [vmem:[%s3151_s1 + $0x358] sm:$0xff] }
  0x1c   :  { %664 = vmatpush.msra.mxu1 %v54_v50  ;;  %645 = vmatpush.msra.mxu0 %v37_v52  ;;  %v159_v17 = vld [vmem:[%s3151_s1 + $0x3e0] sm:$0xff]  ;;  %v109_v18 = vld [vmem:[%s3151_s1 + $0x250] sm:$0xff]  ;;  %v126_v19 = vld [vmem:[%s3151_s1 + $0x2d8] sm:$0xff] }
  0x1d   :  { %704 = vmatpush.msra.mxu3 %v86_v51  ;;  %685 = vmatpush.msra.mxu2 %v69_v53  ;;  %v141_v20 = vld [vmem:[%s3151_s1 + $0x350] sm:$0xff]  ;;  %v158_v21 = vld [vmem:[%s3151_s1 + $0x3d8] sm:$0xff]  ;;  %v108_v22 = vld [vmem:[%s3151_s1 + $0x248] sm:$0xff] }
  0x1e   :  { %665 = vmatpush.msra.mxu1 %v53_v54  ;;  %646 = vmatpush.msra.mxu0 %v36_v56  ;;  %v125_v23 = vld [vmem:[%s3151_s1 + $0x2d0] sm:$0xff]  ;;  %v140_v24 = vld [vmem:[%s3151_s1 + $0x348] sm:$0xff]  ;;  %v27_v26 = vld [vmem:[%s3150_s0] sm:$0xff] }
  0x1f   :  { %705 = vmatpush.msra.mxu3 %v85_v55  ;;  %686 = vmatpush.msra.mxu2 %v68_v57  ;;  %v157_v25 = vld [vmem:[%s3151_s1 + $0x3d0] sm:$0xff]  ;;  %v107_v27 = vld [vmem:[%s3151_s1 + $0x240] sm:$0xff]  ;;  %v124_v28 = vld [vmem:[%s3151_s1 + $0x2c8] sm:$0xff]  ;;  %559 = vst [vmem:[#allocation1] ss:$4 sm:$0xff] %v27_v26 }
  0x20   :  { %666 = vmatpush.msra.mxu1 %v52_v58  ;;  %647 = vmatpush.msra.mxu0 %v35_v60  ;;  %v139_v29 = vld [vmem:[%s3151_s1 + $0x340] sm:$0xff]  ;;  %v156_v30 = vld [vmem:[%s3151_s1 + $0x3c8] sm:$0xff]  ;;  %v106_v31 = vld [vmem:[%s3151_s1 + $0x238] sm:$0xff] }
  0x21   :  { %706 = vmatpush.msra.mxu3 %v84_v59  ;;  %687 = vmatpush.msra.mxu2 %v67_v61  ;;  %v123_v32 = vld [vmem:[%s3151_s1 + $0x2c0] sm:$0xff]  ;;  %v138_v33 = vld [vmem:[%s3151_s1 + $0x338] sm:$0xff]  ;;  %v105_v35 = vld [vmem:[%s3151_s1 + $0x230] sm:$0xff] }
  0x22   :  { %712 = vmatpush.msrb.mxu0 %v114_v62  ;;  %667 = vmatpush.msra.mxu1 %v51_v0  ;;  %v155_v34 = vld [vmem:[%s3151_s1 + $0x3c0] sm:$0xff]  ;;  %v122_v36 = vld [vmem:[%s3151_s1 + $0x2b8] sm:$0xff]  ;;  %v137_v37 = vld [vmem:[%s3151_s1 + $0x330] sm:$0xff] }
  0x23   :  { %752 = vmatpush.msrb.mxu2 %v146_v63  ;;  %707 = vmatpush.msra.mxu3 %v83_v1  ;;  %v154_v38 = vld [vmem:[%s3151_s1 + $0x3b8] sm:$0xff]  ;;  %v104_v39 = vld [vmem:[%s3151_s1 + $0x228] sm:$0xff]  ;;  %v121_v40 = vld [vmem:[%s3151_s1 + $0x2b0] sm:$0xff] }
  0x24   :  { %713 = vmatpush.msrb.mxu0 %v113_v2  ;;  %732 = vmatpush.msrb.mxu1 %v130_v3  ;;  %v136_v41 = vld [vmem:[%s3151_s1 + $0x328] sm:$0xff]  ;;  %v153_v42 = vld [vmem:[%s3151_s1 + $0x3b0] sm:$0xff]  ;;  %v103_v44 = vld [vmem:[%s3151_s1 + $0x220] sm:$0xff] }
  0x25   :  { %753 = vmatpush.msrb.mxu2 %v145_v4  ;;  %772 = vmatpush.msrb.mxu3 %v162_v5  ;;  %v28_v43 = vld [vmem:[%s3150_s0 + $0x8] sm:$0xff]  ;;  %v29_v46 = vld [vmem:[%s3150_s0 + $0x10] sm:$0xff]  ;;  %v135_v47 = vld [vmem:[%s3151_s1 + $0x320] sm:$0xff] }
  0x26   :  { %714 = vmatpush.msrb.mxu0 %v112_v6  ;;  %733 = vmatpush.msrb.mxu1 %v129_v7  ;;  %v120_v45 = vld [vmem:[%s3151_s1 + $0x2a8] sm:$0xff]  ;;  %561 = vst [vmem:[#allocation1 + $0x20] ss:$4 sm:$0xff] %v28_v43  ;;  %v562_v48 = vld.sshfl [vmem:[#allocation1] sm:$0xff pattern:$0x73625140] }
  0x27   :  { %754 = vmatpush.msrb.mxu2 %v144_v8  ;;  %773 = vmatpush.msrb.mxu3 %v161_v9  ;;  %v564_v49 = vld.sshfl [vmem:[#allocation1 + $0x10] sm:$0xff pattern:$0x73625140]  ;;  %v1776_v50 = vld.sshfl [vmem:[#allocation1 + $0x8] sm:$0xff pattern:$0x73625140] }
  0x28   :  { %715 = vmatpush.msrb.mxu0 %v111_v10  ;;  %734 = vmatpush.msrb.mxu1 %v128_v11  ;;  %v1778_v51 = vld.sshfl [vmem:[#allocation1 + $0x18] sm:$0xff pattern:$0x73625140]  ;;  %v152_v52 = vld [vmem:[%s3151_s1 + $0x3a8] sm:$0xff]  ;;  %v119_v54 = vld [vmem:[%s3151_s1 + $0x2a0] sm:$0xff] }
  0x29   :  { %755 = vmatpush.msrb.mxu2 %v143_v12  ;;  %774 = vmatpush.msrb.mxu3 %v160_v13  ;;  %v102_v53 = vld [vmem:[%s3151_s1 + $0x218] sm:$0xff]  ;;  %570 = vst [vmem:[#allocation1] ss:$4 sm:$0xff] %v29_v46  ;;  %v151_v56 = vld [vmem:[%s3151_s1 + $0x3a0] sm:$0xff]  ;;  %v101_v57 = vld [vmem:[%s3151_s1 + $0x210] sm:$0xff] }
  0x2a   :  { %716 = vmatpush.msrb.mxu0 %v110_v14  ;;  %735 = vmatpush.msrb.mxu1 %v127_v15  ;;  %v134_v55 = vld [vmem:[%s3151_s1 + $0x318] sm:$0xff]  ;;  %v133_v59 = vld [vmem:[%s3151_s1 + $0x310] sm:$0xff]  ;;  %v100_v61 = vld [vmem:[%s3151_s1 + $0x208] sm:$0xff] }
  0x2b   :  { %756 = vmatpush.msrb.mxu2 %v142_v16  ;;  %775 = vmatpush.msrb.mxu3 %v159_v17  ;;  %v118_v58 = vld [vmem:[%s3151_s1 + $0x298] sm:$0xff]  ;;  %v117_v62 = vld [vmem:[%s3151_s1 + $0x290] sm:$0xff]  ;;  %v132_v4 = vld [vmem:[%s3151_s1 + $0x308] sm:$0xff] }
  0x2c   :  { %717 = vmatpush.msrb.mxu0 %v109_v18  ;;  %736 = vmatpush.msrb.mxu1 %v126_v19  ;;  %v150_v60 = vld [vmem:[%s3151_s1 + $0x398] sm:$0xff]  ;;  %v149_v5 = vld [vmem:[%s3151_s1 + $0x390] sm:$0xff]  ;;  %v99_v6 = vld [vmem:[%s3151_s1 + $0x200] sm:$0xff] }
  0x2d   :  { %757 = vmatpush.msrb.mxu2 %v141_v20  ;;  %776 = vmatpush.msrb.mxu3 %v158_v21  ;;  %v30_v63 = vld [vmem:[%s3150_s0 + $0x18] sm:$0xff]  ;;  %v1816_v0 = vld.sshfl [vmem:[#allocation1 + $0x30] sm:$0xff pattern:$0x73625140]  ;;  %v116_v7 = vld [vmem:[%s3151_s1 + $0x288] sm:$0xff] }
  0x2e   :  { %718 = vmatpush.msrb.mxu0 %v108_v22  ;;  %737 = vmatpush.msrb.mxu1 %v125_v23  ;;  %v1818_v1 = vld.sshfl [vmem:[#allocation1 + $0x20] sm:$0xff pattern:$0x73625140]  ;;  %v1820_v2 = vld.sshfl [vmem:[#allocation1 + $0x38] sm:$0xff pattern:$0x73625140] }
  0x2f   :  { %758 = vmatpush.msrb.mxu2 %v140_v24  ;;  %777 = vmatpush.msrb.mxu3 %v157_v25  ;;  %v1822_v3 = vld.sshfl [vmem:[#allocation1 + $0x28] sm:$0xff pattern:$0x73625140]  ;;  %v131_v8 = vld [vmem:[%s3151_s1 + $0x300] sm:$0xff]  ;;  %v178_v10 = vld [vmem:[%s3151_s1 + $0x478] sm:$0xff] }
  0x30   :  { %719 = vmatpush.msrb.mxu0 %v107_v27  ;;  %738 = vmatpush.msrb.mxu1 %v124_v28  ;;  %571 = vst [vmem:[#allocation1 + $0x20] ss:$4 sm:$0xff] %v30_v63  ;;  %v148_v9 = vld [vmem:[%s3151_s1 + $0x388] sm:$0xff]  ;;  %v210_v11 = vld [vmem:[%s3151_s1 + $0x578] sm:$0xff]  ;;  %v115_v12 = vld [vmem:[%s3151_s1 + $0x280] sm:$0xff] }
  0x31   :  { %759 = vmatpush.msrb.mxu2 %v139_v29  ;;  %778 = vmatpush.msrb.mxu3 %v156_v30  ;;  %v147_v13 = vld [vmem:[%s3151_s1 + $0x380] sm:$0xff]  ;;  %v177_v14 = vld [vmem:[%s3151_s1 + $0x470] sm:$0xff]  ;;  %v194_v15 = vld [vmem:[%s3151_s1 + $0x4f8] sm:$0xff] }
  0x32   :  { %720 = vmatpush.msrb.mxu0 %v106_v31  ;;  %739 = vmatpush.msrb.mxu1 %v123_v32  ;;  %v209_v16 = vld [vmem:[%s3151_s1 + $0x570] sm:$0xff]  ;;  %v226_v17 = vld [vmem:[%s3151_s1 + $0x5f8] sm:$0xff]  ;;  %v176_v18 = vld [vmem:[%s3151_s1 + $0x468] sm:$0xff] }
  0x33   :  { %760 = vmatpush.msrb.mxu2 %v138_v33  ;;  %779 = vmatpush.msrb.mxu3 %v155_v34  ;;  %v193_v19 = vld [vmem:[%s3151_s1 + $0x4f0] sm:$0xff]  ;;  %v208_v20 = vld [vmem:[%s3151_s1 + $0x568] sm:$0xff]  ;;  %v175_v22 = vld [vmem:[%s3151_s1 + $0x460] sm:$0xff] }
  0x34   :  { %721 = vmatpush.msrb.mxu0 %v105_v35  ;;  %740 = vmatpush.msrb.mxu1 %v122_v36  ;;  %v225_v21 = vld [vmem:[%s3151_s1 + $0x5f0] sm:$0xff]  ;;  %v192_v23 = vld [vmem:[%s3151_s1 + $0x4e8] sm:$0xff]  ;;  %v207_v24 = vld [vmem:[%s3151_s1 + $0x560] sm:$0xff] }
  0x35   :  { %761 = vmatpush.msrb.mxu2 %v137_v37  ;;  %780 = vmatpush.msrb.mxu3 %v154_v38  ;;  %v224_v25 = vld [vmem:[%s3151_s1 + $0x5e8] sm:$0xff]  ;;  %v1892_v26 = vld.sshfl [vmem:[#allocation1] sm:$0xff pattern:$0x73625140]  ;;  %v174_v29 = vld [vmem:[%s3151_s1 + $0x458] sm:$0xff] }
  0x36   :  { %722 = vmatpush.msrb.mxu0 %v104_v39  ;;  %741 = vmatpush.msrb.mxu1 %v121_v40  ;;  %v1894_v27 = vld.sshfl [vmem:[#allocation1 + $0x10] sm:$0xff pattern:$0x73625140]  ;;  %v1896_v28 = vld.sshfl [vmem:[#allocation1 + $0x8] sm:$0xff pattern:$0x73625140] }
  0x37   :  { %762 = vmatpush.msrb.mxu2 %v136_v41  ;;  %781 = vmatpush.msrb.mxu3 %v153_v42  ;;  %v31_v30 = vld [vmem:[%s3150_s0 + $0x20] sm:$0xff]  ;;  %v1904_v31 = vld.sshfl [vmem:[#allocation1 + $0x18] sm:$0xff pattern:$0x73625140]  ;;  %v173_v35 = vld [vmem:[%s3151_s1 + $0x450] sm:$0xff] }
  0x38   :  { %723 = vmatpush.msrb.mxu0 %v103_v44  ;;  %742 = vmatpush.msrb.mxu1 %v120_v45  ;;  %v191_v32 = vld [vmem:[%s3151_s1 + $0x4e0] sm:$0xff]  ;;  %v206_v33 = vld [vmem:[%s3151_s1 + $0x558] sm:$0xff]  ;;  %580 = vst [vmem:[#allocation1] ss:$4 sm:$0xff] %v31_v30  ;;  %v205_v37 = vld [vmem:[%s3151_s1 + $0x550] sm:$0xff] }
  0x39   :  { %763 = vmatpush.msrb.mxu2 %v135_v47  ;;  %782 = vmatpush.msrb.mxu3 %v152_v52  ;;  %v223_v34 = vld [vmem:[%s3151_s1 + $0x5e0] sm:$0xff]  ;;  %v190_v36 = vld [vmem:[%s3151_s1 + $0x4d8] sm:$0xff] }
  0x3a   :  { %724 = vmatpush.msrb.mxu0 %v102_v53  ;;  %743 = vmatpush.msrb.mxu1 %v119_v54 }
  0x3b   :  { %764 = vmatpush.msrb.mxu2 %v134_v55  ;;  %783 = vmatpush.msrb.mxu3 %v151_v56 }
  0x3c   :  { %725 = vmatpush.msrb.mxu0 %v101_v57  ;;  %744 = vmatpush.msrb.mxu1 %v118_v58 }
  0x3d   :  { %765 = vmatpush.msrb.mxu2 %v133_v59  ;;  %784 = vmatpush.msrb.mxu3 %v150_v60 }
  0x3e   :  { %726 = vmatpush.msrb.mxu0 %v100_v61  ;;  %745 = vmatpush.msrb.mxu1 %v117_v62 }
  0x3f   :  { %766 = vmatpush.msrb.mxu2 %v132_v4  ;;  %785 = vmatpush.msrb.mxu3 %v149_v5 }
  0x40   :  { %727 = vmatpush.msrb.mxu0 %v99_v6  ;;  %746 = vmatpush.msrb.mxu1 %v116_v7 }
  0x41   :  { %767 = vmatpush.msrb.mxu2 %v131_v8  ;;  %786 = vmatpush.msrb.mxu3 %v148_v9 }
  0x42   :  { %648 = vmatmul.f32.vlgmr.msra.gmra.mxu0 %v562_v48  ;;  %688 = vmatmul.f32.vlgmr.msra.gmra.mxu2 %v564_v49 }
  0x43   :  { %792 = vmatpush.msra.mxu0 %v178_v10  ;;  %832 = vmatpush.msra.mxu2 %v210_v11 }
  0x44   :  { %747 = vmatpush.msrb.mxu1 %v115_v12  ;;  %787 = vmatpush.msrb.mxu3 %v147_v13 }
  0x45   :  { %668 = vmatmul.f32.vlgmr.msra.gmra.mxu1 %v1776_v50  ;;  %708 = vmatmul.f32.vlgmr.msra.gmra.mxu3 %v1778_v51 }
  0x46   :  { %793 = vmatpush.msra.mxu0 %v177_v14  ;;  %812 = vmatpush.msra.mxu1 %v194_v15 }
  0x47   :  { %833 = vmatpush.msra.mxu2 %v209_v16  ;;  %852 = vmatpush.msra.mxu3 %v226_v17 }
  0x48   :  { %794 = vmatpush.msra.mxu0 %v176_v18  ;;  %813 = vmatpush.msra.mxu1 %v193_v19 }
  0x49   :  { %834 = vmatpush.msra.mxu2 %v208_v20  ;;  %853 = vmatpush.msra.mxu3 %v225_v21 }
  0x4a   :  { %795 = vmatpush.msra.mxu0 %v175_v22  ;;  %814 = vmatpush.msra.mxu1 %v192_v23 }
  0x4b   :  { %835 = vmatpush.msra.mxu2 %v207_v24  ;;  %854 = vmatpush.msra.mxu3 %v224_v25 }
  0x4c   :  { %768 = vmatmul.f32.vlgmr.msrb.gmra.mxu2 %v1816_v0  ;;  %796 = vmatpush.msra.mxu0 %v174_v29 }
  0x4d   :  { %815 = vmatpush.msra.mxu1 %v191_v32  ;;  %836 = vmatpush.msra.mxu2 %v206_v33 }
  0x4e   :  { %12 = vsyncpa [#allocation3], 0  ;;  %855 = vmatpush.msra.mxu3 %v223_v34  ;;  %728 = vmatmul.f32.vlgmr.msrb.gmra.mxu0 %v1818_v1  ;;  %v222_v38 = vld [vmem:[%s3151_s1 + $0x5d8] sm:$0xff]  ;;  %v172_v39 = vld [vmem:[%s3151_s1 + $0x448] sm:$0xff]  ;;  %s1399_s13 = smov [#allocation2]   ;;  %s1360_s17 = sshll.u32 %s3157_s7, 4  ;;  %s1361_s17 = int_to_ptr.hbm [resolvable:$true] %s1360_s17 }
  0x4f   :  { %788 = vmatmul.f32.vlgmr.msrb.gmra.mxu3 %v1820_v2  ;;  %797 = vmatpush.msra.mxu0 %v173_v35  ;;  %v189_v40 = vld [vmem:[%s3151_s1 + $0x4d0] sm:$0xff]  ;;  %v204_v41 = vld [vmem:[%s3151_s1 + $0x548] sm:$0xff]  ;;  %v171_v43 = vld [vmem:[%s3151_s1 + $0x440] sm:$0xff]  ;;  %s1358_s14 = sshll.u32 %s1399_s13, 4  ;;  %s1359_s14 = int_to_ptr.vmem [resolvable:$true] %s1358_s14 }
  0x50   :  { %816 = vmatpush.msra.mxu1 %v190_v36  ;;  %837 = vmatpush.msra.mxu2 %v205_v37  ;;  %v221_v42 = vld [vmem:[%s3151_s1 + $0x5d0] sm:$0xff]  ;;  %v188_v44 = vld [vmem:[%s3151_s1 + $0x4c8] sm:$0xff]  ;;  %v203_v45 = vld [vmem:[%s3151_s1 + $0x540] sm:$0xff] }
  0x51   :  { %856 = vmatpush.msra.mxu3 %v222_v38  ;;  %748 = vmatmul.f32.vlgmr.msrb.gmra.mxu1 %v1822_v3  ;;  %v220_v46 = vld [vmem:[%s3151_s1 + $0x5c8] sm:$0xff]  ;;  %v170_v47 = vld [vmem:[%s3151_s1 + $0x438] sm:$0xff]  ;;  %v187_v48 = vld [vmem:[%s3151_s1 + $0x4c0] sm:$0xff] }
  0x52   :  { %798 = vmatpush.msra.mxu0 %v172_v39  ;;  %817 = vmatpush.msra.mxu1 %v189_v40  ;;  %v202_v49 = vld [vmem:[%s3151_s1 + $0x538] sm:$0xff]  ;;  %v219_v50 = vld [vmem:[%s3151_s1 + $0x5c0] sm:$0xff]  ;;  %v169_v51 = vld [vmem:[%s3151_s1 + $0x430] sm:$0xff] }
  0x53   :  { %838 = vmatpush.msra.mxu2 %v204_v41  ;;  %857 = vmatpush.msra.mxu3 %v221_v42  ;;  %v186_v52 = vld [vmem:[%s3151_s1 + $0x4b8] sm:$0xff]  ;;  %v201_v53 = vld [vmem:[%s3151_s1 + $0x530] sm:$0xff]  ;;  %v168_v55 = vld [vmem:[%s3151_s1 + $0x428] sm:$0xff] }
  0x54   :  { %799 = vmatpush.msra.mxu0 %v171_v43  ;;  %818 = vmatpush.msra.mxu1 %v188_v44  ;;  %v218_v54 = vld [vmem:[%s3151_s1 + $0x5b8] sm:$0xff]  ;;  %v185_v56 = vld [vmem:[%s3151_s1 + $0x4b0] sm:$0xff]  ;;  %v200_v57 = vld [vmem:[%s3151_s1 + $0x528] sm:$0xff] }
  0x55   :  { %839 = vmatpush.msra.mxu2 %v203_v45  ;;  %858 = vmatpush.msra.mxu3 %v220_v46  ;;  %v217_v58 = vld [vmem:[%s3151_s1 + $0x5b0] sm:$0xff]  ;;  %v167_v59 = vld [vmem:[%s3151_s1 + $0x420] sm:$0xff]  ;;  %v184_v60 = vld [vmem:[%s3151_s1 + $0x4a8] sm:$0xff] }
  0x56   :  { %800 = vmatpush.msra.mxu0 %v170_v47  ;;  %819 = vmatpush.msra.mxu1 %v187_v48  ;;  %v199_v61 = vld [vmem:[%s3151_s1 + $0x520] sm:$0xff]  ;;  %v216_v62 = vld [vmem:[%s3151_s1 + $0x5a8] sm:$0xff]  ;;  %v166_v63 = vld [vmem:[%s3151_s1 + $0x418] sm:$0xff] }
  0x57   :  { %840 = vmatpush.msra.mxu2 %v202_v49  ;;  %859 = vmatpush.msra.mxu3 %v219_v50  ;;  %v183_v0 = vld [vmem:[%s3151_s1 + $0x4a0] sm:$0xff]  ;;  %v198_v1 = vld [vmem:[%s3151_s1 + $0x518] sm:$0xff]  ;;  %v165_v3 = vld [vmem:[%s3151_s1 + $0x410] sm:$0xff] }
  0x58   :  { %801 = vmatpush.msra.mxu0 %v169_v51  ;;  %820 = vmatpush.msra.mxu1 %v186_v52  ;;  %v215_v2 = vld [vmem:[%s3151_s1 + $0x5a0] sm:$0xff]  ;;  %v182_v4 = vld [vmem:[%s3151_s1 + $0x498] sm:$0xff]  ;;  %v197_v5 = vld [vmem:[%s3151_s1 + $0x510] sm:$0xff] }
  0x59   :  { %841 = vmatpush.msra.mxu2 %v201_v53  ;;  %860 = vmatpush.msra.mxu3 %v218_v54  ;;  %v214_v6 = vld [vmem:[%s3151_s1 + $0x598] sm:$0xff]  ;;  %v164_v7 = vld [vmem:[%s3151_s1 + $0x408] sm:$0xff]  ;;  %v181_v8 = vld [vmem:[%s3151_s1 + $0x490] sm:$0xff] }
  0x5a   :  { %802 = vmatpush.msra.mxu0 %v168_v55  ;;  %821 = vmatpush.msra.mxu1 %v185_v56  ;;  %v196_v9 = vld [vmem:[%s3151_s1 + $0x508] sm:$0xff]  ;;  %v213_v10 = vld [vmem:[%s3151_s1 + $0x590] sm:$0xff]  ;;  %v163_v11 = vld [vmem:[%s3151_s1 + $0x400] sm:$0xff] }
  0x5b   :  { %842 = vmatpush.msra.mxu2 %v200_v57  ;;  %861 = vmatpush.msra.mxu3 %v217_v58  ;;  %v180_v12 = vld [vmem:[%s3151_s1 + $0x488] sm:$0xff]  ;;  %v195_v13 = vld [vmem:[%s3151_s1 + $0x500] sm:$0xff]  ;;  %v242_v15 = vld [vmem:[%s3151_s1 + $0x678] sm:$0xff] }
  0x5c   :  { %803 = vmatpush.msra.mxu0 %v167_v59  ;;  %822 = vmatpush.msra.mxu1 %v184_v60  ;;  %v212_v14 = vld [vmem:[%s3151_s1 + $0x588] sm:$0xff]  ;;  %v274_v16 = vld [vmem:[%s3151_s1 + $0x778] sm:$0xff]  ;;  %v179_v17 = vld [vmem:[%s3151_s1 + $0x480] sm:$0xff] }
  0x5d   :  { %843 = vmatpush.msra.mxu2 %v199_v61  ;;  %862 = vmatpush.msra.mxu3 %v216_v62  ;;  %v211_v18 = vld [vmem:[%s3151_s1 + $0x580] sm:$0xff]  ;;  %v241_v19 = vld [vmem:[%s3151_s1 + $0x670] sm:$0xff]  ;;  %v258_v20 = vld [vmem:[%s3151_s1 + $0x6f8] sm:$0xff] }
  0x5e   :  { %804 = vmatpush.msra.mxu0 %v166_v63  ;;  %823 = vmatpush.msra.mxu1 %v183_v0  ;;  %v273_v21 = vld [vmem:[%s3151_s1 + $0x770] sm:$0xff]  ;;  %v290_v22 = vld [vmem:[%s3151_s1 + $0x7f8] sm:$0xff]  ;;  %v240_v23 = vld [vmem:[%s3151_s1 + $0x668] sm:$0xff] }
  0x5f   :  { %844 = vmatpush.msra.mxu2 %v198_v1  ;;  %863 = vmatpush.msra.mxu3 %v215_v2  ;;  %v257_v24 = vld [vmem:[%s3151_s1 + $0x6f0] sm:$0xff]  ;;  %v272_v25 = vld [vmem:[%s3151_s1 + $0x768] sm:$0xff]  ;;  %v2094_v29 = vld.sshfl [vmem:[#allocation1 + $0x20] sm:$0xff pattern:$0x73625140] }
  0x60   :  { %805 = vmatpush.msra.mxu0 %v165_v3  ;;  %824 = vmatpush.msra.mxu1 %v182_v4  ;;  %v2096_v30 = vld.sshfl [vmem:[#allocation1 + $0x30] sm:$0xff pattern:$0x73625140]  ;;  %v2098_v32 = vld.sshfl [vmem:[#allocation1 + $0x28] sm:$0xff pattern:$0x73625140] }
  0x61   :  { %845 = vmatpush.msra.mxu2 %v197_v5  ;;  %864 = vmatpush.msra.mxu3 %v214_v6  ;;  %v2106_v33 = vld.sshfl [vmem:[#allocation1 + $0x38] sm:$0xff pattern:$0x73625140]  ;;  %v271_v34 = vld [vmem:[%s3151_s1 + $0x760] sm:$0xff]  ;;  %v288_v35 = vld [vmem:[%s3151_s1 + $0x7e8] sm:$0xff] }
  0x62   :  { %806 = vmatpush.msra.mxu0 %v164_v7  ;;  %825 = vmatpush.msra.mxu1 %v181_v8  ;;  %v238_v36 = vld [vmem:[%s3151_s1 + $0x658] sm:$0xff]  ;;  %v255_v37 = vld [vmem:[%s3151_s1 + $0x6e0] sm:$0xff]  ;;  %v237_v40 = vld [vmem:[%s3151_s1 + $0x650] sm:$0xff] }
  0x63   :  { %846 = vmatpush.msra.mxu2 %v196_v9  ;;  %865 = vmatpush.msra.mxu3 %v213_v10  ;;  %v270_v38 = vld [vmem:[%s3151_s1 + $0x758] sm:$0xff]  ;;  %v287_v39 = vld [vmem:[%s3151_s1 + $0x7e0] sm:$0xff]  ;;  %v269_v42 = vld [vmem:[%s3151_s1 + $0x750] sm:$0xff] }
  0x64   :  { %807 = vmatpush.msra.mxu0 %v163_v11  ;;  %826 = vmatpush.msra.mxu1 %v180_v12  ;;  %v254_v41 = vld [vmem:[%s3151_s1 + $0x6d8] sm:$0xff]  ;;  %v236_v44 = vld [vmem:[%s3151_s1 + $0x648] sm:$0xff]  ;;  %v253_v45 = vld [vmem:[%s3151_s1 + $0x6d0] sm:$0xff] }
  0x65   :  { %847 = vmatpush.msra.mxu2 %v195_v13  ;;  %866 = vmatpush.msra.mxu3 %v212_v14  ;;  %v286_v43 = vld [vmem:[%s3151_s1 + $0x7d8] sm:$0xff]  ;;  %v268_v46 = vld [vmem:[%s3151_s1 + $0x748] sm:$0xff]  ;;  %v285_v47 = vld [vmem:[%s3151_s1 + $0x7d0] sm:$0xff] }
  0x66   :  { %808 = vmatmul.f32.vlgmr.msra.gmra.mxu0 %v1892_v26  ;;  %848 = vmatmul.f32.vlgmr.msra.gmra.mxu2 %v1894_v27  ;;  %v289_v26 = vld [vmem:[%s3151_s1 + $0x7f0] sm:$0xff]  ;;  %v239_v27 = vld [vmem:[%s3151_s1 + $0x660] sm:$0xff]  ;;  %v252_v49 = vld [vmem:[%s3151_s1 + $0x6c8] sm:$0xff] }
  0x67   :  { %872 = vmatpush.msrb.mxu0 %v242_v15  ;;  %912 = vmatpush.msrb.mxu2 %v274_v16  ;;  %v235_v48 = vld [vmem:[%s3151_s1 + $0x640] sm:$0xff]  ;;  %v284_v51 = vld [vmem:[%s3151_s1 + $0x7c8] sm:$0xff]  ;;  %v234_v52 = vld [vmem:[%s3151_s1 + $0x638] sm:$0xff] }
  0x68   :  { %827 = vmatpush.msra.mxu1 %v179_v17  ;;  %867 = vmatpush.msra.mxu3 %v211_v18  ;;  %v267_v50 = vld [vmem:[%s3151_s1 + $0x740] sm:$0xff]  ;;  %v266_v54 = vld [vmem:[%s3151_s1 + $0x738] sm:$0xff]  ;;  %v233_v56 = vld [vmem:[%s3151_s1 + $0x630] sm:$0xff] }
  0x69   :  { %828 = vmatmul.f32.vlgmr.msra.gmra.mxu1 %v1896_v28  ;;  %868 = vmatmul.f32.vlgmr.msra.gmra.mxu3 %v1904_v31  ;;  %v256_v28 = vld [vmem:[%s3151_s1 + $0x6e8] sm:$0xff]  ;;  %v251_v53 = vld [vmem:[%s3151_s1 + $0x6c0] sm:$0xff]  ;;  %v250_v57 = vld [vmem:[%s3151_s1 + $0x6b8] sm:$0xff] }
  0x6a   :  { %873 = vmatpush.msrb.mxu0 %v241_v19  ;;  %892 = vmatpush.msrb.mxu1 %v258_v20  ;;  %v32_v31 = vld [vmem:[%s3150_s0 + $0x28] sm:$0xff]  ;;  %v283_v55 = vld [vmem:[%s3151_s1 + $0x7c0] sm:$0xff]  ;;  %v265_v58 = vld [vmem:[%s3151_s1 + $0x730] sm:$0xff] }
  0x6b   :  { %913 = vmatpush.msrb.mxu2 %v273_v21  ;;  %932 = vmatpush.msrb.mxu3 %v290_v22  ;;  %581 = vst [vmem:[#allocation1 + $0x20] ss:$4 sm:$0xff] %v32_v31  ;;  %v282_v59 = vld [vmem:[%s3151_s1 + $0x7b8] sm:$0xff]  ;;  %v232_v60 = vld [vmem:[%s3151_s1 + $0x628] sm:$0xff]  ;;  %v249_v61 = vld [vmem:[%s3151_s1 + $0x6b0] sm:$0xff] }
  0x6c   :  { %874 = vmatpush.msrb.mxu0 %v240_v23  ;;  %893 = vmatpush.msrb.mxu1 %v257_v24  ;;  %v264_v62 = vld [vmem:[%s3151_s1 + $0x728] sm:$0xff]  ;;  %v281_v63 = vld [vmem:[%s3151_s1 + $0x7b0] sm:$0xff]  ;;  %v231_v0 = vld [vmem:[%s3151_s1 + $0x620] sm:$0xff] }
  0x6d   :  { %914 = vmatpush.msrb.mxu2 %v272_v25  ;;  %933 = vmatpush.msrb.mxu3 %v289_v26  ;;  %v248_v1 = vld [vmem:[%s3151_s1 + $0x6a8] sm:$0xff]  ;;  %v263_v2 = vld [vmem:[%s3151_s1 + $0x720] sm:$0xff]  ;;  %v230_v4 = vld [vmem:[%s3151_s1 + $0x618] sm:$0xff] }
  0x6e   :  { %875 = vmatpush.msrb.mxu0 %v239_v27  ;;  %894 = vmatpush.msrb.mxu1 %v256_v28  ;;  %v280_v3 = vld [vmem:[%s3151_s1 + $0x7a8] sm:$0xff]  ;;  %v247_v5 = vld [vmem:[%s3151_s1 + $0x6a0] sm:$0xff]  ;;  %v262_v6 = vld [vmem:[%s3151_s1 + $0x718] sm:$0xff] }
  0x6f   :  { %915 = vmatpush.msrb.mxu2 %v271_v34  ;;  %934 = vmatpush.msrb.mxu3 %v288_v35  ;;  %v279_v7 = vld [vmem:[%s3151_s1 + $0x7a0] sm:$0xff]  ;;  %v229_v8 = vld [vmem:[%s3151_s1 + $0x610] sm:$0xff]  ;;  %v246_v9 = vld [vmem:[%s3151_s1 + $0x698] sm:$0xff] }
  0x70   :  { %876 = vmatpush.msrb.mxu0 %v238_v36  ;;  %895 = vmatpush.msrb.mxu1 %v255_v37  ;;  %v261_v10 = vld [vmem:[%s3151_s1 + $0x710] sm:$0xff]  ;;  %v278_v11 = vld [vmem:[%s3151_s1 + $0x798] sm:$0xff]  ;;  %v228_v12 = vld [vmem:[%s3151_s1 + $0x608] sm:$0xff] }
  0x71   :  { %916 = vmatpush.msrb.mxu2 %v270_v38  ;;  %935 = vmatpush.msrb.mxu3 %v287_v39  ;;  %v245_v13 = vld [vmem:[%s3151_s1 + $0x690] sm:$0xff]  ;;  %v260_v14 = vld [vmem:[%s3151_s1 + $0x708] sm:$0xff]  ;;  %v227_v16 = vld [vmem:[%s3151_s1 + $0x600] sm:$0xff] }
  0x72   :  { %877 = vmatpush.msrb.mxu0 %v237_v40  ;;  %896 = vmatpush.msrb.mxu1 %v254_v41  ;;  %v277_v15 = vld [vmem:[%s3151_s1 + $0x790] sm:$0xff]  ;;  %v244_v17 = vld [vmem:[%s3151_s1 + $0x688] sm:$0xff]  ;;  %v259_v18 = vld [vmem:[%s3151_s1 + $0x700] sm:$0xff] }
  0x73   :  { %917 = vmatpush.msrb.mxu2 %v269_v42  ;;  %936 = vmatpush.msrb.mxu3 %v286_v43  ;;  %v276_v19 = vld [vmem:[%s3151_s1 + $0x788] sm:$0xff]  ;;  %v306_v20 = vld [vmem:[%s3151_s1 + $0x878] sm:$0xff]  ;;  %v243_v22 = vld [vmem:[%s3151_s1 + $0x680] sm:$0xff] }
  0x74   :  { %878 = vmatpush.msrb.mxu0 %v236_v44  ;;  %897 = vmatpush.msrb.mxu1 %v253_v45  ;;  %v338_v21 = vld [vmem:[%s3151_s1 + $0x978] sm:$0xff]  ;;  %v275_v23 = vld [vmem:[%s3151_s1 + $0x780] sm:$0xff]  ;;  %v305_v24 = vld [vmem:[%s3151_s1 + $0x870] sm:$0xff] }
  0x75   :  { %918 = vmatpush.msrb.mxu2 %v268_v46  ;;  %937 = vmatpush.msrb.mxu3 %v285_v47  ;;  %v322_v25 = vld [vmem:[%s3151_s1 + $0x8f8] sm:$0xff]  ;;  %v337_v26 = vld [vmem:[%s3151_s1 + $0x970] sm:$0xff]  ;;  %v336_v28 = vld [vmem:[%s3151_s1 + $0x968] sm:$0xff] }
  0x76   :  { %879 = vmatpush.msrb.mxu0 %v235_v48  ;;  %898 = vmatpush.msrb.mxu1 %v252_v49  ;;  %v354_v27 = vld [vmem:[%s3151_s1 + $0x9f8] sm:$0xff]  ;;  %v303_v31 = vld [vmem:[%s3151_s1 + $0x860] sm:$0xff]  ;;  %v352_v35 = vld [vmem:[%s3151_s1 + $0x9e8] sm:$0xff] }
  0x77   :  { %919 = vmatpush.msrb.mxu2 %v267_v50  ;;  %938 = vmatpush.msrb.mxu3 %v284_v51  ;;  %v335_v34 = vld [vmem:[%s3151_s1 + $0x960] sm:$0xff]  ;;  %v302_v36 = vld [vmem:[%s3151_s1 + $0x858] sm:$0xff]  ;;  %v301_v40 = vld [vmem:[%s3151_s1 + $0x850] sm:$0xff] }
  0x78   :  { %880 = vmatpush.msrb.mxu0 %v234_v52  ;;  %899 = vmatpush.msrb.mxu1 %v251_v53  ;;  %v319_v37 = vld [vmem:[%s3151_s1 + $0x8e0] sm:$0xff]  ;;  %v334_v38 = vld [vmem:[%s3151_s1 + $0x958] sm:$0xff]  ;;  %v333_v42 = vld [vmem:[%s3151_s1 + $0x950] sm:$0xff] }
  0x79   :  { %920 = vmatpush.msrb.mxu2 %v266_v54  ;;  %939 = vmatpush.msrb.mxu3 %v283_v55  ;;  %v351_v39 = vld [vmem:[%s3151_s1 + $0x9e0] sm:$0xff]  ;;  %v318_v41 = vld [vmem:[%s3151_s1 + $0x8d8] sm:$0xff]  ;;  %v300_v44 = vld [vmem:[%s3151_s1 + $0x848] sm:$0xff] }
  0x7a   :  { %881 = vmatpush.msrb.mxu0 %v233_v56  ;;  %900 = vmatpush.msrb.mxu1 %v250_v57  ;;  %v350_v43 = vld [vmem:[%s3151_s1 + $0x9d8] sm:$0xff]  ;;  %v317_v45 = vld [vmem:[%s3151_s1 + $0x8d0] sm:$0xff]  ;;  %v332_v46 = vld [vmem:[%s3151_s1 + $0x948] sm:$0xff] }
  0x7b   :  { %921 = vmatpush.msrb.mxu2 %v265_v58  ;;  %940 = vmatpush.msrb.mxu3 %v282_v59  ;;  %v349_v47 = vld [vmem:[%s3151_s1 + $0x9d0] sm:$0xff]  ;;  %v299_v48 = vld [vmem:[%s3151_s1 + $0x840] sm:$0xff]  ;;  %v316_v49 = vld [vmem:[%s3151_s1 + $0x8c8] sm:$0xff] }
  0x7c   :  { %882 = vmatpush.msrb.mxu0 %v232_v60  ;;  %901 = vmatpush.msrb.mxu1 %v249_v61  ;;  %v331_v50 = vld [vmem:[%s3151_s1 + $0x940] sm:$0xff]  ;;  %v348_v51 = vld [vmem:[%s3151_s1 + $0x9c8] sm:$0xff]  ;;  %v298_v52 = vld [vmem:[%s3151_s1 + $0x838] sm:$0xff] }
  0x7d   :  { %922 = vmatpush.msrb.mxu2 %v264_v62  ;;  %941 = vmatpush.msrb.mxu3 %v281_v63  ;;  %v315_v53 = vld [vmem:[%s3151_s1 + $0x8c0] sm:$0xff]  ;;  %v330_v54 = vld [vmem:[%s3151_s1 + $0x938] sm:$0xff]  ;;  %v297_v56 = vld [vmem:[%s3151_s1 + $0x830] sm:$0xff] }
  0x7e   :  { %883 = vmatpush.msrb.mxu0 %v231_v0  ;;  %902 = vmatpush.msrb.mxu1 %v248_v1  ;;  %v347_v55 = vld [vmem:[%s3151_s1 + $0x9c0] sm:$0xff]  ;;  %v314_v57 = vld [vmem:[%s3151_s1 + $0x8b8] sm:$0xff]  ;;  %v329_v58 = vld [vmem:[%s3151_s1 + $0x930] sm:$0xff] }
  0x7f   :  { %923 = vmatpush.msrb.mxu2 %v263_v2  ;;  %942 = vmatpush.msrb.mxu3 %v280_v3  ;;  %v346_v59 = vld [vmem:[%s3151_s1 + $0x9b8] sm:$0xff]  ;;  %v296_v60 = vld [vmem:[%s3151_s1 + $0x828] sm:$0xff]  ;;  %v313_v61 = vld [vmem:[%s3151_s1 + $0x8b0] sm:$0xff] }
  0x80   :  { %884 = vmatpush.msrb.mxu0 %v230_v4  ;;  %903 = vmatpush.msrb.mxu1 %v247_v5  ;;  %v328_v62 = vld [vmem:[%s3151_s1 + $0x928] sm:$0xff]  ;;  %v345_v63 = vld [vmem:[%s3151_s1 + $0x9b0] sm:$0xff]  ;;  %v295_v0 = vld [vmem:[%s3151_s1 + $0x820] sm:$0xff] }
  0x81   :  { %924 = vmatpush.msrb.mxu2 %v262_v6  ;;  %943 = vmatpush.msrb.mxu3 %v279_v7  ;;  %v312_v1 = vld [vmem:[%s3151_s1 + $0x8a8] sm:$0xff]  ;;  %v327_v2 = vld [vmem:[%s3151_s1 + $0x920] sm:$0xff]  ;;  %v294_v4 = vld [vmem:[%s3151_s1 + $0x818] sm:$0xff] }
  0x82   :  { %885 = vmatpush.msrb.mxu0 %v229_v8  ;;  %904 = vmatpush.msrb.mxu1 %v246_v9  ;;  %v344_v3 = vld [vmem:[%s3151_s1 + $0x9a8] sm:$0xff]  ;;  %v311_v5 = vld [vmem:[%s3151_s1 + $0x8a0] sm:$0xff]  ;;  %v326_v6 = vld [vmem:[%s3151_s1 + $0x918] sm:$0xff] }
  0x83   :  { %925 = vmatpush.msrb.mxu2 %v261_v10  ;;  %944 = vmatpush.msrb.mxu3 %v278_v11  ;;  %v343_v7 = vld [vmem:[%s3151_s1 + $0x9a0] sm:$0xff]  ;;  %v293_v8 = vld [vmem:[%s3151_s1 + $0x810] sm:$0xff]  ;;  %v310_v9 = vld [vmem:[%s3151_s1 + $0x898] sm:$0xff] }
  0x84   :  { %886 = vmatpush.msrb.mxu0 %v228_v12  ;;  %905 = vmatpush.msrb.mxu1 %v245_v13  ;;  %v325_v10 = vld [vmem:[%s3151_s1 + $0x910] sm:$0xff]  ;;  %v342_v11 = vld [vmem:[%s3151_s1 + $0x998] sm:$0xff]  ;;  %v292_v12 = vld [vmem:[%s3151_s1 + $0x808] sm:$0xff] }
  0x85   :  { %926 = vmatpush.msrb.mxu2 %v260_v14  ;;  %945 = vmatpush.msrb.mxu3 %v277_v15  ;;  %v309_v13 = vld [vmem:[%s3151_s1 + $0x890] sm:$0xff]  ;;  %v324_v14 = vld [vmem:[%s3151_s1 + $0x908] sm:$0xff] }
  0x86   :  { %887 = vmatpush.msrb.mxu0 %v227_v16  ;;  %906 = vmatpush.msrb.mxu1 %v244_v17  ;;  %v341_v15 = vld [vmem:[%s3151_s1 + $0x990] sm:$0xff]  ;;  %v291_v16 = vld [vmem:[%s3151_s1 + $0x800] sm:$0xff]  ;;  %v308_v17 = vld [vmem:[%s3151_s1 + $0x888] sm:$0xff] }
  0x87   :  { %927 = vmatpush.msrb.mxu2 %v259_v18  ;;  %946 = vmatpush.msrb.mxu3 %v276_v19  ;;  %v323_v18 = vld [vmem:[%s3151_s1 + $0x900] sm:$0xff]  ;;  %v340_v19 = vld [vmem:[%s3151_s1 + $0x988] sm:$0xff] }
  0x88   :  { %888 = vmatmul.f32.vlgmr.msrb.gmra.mxu0 %v2094_v29  ;;  %928 = vmatmul.f32.vlgmr.msrb.gmra.mxu2 %v2096_v30  ;;  %v304_v29 = vld [vmem:[%s3151_s1 + $0x868] sm:$0xff]  ;;  %v321_v30 = vld [vmem:[%s3151_s1 + $0x8f0] sm:$0xff] }
  0x89   :  { %952 = vmatpush.msra.mxu0 %v306_v20  ;;  %992 = vmatpush.msra.mxu2 %v338_v21  ;;  %v582_v20 = vld.sshfl [vmem:[#allocation1] sm:$0xff pattern:$0x73625140]  ;;  %v584_v21 = vld.sshfl [vmem:[#allocation1 + $0x10] sm:$0xff pattern:$0x73625140] }
  0x8a   :  { %907 = vmatpush.msrb.mxu1 %v243_v22  ;;  %947 = vmatpush.msrb.mxu3 %v275_v23  ;;  %v370_v22 = vld [vmem:[%s3151_s1 + $0xa78] sm:$0xff] }
  0x8b   :  { %908 = vmatmul.f32.vlgmr.msrb.gmra.mxu1 %v2098_v32  ;;  %948 = vmatmul.f32.vlgmr.msrb.gmra.mxu3 %v2106_v33  ;;  %v353_v32 = vld [vmem:[%s3151_s1 + $0x9f0] sm:$0xff]  ;;  %v320_v33 = vld [vmem:[%s3151_s1 + $0x8e8] sm:$0xff]  ;;  %v402_v23 = vld [vmem:[%s3151_s1 + $0xb78] sm:$0xff] }
  0x8c   :  { %953 = vmatpush.msra.mxu0 %v305_v24  ;;  %972 = vmatpush.msra.mxu1 %v322_v25  ;;  %v307_v24 = vld [vmem:[%s3151_s1 + $0x880] sm:$0xff] }
  0x8d   :  { %993 = vmatpush.msra.mxu2 %v337_v26  ;;  %1012 = vmatpush.msra.mxu3 %v354_v27  ;;  %v339_v25 = vld [vmem:[%s3151_s1 + $0x980] sm:$0xff]  ;;  %v583_v26 = vld.sshfl [vmem:[#allocation1 + $0x8] sm:$0xff pattern:$0x73625140] }
  0x8e   :  { %954 = vmatpush.msra.mxu0 %v304_v29  ;;  %973 = vmatpush.msra.mxu1 %v321_v30  ;;  %v585_v27 = vld.sshfl [vmem:[#allocation1 + $0x18] sm:$0xff pattern:$0x73625140]  ;;  %v369_v29 = vld [vmem:[%s3151_s1 + $0xa70] sm:$0xff] }
  0x8f   :  { %994 = vmatpush.msra.mxu2 %v336_v28  ;;  %1013 = vmatpush.msra.mxu3 %v353_v32  ;;  %v386_v30 = vld [vmem:[%s3151_s1 + $0xaf8] sm:$0xff]  ;;  %v401_v28 = vld [vmem:[%s3151_s1 + $0xb70] sm:$0xff] }
  0x90   :  { %955 = vmatpush.msra.mxu0 %v303_v31  ;;  %974 = vmatpush.msra.mxu1 %v320_v33  ;;  %v418_v32 = vld [vmem:[%s3151_s1 + $0xbf8] sm:$0xff]  ;;  %v368_v31 = vld [vmem:[%s3151_s1 + $0xa68] sm:$0xff]  ;;  %v385_v33 = vld [vmem:[%s3151_s1 + $0xaf0] sm:$0xff] }
  0x91   :  { %995 = vmatpush.msra.mxu2 %v335_v34  ;;  %1014 = vmatpush.msra.mxu3 %v352_v35  ;;  %v400_v34 = vld [vmem:[%s3151_s1 + $0xb68] sm:$0xff]  ;;  %v417_v35 = vld [vmem:[%s3151_s1 + $0xbf0] sm:$0xff] }
  0x92   :  { %956 = vmatpush.msra.mxu0 %v302_v36  ;;  %975 = vmatpush.msra.mxu1 %v319_v37  ;;  %v367_v36 = vld [vmem:[%s3151_s1 + $0xa60] sm:$0xff]  ;;  %v384_v37 = vld [vmem:[%s3151_s1 + $0xae8] sm:$0xff] }
  0x93   :  { %996 = vmatpush.msra.mxu2 %v334_v38  ;;  %1015 = vmatpush.msra.mxu3 %v351_v39  ;;  %v399_v38 = vld [vmem:[%s3151_s1 + $0xb60] sm:$0xff]  ;;  %v416_v39 = vld [vmem:[%s3151_s1 + $0xbe8] sm:$0xff] }
  0x94   :  { %957 = vmatpush.msra.mxu0 %v301_v40  ;;  %976 = vmatpush.msra.mxu1 %v318_v41  ;;  %v366_v40 = vld [vmem:[%s3151_s1 + $0xa58] sm:$0xff]  ;;  %v383_v41 = vld [vmem:[%s3151_s1 + $0xae0] sm:$0xff] }
  0x95   :  { %997 = vmatpush.msra.mxu2 %v333_v42  ;;  %1016 = vmatpush.msra.mxu3 %v350_v43  ;;  %v398_v42 = vld [vmem:[%s3151_s1 + $0xb58] sm:$0xff]  ;;  %v415_v43 = vld [vmem:[%s3151_s1 + $0xbe0] sm:$0xff] }
  0x96   :  { %958 = vmatpush.msra.mxu0 %v300_v44  ;;  %977 = vmatpush.msra.mxu1 %v317_v45  ;;  %v365_v44 = vld [vmem:[%s3151_s1 + $0xa50] sm:$0xff]  ;;  %v382_v45 = vld [vmem:[%s3151_s1 + $0xad8] sm:$0xff] }
  0x97   :  { %998 = vmatpush.msra.mxu2 %v332_v46  ;;  %1017 = vmatpush.msra.mxu3 %v349_v47  ;;  %v397_v46 = vld [vmem:[%s3151_s1 + $0xb50] sm:$0xff]  ;;  %v414_v47 = vld [vmem:[%s3151_s1 + $0xbd8] sm:$0xff] }
  0x98   :  { %959 = vmatpush.msra.mxu0 %v299_v48  ;;  %978 = vmatpush.msra.mxu1 %v316_v49  ;;  %v364_v48 = vld [vmem:[%s3151_s1 + $0xa48] sm:$0xff]  ;;  %v381_v49 = vld [vmem:[%s3151_s1 + $0xad0] sm:$0xff] }
  0x99   :  { %999 = vmatpush.msra.mxu2 %v331_v50  ;;  %1018 = vmatpush.msra.mxu3 %v348_v51  ;;  %v396_v50 = vld [vmem:[%s3151_s1 + $0xb48] sm:$0xff]  ;;  %v413_v51 = vld [vmem:[%s3151_s1 + $0xbd0] sm:$0xff] }
  0x9a   :  { %960 = vmatpush.msra.mxu0 %v298_v52  ;;  %979 = vmatpush.msra.mxu1 %v315_v53  ;;  %v363_v52 = vld [vmem:[%s3151_s1 + $0xa40] sm:$0xff]  ;;  %v380_v53 = vld [vmem:[%s3151_s1 + $0xac8] sm:$0xff] }
  0x9b   :  { %1000 = vmatpush.msra.mxu2 %v330_v54  ;;  %1019 = vmatpush.msra.mxu3 %v347_v55  ;;  %v395_v54 = vld [vmem:[%s3151_s1 + $0xb40] sm:$0xff]  ;;  %v412_v55 = vld [vmem:[%s3151_s1 + $0xbc8] sm:$0xff] }
  0x9c   :  { %961 = vmatpush.msra.mxu0 %v297_v56  ;;  %980 = vmatpush.msra.mxu1 %v314_v57  ;;  %v362_v56 = vld [vmem:[%s3151_s1 + $0xa38] sm:$0xff]  ;;  %v379_v57 = vld [vmem:[%s3151_s1 + $0xac0] sm:$0xff] }
  0x9d   :  { %1001 = vmatpush.msra.mxu2 %v329_v58  ;;  %1020 = vmatpush.msra.mxu3 %v346_v59  ;;  %v394_v58 = vld [vmem:[%s3151_s1 + $0xb38] sm:$0xff]  ;;  %v411_v59 = vld [vmem:[%s3151_s1 + $0xbc0] sm:$0xff] }
  0x9e   :  { %962 = vmatpush.msra.mxu0 %v296_v60  ;;  %981 = vmatpush.msra.mxu1 %v313_v61  ;;  %v361_v60 = vld [vmem:[%s3151_s1 + $0xa30] sm:$0xff]  ;;  %v378_v61 = vld [vmem:[%s3151_s1 + $0xab8] sm:$0xff] }
  0x9f   :  { %1002 = vmatpush.msra.mxu2 %v328_v62  ;;  %1021 = vmatpush.msra.mxu3 %v345_v63  ;;  %v393_v62 = vld [vmem:[%s3151_s1 + $0xb30] sm:$0xff]  ;;  %v410_v63 = vld [vmem:[%s3151_s1 + $0xbb8] sm:$0xff] }
  0xa0   :  { %963 = vmatpush.msra.mxu0 %v295_v0  ;;  %982 = vmatpush.msra.mxu1 %v312_v1  ;;  %v360_v0 = vld [vmem:[%s3151_s1 + $0xa28] sm:$0xff]  ;;  %v377_v1 = vld [vmem:[%s3151_s1 + $0xab0] sm:$0xff] }
  0xa1   :  { %1003 = vmatpush.msra.mxu2 %v327_v2  ;;  %1022 = vmatpush.msra.mxu3 %v344_v3  ;;  %v392_v2 = vld [vmem:[%s3151_s1 + $0xb28] sm:$0xff]  ;;  %v409_v3 = vld [vmem:[%s3151_s1 + $0xbb0] sm:$0xff] }
  0xa2   :  { %964 = vmatpush.msra.mxu0 %v294_v4  ;;  %983 = vmatpush.msra.mxu1 %v311_v5  ;;  %v359_v4 = vld [vmem:[%s3151_s1 + $0xa20] sm:$0xff]  ;;  %v376_v5 = vld [vmem:[%s3151_s1 + $0xaa8] sm:$0xff] }
  0xa3   :  { %1004 = vmatpush.msra.mxu2 %v326_v6  ;;  %1023 = vmatpush.msra.mxu3 %v343_v7  ;;  %v391_v6 = vld [vmem:[%s3151_s1 + $0xb20] sm:$0xff]  ;;  %v408_v7 = vld [vmem:[%s3151_s1 + $0xba8] sm:$0xff] }
  0xa4   :  { %965 = vmatpush.msra.mxu0 %v293_v8  ;;  %984 = vmatpush.msra.mxu1 %v310_v9  ;;  %v358_v8 = vld [vmem:[%s3151_s1 + $0xa18] sm:$0xff]  ;;  %v375_v9 = vld [vmem:[%s3151_s1 + $0xaa0] sm:$0xff] }
  0xa5   :  { %1005 = vmatpush.msra.mxu2 %v325_v10  ;;  %1024 = vmatpush.msra.mxu3 %v342_v11  ;;  %v390_v10 = vld [vmem:[%s3151_s1 + $0xb18] sm:$0xff]  ;;  %v407_v11 = vld [vmem:[%s3151_s1 + $0xba0] sm:$0xff] }
  0xa6   :  { %966 = vmatpush.msra.mxu0 %v292_v12  ;;  %985 = vmatpush.msra.mxu1 %v309_v13  ;;  %v357_v12 = vld [vmem:[%s3151_s1 + $0xa10] sm:$0xff]  ;;  %v374_v13 = vld [vmem:[%s3151_s1 + $0xa98] sm:$0xff] }
  0xa7   :  { %1006 = vmatpush.msra.mxu2 %v324_v14  ;;  %1025 = vmatpush.msra.mxu3 %v341_v15  ;;  %v389_v14 = vld [vmem:[%s3151_s1 + $0xb10] sm:$0xff]  ;;  %v406_v15 = vld [vmem:[%s3151_s1 + $0xb98] sm:$0xff] }
  0xa8   :  { %967 = vmatpush.msra.mxu0 %v291_v16  ;;  %986 = vmatpush.msra.mxu1 %v308_v17  ;;  %v356_v16 = vld [vmem:[%s3151_s1 + $0xa08] sm:$0xff]  ;;  %v373_v17 = vld [vmem:[%s3151_s1 + $0xa90] sm:$0xff] }
  0xa9   :  { %1007 = vmatpush.msra.mxu2 %v323_v18  ;;  %1026 = vmatpush.msra.mxu3 %v340_v19  ;;  %v33_v18 = vld [vmem:[%s3150_s0 + $0x30] sm:$0xff]  ;;  %v388_v19 = vld [vmem:[%s3151_s1 + $0xb08] sm:$0xff] }
  0xaa   :  { %968 = vmatmul.f32.vlgmr.msra.gmra.mxu0 %v582_v20  ;;  %1008 = vmatmul.f32.vlgmr.msra.gmra.mxu2 %v584_v21  ;;  %v405_v20 = vld [vmem:[%s3151_s1 + $0xb90] sm:$0xff]  ;;  %590 = vst [vmem:[#allocation1] ss:$4 sm:$0xff] %v33_v18  ;;  %v355_v21 = vld [vmem:[%s3151_s1 + $0xa00] sm:$0xff]  ;;  %v438_v18 = vld [vmem:[%s3151_s1 + $0xc98] sm:$0xff] }
  0xab   :  { %1032 = vmatpush.msrb.mxu0 %v370_v22  ;;  %1072 = vmatpush.msrb.mxu2 %v402_v23  ;;  %v372_v22 = vld [vmem:[%s3151_s1 + $0xa88] sm:$0xff]  ;;  %v387_v23 = vld [vmem:[%s3151_s1 + $0xb00] sm:$0xff] }
  0xac   :  { %987 = vmatpush.msra.mxu1 %v307_v24  ;;  %1027 = vmatpush.msra.mxu3 %v339_v25  ;;  %v404_v24 = vld [vmem:[%s3151_s1 + $0xb88] sm:$0xff]  ;;  %v586_v25 = vld.sshfl [vmem:[#allocation1 + $0x20] sm:$0xff pattern:$0x73625140] }
  0xad   :  { %988 = vmatmul.f32.vlgmr.msra.gmra.mxu1 %v583_v26  ;;  %1028 = vmatmul.f32.vlgmr.msra.gmra.mxu3 %v585_v27  ;;  %v588_v26 = vld.sshfl [vmem:[#allocation1 + $0x30] sm:$0xff pattern:$0x73625140]  ;;  %v434_v27 = vld [vmem:[%s3151_s1 + $0xc78] sm:$0xff] }
  0xae   :  { %1033 = vmatpush.msrb.mxu0 %v369_v29  ;;  %1052 = vmatpush.msrb.mxu1 %v386_v30  ;;  %v466_v29 = vld [vmem:[%s3151_s1 + $0xd78] sm:$0xff]  ;;  %v371_v30 = vld [vmem:[%s3151_s1 + $0xa80] sm:$0xff] }
  0xaf   :  { %1073 = vmatpush.msrb.mxu2 %v401_v28  ;;  %1092 = vmatpush.msrb.mxu3 %v418_v32  ;;  %v403_v28 = vld [vmem:[%s3151_s1 + $0xb80] sm:$0xff]  ;;  %v587_v32 = vld.sshfl [vmem:[#allocation1 + $0x28] sm:$0xff pattern:$0x73625140] }
  0xb0   :  { %1034 = vmatpush.msrb.mxu0 %v368_v31  ;;  %1053 = vmatpush.msrb.mxu1 %v385_v33  ;;  %v589_v31 = vld.sshfl [vmem:[#allocation1 + $0x38] sm:$0xff pattern:$0x73625140]  ;;  %v433_v33 = vld [vmem:[%s3151_s1 + $0xc70] sm:$0xff] }
  0xb1   :  { %1074 = vmatpush.msrb.mxu2 %v400_v34  ;;  %1093 = vmatpush.msrb.mxu3 %v417_v35  ;;  %v450_v34 = vld [vmem:[%s3151_s1 + $0xcf8] sm:$0xff]  ;;  %v465_v35 = vld [vmem:[%s3151_s1 + $0xd70] sm:$0xff] }
  0xb2   :  { %1035 = vmatpush.msrb.mxu0 %v367_v36  ;;  %1054 = vmatpush.msrb.mxu1 %v384_v37  ;;  %v482_v36 = vld [vmem:[%s3151_s1 + $0xdf8] sm:$0xff]  ;;  %v432_v37 = vld [vmem:[%s3151_s1 + $0xc68] sm:$0xff] }
  0xb3   :  { %1075 = vmatpush.msrb.mxu2 %v399_v38  ;;  %1094 = vmatpush.msrb.mxu3 %v416_v39  ;;  %v449_v38 = vld [vmem:[%s3151_s1 + $0xcf0] sm:$0xff]  ;;  %v464_v39 = vld [vmem:[%s3151_s1 + $0xd68] sm:$0xff] }
  0xb4   :  { %1036 = vmatpush.msrb.mxu0 %v366_v40  ;;  %1055 = vmatpush.msrb.mxu1 %v383_v41  ;;  %v481_v40 = vld [vmem:[%s3151_s1 + $0xdf0] sm:$0xff]  ;;  %v431_v41 = vld [vmem:[%s3151_s1 + $0xc60] sm:$0xff] }
  0xb5   :  { %1076 = vmatpush.msrb.mxu2 %v398_v42  ;;  %1095 = vmatpush.msrb.mxu3 %v415_v43  ;;  %v448_v42 = vld [vmem:[%s3151_s1 + $0xce8] sm:$0xff]  ;;  %v463_v43 = vld [vmem:[%s3151_s1 + $0xd60] sm:$0xff] }
  0xb6   :  { %1037 = vmatpush.msrb.mxu0 %v365_v44  ;;  %1056 = vmatpush.msrb.mxu1 %v382_v45  ;;  %v480_v44 = vld [vmem:[%s3151_s1 + $0xde8] sm:$0xff]  ;;  %v430_v45 = vld [vmem:[%s3151_s1 + $0xc58] sm:$0xff] }
  0xb7   :  { %1077 = vmatpush.msrb.mxu2 %v397_v46  ;;  %1096 = vmatpush.msrb.mxu3 %v414_v47  ;;  %v447_v46 = vld [vmem:[%s3151_s1 + $0xce0] sm:$0xff]  ;;  %v462_v47 = vld [vmem:[%s3151_s1 + $0xd58] sm:$0xff] }
  0xb8   :  { %1038 = vmatpush.msrb.mxu0 %v364_v48  ;;  %1057 = vmatpush.msrb.mxu1 %v381_v49  ;;  %v479_v48 = vld [vmem:[%s3151_s1 + $0xde0] sm:$0xff]  ;;  %v429_v49 = vld [vmem:[%s3151_s1 + $0xc50] sm:$0xff] }
  0xb9   :  { %1078 = vmatpush.msrb.mxu2 %v396_v50  ;;  %1097 = vmatpush.msrb.mxu3 %v413_v51  ;;  %v446_v50 = vld [vmem:[%s3151_s1 + $0xcd8] sm:$0xff]  ;;  %v461_v51 = vld [vmem:[%s3151_s1 + $0xd50] sm:$0xff] }
  0xba   :  { %1039 = vmatpush.msrb.mxu0 %v363_v52  ;;  %1058 = vmatpush.msrb.mxu1 %v380_v53  ;;  %v478_v52 = vld [vmem:[%s3151_s1 + $0xdd8] sm:$0xff]  ;;  %v428_v53 = vld [vmem:[%s3151_s1 + $0xc48] sm:$0xff] }
  0xbb   :  { %1079 = vmatpush.msrb.mxu2 %v395_v54  ;;  %1098 = vmatpush.msrb.mxu3 %v412_v55  ;;  %v445_v54 = vld [vmem:[%s3151_s1 + $0xcd0] sm:$0xff]  ;;  %v460_v55 = vld [vmem:[%s3151_s1 + $0xd48] sm:$0xff] }
  0xbc   :  { %1040 = vmatpush.msrb.mxu0 %v362_v56  ;;  %1059 = vmatpush.msrb.mxu1 %v379_v57  ;;  %v477_v56 = vld [vmem:[%s3151_s1 + $0xdd0] sm:$0xff]  ;;  %v427_v57 = vld [vmem:[%s3151_s1 + $0xc40] sm:$0xff] }
  0xbd   :  { %1080 = vmatpush.msrb.mxu2 %v394_v58  ;;  %1099 = vmatpush.msrb.mxu3 %v411_v59  ;;  %v444_v58 = vld [vmem:[%s3151_s1 + $0xcc8] sm:$0xff]  ;;  %v459_v59 = vld [vmem:[%s3151_s1 + $0xd40] sm:$0xff] }
  0xbe   :  { %1041 = vmatpush.msrb.mxu0 %v361_v60  ;;  %1060 = vmatpush.msrb.mxu1 %v378_v61  ;;  %v476_v60 = vld [vmem:[%s3151_s1 + $0xdc8] sm:$0xff]  ;;  %v426_v61 = vld [vmem:[%s3151_s1 + $0xc38] sm:$0xff] }
  0xbf   :  { %1081 = vmatpush.msrb.mxu2 %v393_v62  ;;  %1100 = vmatpush.msrb.mxu3 %v410_v63  ;;  %v443_v62 = vld [vmem:[%s3151_s1 + $0xcc0] sm:$0xff]  ;;  %v458_v63 = vld [vmem:[%s3151_s1 + $0xd38] sm:$0xff] }
  0xc0   :  { %1042 = vmatpush.msrb.mxu0 %v360_v0  ;;  %1061 = vmatpush.msrb.mxu1 %v377_v1  ;;  %v475_v0 = vld [vmem:[%s3151_s1 + $0xdc0] sm:$0xff]  ;;  %v425_v1 = vld [vmem:[%s3151_s1 + $0xc30] sm:$0xff] }
  0xc1   :  { %1082 = vmatpush.msrb.mxu2 %v392_v2  ;;  %1101 = vmatpush.msrb.mxu3 %v409_v3  ;;  %v442_v2 = vld [vmem:[%s3151_s1 + $0xcb8] sm:$0xff]  ;;  %v457_v3 = vld [vmem:[%s3151_s1 + $0xd30] sm:$0xff] }
  0xc2   :  { %1043 = vmatpush.msrb.mxu0 %v359_v4  ;;  %1062 = vmatpush.msrb.mxu1 %v376_v5  ;;  %v474_v4 = vld [vmem:[%s3151_s1 + $0xdb8] sm:$0xff]  ;;  %v424_v5 = vld [vmem:[%s3151_s1 + $0xc28] sm:$0xff] }
  0xc3   :  { %1083 = vmatpush.msrb.mxu2 %v391_v6  ;;  %1102 = vmatpush.msrb.mxu3 %v408_v7  ;;  %v441_v6 = vld [vmem:[%s3151_s1 + $0xcb0] sm:$0xff]  ;;  %v456_v7 = vld [vmem:[%s3151_s1 + $0xd28] sm:$0xff] }
  0xc4   :  { %1044 = vmatpush.msrb.mxu0 %v358_v8  ;;  %1063 = vmatpush.msrb.mxu1 %v375_v9  ;;  %v473_v8 = vld [vmem:[%s3151_s1 + $0xdb0] sm:$0xff]  ;;  %v423_v9 = vld [vmem:[%s3151_s1 + $0xc20] sm:$0xff] }
  0xc5   :  { %1084 = vmatpush.msrb.mxu2 %v390_v10  ;;  %1103 = vmatpush.msrb.mxu3 %v407_v11  ;;  %v440_v10 = vld [vmem:[%s3151_s1 + $0xca8] sm:$0xff]  ;;  %v455_v11 = vld [vmem:[%s3151_s1 + $0xd20] sm:$0xff] }
  0xc6   :  { %1045 = vmatpush.msrb.mxu0 %v357_v12  ;;  %1064 = vmatpush.msrb.mxu1 %v374_v13  ;;  %v472_v12 = vld [vmem:[%s3151_s1 + $0xda8] sm:$0xff]  ;;  %v422_v13 = vld [vmem:[%s3151_s1 + $0xc18] sm:$0xff] }
  0xc7   :  { %1085 = vmatpush.msrb.mxu2 %v389_v14  ;;  %1104 = vmatpush.msrb.mxu3 %v406_v15  ;;  %v439_v14 = vld [vmem:[%s3151_s1 + $0xca0] sm:$0xff]  ;;  %v454_v15 = vld [vmem:[%s3151_s1 + $0xd18] sm:$0xff] }
  0xc8   :  { %1046 = vmatpush.msrb.mxu0 %v356_v16  ;;  %1065 = vmatpush.msrb.mxu1 %v373_v17  ;;  %v471_v16 = vld [vmem:[%s3151_s1 + $0xda0] sm:$0xff]  ;;  %v421_v17 = vld [vmem:[%s3151_s1 + $0xc10] sm:$0xff] }
  0xc9   :  { %1086 = vmatpush.msrb.mxu2 %v388_v19  ;;  %1105 = vmatpush.msrb.mxu3 %v405_v20  ;;  %v453_v19 = vld [vmem:[%s3151_s1 + $0xd10] sm:$0xff]  ;;  %v470_v20 = vld [vmem:[%s3151_s1 + $0xd98] sm:$0xff] }
  0xca   :  { %1047 = vmatpush.msrb.mxu0 %v355_v21  ;;  %1066 = vmatpush.msrb.mxu1 %v372_v22  ;;  %v420_v21 = vld [vmem:[%s3151_s1 + $0xc08] sm:$0xff]  ;;  %v437_v22 = vld [vmem:[%s3151_s1 + $0xc90] sm:$0xff] }
  0xcb   :  { %1087 = vmatpush.msrb.mxu2 %v387_v23  ;;  %1106 = vmatpush.msrb.mxu3 %v404_v24  ;;  %v34_v23 = vld [vmem:[%s3150_s0 + $0x38] sm:$0xff]  ;;  %v452_v24 = vld [vmem:[%s3151_s1 + $0xd08] sm:$0xff] }
  0xcc   :  { %1048 = vmatmul.f32.vlgmr.msrb.gmra.mxu0 %v586_v25  ;;  %1088 = vmatmul.f32.vlgmr.msrb.gmra.mxu2 %v588_v26  ;;  %v469_v25 = vld [vmem:[%s3151_s1 + $0xd90] sm:$0xff]  ;;  %591 = vst [vmem:[#allocation1 + $0x20] ss:$4 sm:$0xff] %v34_v23  ;;  %v419_v26 = vld [vmem:[%s3151_s1 + $0xc00] sm:$0xff]  ;;  %v502_v23 = vld [vmem:[%s3151_s1 + $0xe98] sm:$0xff] }
  0xcd   :  { %1112 = vmatpush.msra.mxu0 %v434_v27  ;;  %1152 = vmatpush.msra.mxu2 %v466_v29  ;;  %v436_v27 = vld [vmem:[%s3151_s1 + $0xc88] sm:$0xff]  ;;  %v451_v29 = vld [vmem:[%s3151_s1 + $0xd00] sm:$0xff] }
  0xce   :  { %1067 = vmatpush.msrb.mxu1 %v371_v30  ;;  %1107 = vmatpush.msrb.mxu3 %v403_v28  ;;  %v468_v30 = vld [vmem:[%s3151_s1 + $0xd88] sm:$0xff]  ;;  %v592_v28 = vld.sshfl [vmem:[#allocation1] sm:$0xff pattern:$0x73625140] }
  0xcf   :  { %1068 = vmatmul.f32.vlgmr.msrb.gmra.mxu1 %v587_v32  ;;  %1108 = vmatmul.f32.vlgmr.msrb.gmra.mxu3 %v589_v31  ;;  %v594_v32 = vld.sshfl [vmem:[#allocation1 + $0x10] sm:$0xff pattern:$0x73625140]  ;;  %v498_v31 = vld [vmem:[%s3151_s1 + $0xe78] sm:$0xff] }
  0xd0   :  { %1113 = vmatpush.msra.mxu0 %v433_v33  ;;  %1132 = vmatpush.msra.mxu1 %v450_v34  ;;  %v530_v33 = vld [vmem:[%s3151_s1 + $0xf78] sm:$0xff]  ;;  %v435_v34 = vld [vmem:[%s3151_s1 + $0xc80] sm:$0xff] }
  0xd1   :  { %1153 = vmatpush.msra.mxu2 %v465_v35  ;;  %1172 = vmatpush.msra.mxu3 %v482_v36  ;;  %v467_v35 = vld [vmem:[%s3151_s1 + $0xd80] sm:$0xff]  ;;  %v593_v36 = vld.sshfl [vmem:[#allocation1 + $0x8] sm:$0xff pattern:$0x73625140] }
  0xd2   :  { %1114 = vmatpush.msra.mxu0 %v432_v37  ;;  %1133 = vmatpush.msra.mxu1 %v449_v38  ;;  %v595_v37 = vld.sshfl [vmem:[#allocation1 + $0x18] sm:$0xff pattern:$0x73625140]  ;;  %v497_v38 = vld [vmem:[%s3151_s1 + $0xe70] sm:$0xff] }
  0xd3   :  { %1154 = vmatpush.msra.mxu2 %v464_v39  ;;  %1173 = vmatpush.msra.mxu3 %v481_v40  ;;  %v514_v39 = vld [vmem:[%s3151_s1 + $0xef8] sm:$0xff]  ;;  %v529_v40 = vld [vmem:[%s3151_s1 + $0xf70] sm:$0xff] }
  0xd4   :  { %1115 = vmatpush.msra.mxu0 %v431_v41  ;;  %1134 = vmatpush.msra.mxu1 %v448_v42  ;;  %v546_v41 = vld [vmem:[%s3151_s1 + $0xff8] sm:$0xff]  ;;  %v496_v42 = vld [vmem:[%s3151_s1 + $0xe68] sm:$0xff] }
  0xd5   :  { %1155 = vmatpush.msra.mxu2 %v463_v43  ;;  %1174 = vmatpush.msra.mxu3 %v480_v44  ;;  %v513_v43 = vld [vmem:[%s3151_s1 + $0xef0] sm:$0xff]  ;;  %v528_v44 = vld [vmem:[%s3151_s1 + $0xf68] sm:$0xff] }
  0xd6   :  { %1116 = vmatpush.msra.mxu0 %v430_v45  ;;  %1135 = vmatpush.msra.mxu1 %v447_v46  ;;  %v545_v45 = vld [vmem:[%s3151_s1 + $0xff0] sm:$0xff]  ;;  %v495_v46 = vld [vmem:[%s3151_s1 + $0xe60] sm:$0xff] }
  0xd7   :  { %1156 = vmatpush.msra.mxu2 %v462_v47  ;;  %1175 = vmatpush.msra.mxu3 %v479_v48  ;;  %v512_v47 = vld [vmem:[%s3151_s1 + $0xee8] sm:$0xff]  ;;  %v527_v48 = vld [vmem:[%s3151_s1 + $0xf60] sm:$0xff] }
  0xd8   :  { %1117 = vmatpush.msra.mxu0 %v429_v49  ;;  %1136 = vmatpush.msra.mxu1 %v446_v50  ;;  %v544_v49 = vld [vmem:[%s3151_s1 + $0xfe8] sm:$0xff]  ;;  %v494_v50 = vld [vmem:[%s3151_s1 + $0xe58] sm:$0xff] }
  0xd9   :  { %1157 = vmatpush.msra.mxu2 %v461_v51  ;;  %1176 = vmatpush.msra.mxu3 %v478_v52  ;;  %v511_v51 = vld [vmem:[%s3151_s1 + $0xee0] sm:$0xff]  ;;  %v526_v52 = vld [vmem:[%s3151_s1 + $0xf58] sm:$0xff] }
  0xda   :  { %1118 = vmatpush.msra.mxu0 %v428_v53  ;;  %1137 = vmatpush.msra.mxu1 %v445_v54  ;;  %v543_v53 = vld [vmem:[%s3151_s1 + $0xfe0] sm:$0xff]  ;;  %v493_v54 = vld [vmem:[%s3151_s1 + $0xe50] sm:$0xff] }
  0xdb   :  { %1158 = vmatpush.msra.mxu2 %v460_v55  ;;  %1177 = vmatpush.msra.mxu3 %v477_v56  ;;  %v510_v55 = vld [vmem:[%s3151_s1 + $0xed8] sm:$0xff]  ;;  %v525_v56 = vld [vmem:[%s3151_s1 + $0xf50] sm:$0xff] }
  0xdc   :  { %1119 = vmatpush.msra.mxu0 %v427_v57  ;;  %1138 = vmatpush.msra.mxu1 %v444_v58  ;;  %v542_v57 = vld [vmem:[%s3151_s1 + $0xfd8] sm:$0xff]  ;;  %v492_v58 = vld [vmem:[%s3151_s1 + $0xe48] sm:$0xff] }
  0xdd   :  { %1159 = vmatpush.msra.mxu2 %v459_v59  ;;  %1178 = vmatpush.msra.mxu3 %v476_v60  ;;  %v509_v59 = vld [vmem:[%s3151_s1 + $0xed0] sm:$0xff]  ;;  %v524_v60 = vld [vmem:[%s3151_s1 + $0xf48] sm:$0xff] }
  0xde   :  { %1120 = vmatpush.msra.mxu0 %v426_v61  ;;  %1139 = vmatpush.msra.mxu1 %v443_v62  ;;  %v541_v61 = vld [vmem:[%s3151_s1 + $0xfd0] sm:$0xff]  ;;  %v491_v62 = vld [vmem:[%s3151_s1 + $0xe40] sm:$0xff] }
  0xdf   :  { %1160 = vmatpush.msra.mxu2 %v458_v63  ;;  %1179 = vmatpush.msra.mxu3 %v475_v0  ;;  %v508_v63 = vld [vmem:[%s3151_s1 + $0xec8] sm:$0xff]  ;;  %v523_v0 = vld [vmem:[%s3151_s1 + $0xf40] sm:$0xff] }
  0xe0   :  { %1121 = vmatpush.msra.mxu0 %v425_v1  ;;  %1140 = vmatpush.msra.mxu1 %v442_v2  ;;  %v540_v1 = vld [vmem:[%s3151_s1 + $0xfc8] sm:$0xff]  ;;  %v490_v2 = vld [vmem:[%s3151_s1 + $0xe38] sm:$0xff] }
  0xe1   :  { %1161 = vmatpush.msra.mxu2 %v457_v3  ;;  %1180 = vmatpush.msra.mxu3 %v474_v4  ;;  %v507_v3 = vld [vmem:[%s3151_s1 + $0xec0] sm:$0xff]  ;;  %v522_v4 = vld [vmem:[%s3151_s1 + $0xf38] sm:$0xff] }
  0xe2   :  { %1122 = vmatpush.msra.mxu0 %v424_v5  ;;  %1141 = vmatpush.msra.mxu1 %v441_v6  ;;  %v539_v5 = vld [vmem:[%s3151_s1 + $0xfc0] sm:$0xff]  ;;  %v489_v6 = vld [vmem:[%s3151_s1 + $0xe30] sm:$0xff] }
  0xe3   :  { %1162 = vmatpush.msra.mxu2 %v456_v7  ;;  %1181 = vmatpush.msra.mxu3 %v473_v8  ;;  %v506_v7 = vld [vmem:[%s3151_s1 + $0xeb8] sm:$0xff]  ;;  %v521_v8 = vld [vmem:[%s3151_s1 + $0xf30] sm:$0xff] }
  0xe4   :  { %1123 = vmatpush.msra.mxu0 %v423_v9  ;;  %1142 = vmatpush.msra.mxu1 %v440_v10  ;;  %v538_v9 = vld [vmem:[%s3151_s1 + $0xfb8] sm:$0xff]  ;;  %v488_v10 = vld [vmem:[%s3151_s1 + $0xe28] sm:$0xff] }
  0xe5   :  { %1163 = vmatpush.msra.mxu2 %v455_v11  ;;  %1182 = vmatpush.msra.mxu3 %v472_v12  ;;  %v505_v11 = vld [vmem:[%s3151_s1 + $0xeb0] sm:$0xff]  ;;  %v520_v12 = vld [vmem:[%s3151_s1 + $0xf28] sm:$0xff] }
  0xe6   :  { %1124 = vmatpush.msra.mxu0 %v422_v13  ;;  %1143 = vmatpush.msra.mxu1 %v439_v14  ;;  %v537_v13 = vld [vmem:[%s3151_s1 + $0xfb0] sm:$0xff]  ;;  %v487_v14 = vld [vmem:[%s3151_s1 + $0xe20] sm:$0xff] }
  0xe7   :  { %1164 = vmatpush.msra.mxu2 %v454_v15  ;;  %1183 = vmatpush.msra.mxu3 %v471_v16  ;;  %v504_v15 = vld [vmem:[%s3151_s1 + $0xea8] sm:$0xff]  ;;  %v519_v16 = vld [vmem:[%s3151_s1 + $0xf20] sm:$0xff] }
  0xe8   :  { %1125 = vmatpush.msra.mxu0 %v421_v17  ;;  %1144 = vmatpush.msra.mxu1 %v438_v18  ;;  %v536_v17 = vld [vmem:[%s3151_s1 + $0xfa8] sm:$0xff]  ;;  %v486_v18 = vld [vmem:[%s3151_s1 + $0xe18] sm:$0xff] }
  0xe9   :  { %1165 = vmatpush.msra.mxu2 %v453_v19  ;;  %1184 = vmatpush.msra.mxu3 %v470_v20  ;;  %v503_v19 = vld [vmem:[%s3151_s1 + $0xea0] sm:$0xff]  ;;  %v518_v20 = vld [vmem:[%s3151_s1 + $0xf18] sm:$0xff] }
  0xea   :  { %1126 = vmatpush.msra.mxu0 %v420_v21  ;;  %1145 = vmatpush.msra.mxu1 %v437_v22  ;;  %v535_v21 = vld [vmem:[%s3151_s1 + $0xfa0] sm:$0xff]  ;;  %v485_v22 = vld [vmem:[%s3151_s1 + $0xe10] sm:$0xff] }
  0xeb   :  { %1166 = vmatpush.msra.mxu2 %v452_v24  ;;  %1185 = vmatpush.msra.mxu3 %v469_v25  ;;  %v517_v24 = vld [vmem:[%s3151_s1 + $0xf10] sm:$0xff]  ;;  %v534_v25 = vld [vmem:[%s3151_s1 + $0xf98] sm:$0xff] }
  0xec   :  { %1127 = vmatpush.msra.mxu0 %v419_v26  ;;  %1146 = vmatpush.msra.mxu1 %v436_v27  ;;  %v484_v26 = vld [vmem:[%s3151_s1 + $0xe08] sm:$0xff]  ;;  %v501_v27 = vld [vmem:[%s3151_s1 + $0xe90] sm:$0xff] }
  0xed   :  { %1167 = vmatpush.msra.mxu2 %v451_v29  ;;  %1186 = vmatpush.msra.mxu3 %v468_v30  ;;  %v516_v29 = vld [vmem:[%s3151_s1 + $0xf08] sm:$0xff]  ;;  %v533_v30 = vld [vmem:[%s3151_s1 + $0xf90] sm:$0xff] }
  0xee   :  { %1128 = vmatmul.f32.vlgmr.msra.gmra.mxu0 %v592_v28  ;;  %1168 = vmatmul.f32.vlgmr.msra.gmra.mxu2 %v594_v32  ;;  %v483_v28 = vld [vmem:[%s3151_s1 + $0xe00] sm:$0xff]  ;;  %v500_v32 = vld [vmem:[%s3151_s1 + $0xe88] sm:$0xff] }
  0xef   :  { %1192 = vmatpush.msrb.mxu0 %v498_v31  ;;  %1232 = vmatpush.msrb.mxu2 %v530_v33  ;;  %v515_v31 = vld [vmem:[%s3151_s1 + $0xf00] sm:$0xff]  ;;  %v532_v33 = vld [vmem:[%s3151_s1 + $0xf88] sm:$0xff] }
  0xf0   :  { %1147 = vmatpush.msra.mxu1 %v435_v34  ;;  %1187 = vmatpush.msra.mxu3 %v467_v35  ;;  %v596_v34 = vld.sshfl [vmem:[#allocation1 + $0x20] sm:$0xff pattern:$0x73625140]  ;;  %v598_v35 = vld.sshfl [vmem:[#allocation1 + $0x30] sm:$0xff pattern:$0x73625140] }
  0xf1   :  { %1148 = vmatmul.f32.vlgmr.msra.gmra.mxu1 %v593_v36  ;;  %1188 = vmatmul.f32.vlgmr.msra.gmra.mxu3 %v595_v37  ;;  %v499_v36 = vld [vmem:[%s3151_s1 + $0xe80] sm:$0xff] }
  0xf2   :  { %1193 = vmatpush.msrb.mxu0 %v497_v38  ;;  %1212 = vmatpush.msrb.mxu1 %v514_v39  ;;  %v531_v37 = vld [vmem:[%s3151_s1 + $0xf80] sm:$0xff]  ;;  %v597_v38 = vld.sshfl [vmem:[#allocation1 + $0x28] sm:$0xff pattern:$0x73625140] }
  0xf3   :  { %1233 = vmatpush.msrb.mxu2 %v529_v40  ;;  %1252 = vmatpush.msrb.mxu3 %v546_v41  ;;  %v599_v39 = vld.sshfl [vmem:[#allocation1 + $0x38] sm:$0xff pattern:$0x73625140]  ;;  %v1370_v40 = vld [vmem:[%s3152_s2] ss:$0 sm:$0xff]  ;;  %v649_v41 = vpop.f32.mrf.mxu0 }
  0xf4   :  { %1194 = vmatpush.msrb.mxu0 %v496_v42  ;;  %1213 = vmatpush.msrb.mxu1 %v513_v43  ;;  %v650_v42 = vadd.f32 %v1370_v40, %v649_v41  ;;  %v669_v43 = vpop.f32.mrf.mxu1  ;;  %v1325_v40 = vld [vmem:[%s3155_s5 + $0x68] sm:$0xff] }
  0xf5   :  { %1234 = vmatpush.msrb.mxu2 %v528_v44  ;;  %1253 = vmatpush.msrb.mxu3 %v545_v45  ;;  %v689_v45 = vpop.f32.mrf.mxu2 }
  0xf6   :  { %1195 = vmatpush.msrb.mxu0 %v495_v46  ;;  %1214 = vmatpush.msrb.mxu1 %v512_v47  ;;  %v670_v44 = vadd.f32 %v669_v43, %v650_v42  ;;  %v709_v47 = vpop.f32.mrf.mxu3  ;;  %v1324_v42 = vld [vmem:[%s3155_s5 + $0x60] sm:$0xff] }
  0xf7   :  { %1235 = vmatpush.msrb.mxu2 %v527_v48  ;;  %1254 = vmatpush.msrb.mxu3 %v544_v49 }
  0xf8   :  { %1196 = vmatpush.msrb.mxu0 %v494_v50  ;;  %1215 = vmatpush.msrb.mxu1 %v511_v51  ;;  %v690_v46 = vadd.f32 %v689_v45, %v670_v44  ;;  %v1323_v44 = vld [vmem:[%s3155_s5 + $0x58] sm:$0xff] }
  0xf9   :  { %1236 = vmatpush.msrb.mxu2 %v526_v52  ;;  %1255 = vmatpush.msrb.mxu3 %v543_v53 }
  0xfa   :  { %1197 = vmatpush.msrb.mxu0 %v493_v54  ;;  %1216 = vmatpush.msrb.mxu1 %v510_v55  ;;  %v710_v48 = vadd.f32 %v709_v47, %v690_v46  ;;  %v1322_v47 = vld [vmem:[%s3155_s5 + $0x50] sm:$0xff] }
  0xfb   :  { %1237 = vmatpush.msrb.mxu2 %v525_v56  ;;  %1256 = vmatpush.msrb.mxu3 %v542_v57  ;;  %v729_v49 = vpop.f32.mrf.mxu0 }
  0xfc   :  { %1198 = vmatpush.msrb.mxu0 %v492_v58  ;;  %1217 = vmatpush.msrb.mxu1 %v509_v59  ;;  %v730_v50 = vadd.f32 %v729_v49, %v710_v48  ;;  %v749_v51 = vpop.f32.mrf.mxu1  ;;  %v1321_v49 = vld [vmem:[%s3155_s5 + $0x48] sm:$0xff] }
  0xfd   :  { %1238 = vmatpush.msrb.mxu2 %v524_v60  ;;  %1257 = vmatpush.msrb.mxu3 %v541_v61  ;;  %v769_v53 = vpop.f32.mrf.mxu2  ;;  %v1287_v61 = vld [vmem:[%s3153_s3 + $0x78] sm:$0xff] }
  0xfe   :  { %1199 = vmatpush.msrb.mxu0 %v491_v62  ;;  %1218 = vmatpush.msrb.mxu1 %v508_v63  ;;  %v750_v52 = vadd.f32 %v749_v51, %v730_v50  ;;  %v789_v55 = vpop.f32.mrf.mxu3  ;;  %v1286_v62 = vld [vmem:[%s3153_s3 + $0x70] sm:$0xff]  ;;  %v1320_v51 = vld [vmem:[%s3155_s5 + $0x40] sm:$0xff] }
  0xff   :  { %1239 = vmatpush.msrb.mxu2 %v523_v0  ;;  %1258 = vmatpush.msrb.mxu3 %v540_v1  ;;  %v1285_v0 = vld [vmem:[%s3153_s3 + $0x68] sm:$0xff] }
 0x100   :  { %1200 = vmatpush.msrb.mxu0 %v490_v2  ;;  %1219 = vmatpush.msrb.mxu1 %v507_v3  ;;  %v770_v54 = vadd.f32 %v769_v53, %v750_v52  ;;  %v1284_v3 = vld [vmem:[%s3153_s3 + $0x60] sm:$0xff] }
 0x101   :  { %1240 = vmatpush.msrb.mxu2 %v522_v4  ;;  %1259 = vmatpush.msrb.mxu3 %v539_v5  ;;  %v1283_v5 = vld [vmem:[%s3153_s3 + $0x58] sm:$0xff] }
 0x102   :  { %1201 = vmatpush.msrb.mxu0 %v489_v6  ;;  %1220 = vmatpush.msrb.mxu1 %v506_v7  ;;  %v790_v57 = vadd.f32 %v789_v55, %v770_v54  ;;  %v1282_v7 = vld [vmem:[%s3153_s3 + $0x50] sm:$0xff]  ;;  %v1319_v54 = vld [vmem:[%s3155_s5 + $0x38] sm:$0xff] }
 0x103   :  { %1241 = vmatpush.msrb.mxu2 %v521_v8  ;;  %1260 = vmatpush.msrb.mxu3 %v538_v9  ;;  %v809_v56 = vpop.f32.mrf.mxu0 }
 0x104   :  { %1202 = vmatpush.msrb.mxu0 %v488_v10  ;;  %1221 = vmatpush.msrb.mxu1 %v505_v11  ;;  %v810_v58 = vadd.f32 %v809_v56, %v790_v57  ;;  %v829_v59 = vpop.f32.mrf.mxu1  ;;  %v1281_v10 = vld [vmem:[%s3153_s3 + $0x48] sm:$0xff]  ;;  %v1318_v56 = vld [vmem:[%s3155_s5 + $0x30] sm:$0xff] }
 0x105   :  { %1242 = vmatpush.msrb.mxu2 %v520_v12  ;;  %1261 = vmatpush.msrb.mxu3 %v537_v13  ;;  %v849_v60 = vpop.f32.mrf.mxu2  ;;  %v1280_v12 = vld [vmem:[%s3153_s3 + $0x40] sm:$0xff] }
 0x106   :  { %1203 = vmatpush.msrb.mxu0 %v487_v14  ;;  %1222 = vmatpush.msrb.mxu1 %v504_v15  ;;  %v830_v63 = vadd.f32 %v829_v59, %v810_v58  ;;  %v869_v2 = vpop.f32.mrf.mxu3  ;;  %v1279_v14 = vld [vmem:[%s3153_s3 + $0x38] sm:$0xff]  ;;  %v1317_v58 = vld [vmem:[%s3155_s5 + $0x28] sm:$0xff] }
 0x107   :  { %1243 = vmatpush.msrb.mxu2 %v519_v16  ;;  %1262 = vmatpush.msrb.mxu3 %v536_v17  ;;  %v1278_v17 = vld [vmem:[%s3153_s3 + $0x30] sm:$0xff] }
 0x108   :  { %1204 = vmatpush.msrb.mxu0 %v486_v18  ;;  %1223 = vmatpush.msrb.mxu1 %v503_v19  ;;  %v850_v1 = vadd.f32 %v849_v60, %v830_v63  ;;  %v1316_v60 = vld [vmem:[%s3155_s5 + $0x20] sm:$0xff]  ;;  %v1315_v63 = vld [vmem:[%s3155_s5 + $0x18] sm:$0xff] }
 0x109   :  { %1244 = vmatpush.msrb.mxu2 %v518_v20  ;;  %1263 = vmatpush.msrb.mxu3 %v535_v21 }
 0x10a   :  { %1205 = vmatpush.msrb.mxu0 %v485_v22  ;;  %1224 = vmatpush.msrb.mxu1 %v502_v23  ;;  %v870_v6 = vadd.f32 %v869_v2, %v850_v1  ;;  %v1277_v22 = vld [vmem:[%s3153_s3 + $0x28] sm:$0xff]  ;;  %v1314_v1 = vld [vmem:[%s3155_s5 + $0x10] sm:$0xff] }
 0x10b   :  { %1245 = vmatpush.msrb.mxu2 %v517_v24  ;;  %1264 = vmatpush.msrb.mxu3 %v534_v25  ;;  %v889_v4 = vpop.f32.mrf.mxu0  ;;  %v1276_v25 = vld [vmem:[%s3153_s3 + $0x20] sm:$0xff] }
 0x10c   :  { %1206 = vmatpush.msrb.mxu0 %v484_v26  ;;  %1225 = vmatpush.msrb.mxu1 %v501_v27  ;;  %v890_v8 = vadd.f32 %v889_v4, %v870_v6  ;;  %v909_v9 = vpop.f32.mrf.mxu1  ;;  %v1275_v27 = vld [vmem:[%s3153_s3 + $0x18] sm:$0xff] }
 0x10d   :  { %1246 = vmatpush.msrb.mxu2 %v516_v29  ;;  %1265 = vmatpush.msrb.mxu3 %v533_v30  ;;  %v929_v11 = vpop.f32.mrf.mxu2  ;;  %v1274_v30 = vld [vmem:[%s3153_s3 + $0x10] sm:$0xff] }
 0x10e   :  { %1207 = vmatpush.msrb.mxu0 %v483_v28  ;;  %1226 = vmatpush.msrb.mxu1 %v500_v32  ;;  %v910_v13 = vadd.f32 %v909_v9, %v890_v8  ;;  %v949_v16 = vpop.f32.mrf.mxu3  ;;  %v1312_v8 = vld [vmem:[%s3155_s5] sm:$0xff] }
 0x10f   :  { %1247 = vmatpush.msrb.mxu2 %v515_v31  ;;  %1266 = vmatpush.msrb.mxu3 %v532_v33  ;;  %v1273_v31 = vld [vmem:[%s3153_s3 + $0x8] sm:$0xff]  ;;  %v1371_v9 = vld [vmem:[%s3154_s4] ss:$0 sm:$0xff] }
 0x110   :  { %1208 = vmatmul.f32.vlgmr.msrb.gmra.mxu0 %v596_v34  ;;  %1248 = vmatmul.f32.vlgmr.msrb.gmra.mxu2 %v598_v35  ;;  %v930_v15 = vadd.f32 %v929_v11, %v910_v13  ;;  %v1272_v34 = vld [vmem:[%s3153_s3] sm:$0xff] }
 0x111   :  { %1227 = vmatpush.msrb.mxu1 %v499_v36  ;;  %1267 = vmatpush.msrb.mxu3 %v531_v37  ;;  %v1327_v36 = vld [vmem:[%s3155_s5 + $0x78] sm:$0xff]  ;;  %v1326_v37 = vld [vmem:[%s3155_s5 + $0x70] sm:$0xff] }
 0x112   :  { %1228 = vmatmul.f32.vlgmr.msrb.gmra.mxu1 %v597_v38  ;;  %1268 = vmatmul.f32.vlgmr.msrb.gmra.mxu3 %v599_v39  ;;  %v950_v19 = vadd.f32 %v949_v16, %v930_v15 }
 0x113   :  { %1292 = vmatpush.msra.mxu0 %v1287_v61  ;;  %1332 = vmatpush.msra.mxu1 %v1327_v36 }
 0x115   :  { %1293 = vmatpush.msra.mxu0 %v1286_v62  ;;  %1333 = vmatpush.msra.mxu1 %v1326_v37 }
 0x117   :  { %1294 = vmatpush.msra.mxu0 %v1285_v0  ;;  %1334 = vmatpush.msra.mxu1 %v1325_v40 }
 0x119   :  { %1295 = vmatpush.msra.mxu0 %v1284_v3  ;;  %1335 = vmatpush.msra.mxu1 %v1324_v42 }
 0x11b   :  { %1296 = vmatpush.msra.mxu0 %v1283_v5  ;;  %1336 = vmatpush.msra.mxu1 %v1323_v44 }
 0x11d   :  { %1297 = vmatpush.msra.mxu0 %v1282_v7  ;;  %1337 = vmatpush.msra.mxu1 %v1322_v47  ;;  %v1313_v7 = vld [vmem:[%s3155_s5 + $0x8] sm:$0xff] }
 0x11f   :  { %1298 = vmatpush.msra.mxu0 %v1281_v10  ;;  %1338 = vmatpush.msra.mxu1 %v1321_v49 }
 0x121   :  { %1299 = vmatpush.msra.mxu0 %v1280_v12  ;;  %1339 = vmatpush.msra.mxu1 %v1320_v51  ;;  %v1372_v12 = vld [vmem:[%s3156_s6] ss:$0 sm:$0xff] }
 0x123   :  { %1300 = vmatpush.msra.mxu0 %v1279_v14  ;;  %1340 = vmatpush.msra.mxu1 %v1319_v54 }
 0x125   :  { %1301 = vmatpush.msra.mxu0 %v1278_v17  ;;  %1341 = vmatpush.msra.mxu1 %v1318_v56 }
 0x127   :  { %v969_v18 = vpop.f32.mrf.mxu0  ;;  %1302 = vmatpush.msra.mxu0 %v1277_v22  ;;  %1342 = vmatpush.msra.mxu1 %v1317_v58 }
 0x128   :  { %v970_v20 = vadd.f32 %v969_v18, %v950_v19 }
 0x129   :  { %1303 = vmatpush.msra.mxu0 %v1276_v25  ;;  %1343 = vmatpush.msra.mxu1 %v1316_v60 }
 0x12a   :  { %v989_v21 = vpop.f32.mrf.mxu1 }
 0x12b   :  { %v990_v24 = vadd.f32 %v989_v21, %v970_v20  ;;  %1304 = vmatpush.msra.mxu0 %v1275_v27  ;;  %1344 = vmatpush.msra.mxu1 %v1315_v63 }
 0x12d   :  { %v1009_v23 = vpop.f32.mrf.mxu2  ;;  %1305 = vmatpush.msra.mxu0 %v1274_v30  ;;  %1345 = vmatpush.msra.mxu1 %v1314_v1 }
 0x12e   :  { %v1010_v26 = vadd.f32 %v1009_v23, %v990_v24 }
 0x12f   :  { %1306 = vmatpush.msra.mxu0 %v1273_v31  ;;  %1346 = vmatpush.msra.mxu1 %v1313_v7 }
 0x130   :  { %v1029_v29 = vpop.f32.mrf.mxu3 }
 0x131   :  { %v1030_v32 = vadd.f32 %v1029_v29, %v1010_v26  ;;  %1307 = vmatpush.msra.mxu0 %v1272_v34  ;;  %1347 = vmatpush.msra.mxu1 %v1312_v8 }
 0x149   :  { %v1049_v28 = vpop.f32.mrf.mxu0 }
 0x14a   :  { %v1050_v33 = vadd.f32 %v1049_v28, %v1030_v32 }
 0x14c   :  { %v1069_v35 = vpop.f32.mrf.mxu1 }
 0x14d   :  { %v1070_v39 = vadd.f32 %v1069_v35, %v1050_v33 }
 0x14f   :  { %v1089_v38 = vpop.f32.mrf.mxu2 }
 0x150   :  { %v1090_v41 = vadd.f32 %v1089_v38, %v1070_v39 }
 0x152   :  { %v1109_v43 = vpop.f32.mrf.mxu3 }
 0x153   :  { %v1110_v46 = vadd.f32 %v1109_v43, %v1090_v41 }
 0x16b   :  { %v1129_v45 = vpop.f32.mrf.mxu0 }
 0x16c   :  { %v1130_v48 = vadd.f32 %v1129_v45, %v1110_v46 }
 0x16e   :  { %v1149_v50 = vpop.f32.mrf.mxu1 }
 0x16f   :  { %v1150_v53 = vadd.f32 %v1149_v50, %v1130_v48 }
 0x171   :  { %v1169_v52 = vpop.f32.mrf.mxu2 }
 0x172   :  { %v1170_v55 = vadd.f32 %v1169_v52, %v1150_v53 }
 0x174   :  { %v1189_v57 = vpop.f32.mrf.mxu3 }
 0x175   :  { %v1190_v59 = vadd.f32 %v1189_v57, %v1170_v55 }
 0x18d   :  { %v1209_v61 = vpop.f32.mrf.mxu0 }
 0x18e   :  { %v1210_v62 = vadd.f32 %v1209_v61, %v1190_v59 }
 0x18f   :  { %v1229_v0 = vpop.f32.mrf.mxu1 }
 0x190   :  { %v1230_v2 = vadd.f32 %v1229_v0, %v1210_v62 }
 0x193   :  { %v1249_v3 = vpop.f32.mrf.mxu2 }
 0x194   :  { %v1250_v4 = vadd.f32 %v1249_v3, %v1230_v2 }
 0x195   :  { %v1269_v5 = vpop.f32.mrf.mxu3 }
 0x196   :  { %v1270_v6 = vadd.f32 %v1269_v5, %v1250_v4 }
 0x198   :  { %1308 = vmatmul.f32.vlgmr.msra.gmra.mxu0 %v1270_v6 }
 0x215   :  { %v1309_v10 = vpop.f32.mrf.mxu0 }
 0x216   :  { %v1310_v11 = vadd.f32 %v1371_v9, %v1309_v10 }
 0x218   :  { %1348 = vmatmul.f32.vlgmr.msra.gmra.mxu1 %v1310_v11 }
 0x295   :  { %v1349_v13 = vpop.f32.mrf.mxu1 }
 0x296   :  { %v1350_v14 = vadd.f32 %v1372_v12, %v1349_v13 }
 0x298   :  { %1352 = vst [vmem:[#allocation2] sm:$0x3] %v1350_v14 }
 0x299   :  { %1363 = dma.vmem_to_hbm [thread:$0]  %s1359_s14, 32, %s1361_s17, [#allocation3]  }
 0x29a   :  { %1397 = dma.done.wait [#allocation3], 32  }
 0x29b   :  { %1398 = vsyncadd [#allocation3], 4294967264 }
 0x29c   :  { %1368 = vsyncpa [#allocation3], 1 }

</bundles_post_ra>
